<compile_context>
chip_gen: v7x
topology: tpu7x:2x2x1
jax: 0.10.0
libtpu: 0.0.40
codegen_flags: <defaults>
</compile_context>

<pallas_src>
import functools

import jax
import jax.numpy as jnp
from jax.experimental import pallas as pl
from jax.experimental.pallas import tpu as pltpu


# ---------------------------------------------------------------------------
# Hardware-aware helpers
# ---------------------------------------------------------------------------
def _vmem_limit_bytes():
    """~70% of queried VMEM capacity (headroom for compiler-internal scratch)."""
    try:
        cap = int(pltpu.get_tpu_info().vmem_capacity_bytes)
    except Exception:
        cap = 64 << 20                       # conservative: v7x per-core VMEM
    return int(cap * 0.7)


def _num_tensorcores():
    try:
        info = pltpu.get_tpu_info()
        return int(getattr(info, "num_cores", getattr(info, "core_count", 1)) or 1)
    except Exception:
        return 1


def _select_tiles(B, T, F, H, H2=0, C=0, itemsize_x=4):
    """VMEM-aware (NB, Bc, TC) selection for the fused recurrence kernel."""
    G = 4 * H
    # Megacore batch split only when each half still feeds the MXU >=128 rows
    # (v7x).  On single-TC chips (v5e/v6e) this always yields NB=1.
    NB = 2 if (_num_tensorcores() >= 2 and B % 2 == 0 and B // 2 >= 128) else 1
    Bc = B // NB
    budget = int(_vmem_limit_bytes() * 0.85)

    def est(tc):
        b = 0
        b += 2 * tc * Bc * F * itemsize_x          # input block, double-buffered
        b += 2 * tc * Bc * H * 4                   # output block, double-buffered
        b += tc * Bc * G * 4                       # pre-gate scratch (f32)
        b += (F + H) * G * itemsize_x              # W_ih^T + W_hh^T (single-buffered)
        b += (G + H * H2 + H2 + H2 * C + C) * 4    # bias + head weights
        b += 4 * Bc * H * 4                        # h, c, acc scratch + slack
        return b

    tc_best = 1
    for tc in range(1, min(T, 64) + 1):            # largest divisor of T that fits
        if T % tc == 0 and est(tc) <= budget:
            tc_best = tc
    return NB, Bc, tc_best


def _const_spec(shape):
    """BlockSpec for a grid-invariant operand, single-buffered when supported."""
    nd = len(shape)
    idx = lambda b, t: (0,) * nd
    try:
        return pl.BlockSpec(shape, idx, pipeline_mode=pl.Buffered(1))
    except TypeError:                               # older BlockSpec signature
        return pl.BlockSpec(shape, idx)


# ---------------------------------------------------------------------------
# Shared per-chunk body: fused input projection + TC recurrence steps.
# ---------------------------------------------------------------------------
def _lstm_chunk(x_ref, wih_ref, bias_ref, whh_ref, pre_scr, h_scr, c_scr,
                compute_dtype, emit):
    TC, Bc, F = x_ref.shape
    H = whh_ref.shape[0]
    G = 4 * H

    # Chunk-wide input projection: one (TC*Bc, F) x (F, 4H) MXU matmul straight
    # into VMEM scratch -- no (B, T, 4H) HBM round trip.
    x2d = x_ref[...].reshape(TC * Bc, F)
    pre_scr[...] = (
        jnp.dot(x2d, wih_ref[...], preferred_element_type=jnp.float32)
        + bias_ref[...]
    ).reshape(TC, Bc, G)

    whh = whh_ref[...]
    # Per-gate weight slabs (static slices, hoisted) so every per-step dot is
    # (Bc,H)x(H,H) and its result is consumed immediately -> small live ranges.
    w_i = whh[:, 0 * H:1 * H]
    w_f = whh[:, 1 * H:2 * H]
    w_g = whh[:, 2 * H:3 * H]
    w_o = whh[:, 3 * H:4 * H]

    def step(s):
        pre_s = pre_scr[s]                          # (Bc, 4H) contiguous view
        h = h_scr[...].astype(compute_dtype)
        i_g = jax.nn.sigmoid(
            pre_s[:, 0 * H:1 * H]
            + jnp.dot(h, w_i, preferred_element_type=jnp.float32))
        f_g = jax.nn.sigmoid(
            pre_s[:, 1 * H:2 * H]
            + jnp.dot(h, w_f, preferred_element_type=jnp.float32))
        g_g = jnp.tanh(
            pre_s[:, 2 * H:3 * H]
            + jnp.dot(h, w_g, preferred_element_type=jnp.float32))
        o_g = jax.nn.sigmoid(
            pre_s[:, 3 * H:4 * H]
            + jnp.dot(h, w_o, preferred_element_type=jnp.float32))
        c_new = f_g * c_scr[...] + i_g * g_g        # cell state kept in f32
        h_new = o_g * jnp.tanh(c_new)
        c_scr[...] = c_new
        h_scr[...] = h_new
        emit(s, h_new)

    # Cap live ranges: fully unroll only short chunks; longer chunks use a
    # lightly-unrolled fori_loop so regalloc never sees the whole chunk.
    if TC <= 8:
        for s in range(TC):
            step(s)
    else:
        def body(s, carry):
            step(s)
            return carry
        jax.lax.fori_loop(0, TC, body, 0, unroll=2)


# ---------------------------------------------------------------------------
# Kernel 1: intermediate layers -> emit the hidden sequence, time-major blocks.
# ---------------------------------------------------------------------------
def _lstm_seq_kernel(x_ref, wih_ref, bias_ref, whh_ref, out_ref,
                     pre_scr, h_scr, c_scr, *, compute_dtype):
    t_idx = pl.program_id(1)

    @pl.when(t_idx == 0)
    def _():
        h_scr[...] = jnp.zeros_like(h_scr)
        c_scr[...] = jnp.zeros_like(c_scr)

    def emit(step, h_new):
        out_ref[step] = h_new.astype(out_ref.dtype)   # contiguous (Bc,H) store

    _lstm_chunk(x_ref, wih_ref, bias_ref, whh_ref, pre_scr, h_scr, c_scr,
                compute_dtype, emit)


def _lstm_layer_seq(x_tbf, w_ih_t, bias, w_hh_t, *, compute_dtype):
    T, B, F = x_tbf.shape
    H = w_hh_t.shape[0]
    G = 4 * H
    NB, Bc, TC = _select_tiles(
        B, T, F, H, itemsize_x=jnp.dtype(compute_dtype).itemsize)
    NT = T // TC

    kernel = functools.partial(_lstm_seq_kernel, compute_dtype=compute_dtype)
    return pl.pallas_call(
        kernel,
        out_shape=jax.ShapeDtypeStruct((T, B, H), compute_dtype),
        grid_spec=pltpu.PrefetchScalarGridSpec(
            num_scalar_prefetch=0,
            grid=(NB, NT),
            in_specs=[
                pl.BlockSpec((TC, Bc, F), lambda b, t: (t, b, 0)),
                _const_spec((F, G)),
                _const_spec((1, G)),
                _const_spec((H, G)),
            ],
            out_specs=pl.BlockSpec((TC, Bc, H), lambda b, t: (t, b, 0)),
            scratch_shapes=[
                pltpu.VMEM((TC, Bc, G), jnp.float32),   # chunk pre-gates
                pltpu.VMEM((Bc, H), jnp.float32),       # h
                pltpu.VMEM((Bc, H), jnp.float32),       # c
            ],
        ),
        compiler_params=pltpu.CompilerParams(
            dimension_semantics=("parallel", "arbitrary"),
            vmem_limit_bytes=_vmem_limit_bytes()),
    )(x_tbf, w_ih_t, bias, w_hh_t)


# ---------------------------------------------------------------------------
# Kernel 2: last layer -> recurrence fused with temporal mean + MLP head.
# ---------------------------------------------------------------------------
def _lstm_final_kernel(x_ref, wih_ref, bias_ref, whh_ref,
                       w1_ref, b1_ref, w2_ref, b2_ref, out_ref,
                       pre_scr, h_scr, c_scr, acc_scr, *, inv_t, compute_dtype):
    t_idx = pl.program_id(1)

    @pl.when(t_idx == 0)
    def _():
        h_scr[...] = jnp.zeros_like(h_scr)
        c_scr[...] = jnp.zeros_like(c_scr)
        acc_scr[...] = jnp.zeros_like(acc_scr)

    def emit(step, h_new):
        acc_scr[...] = acc_scr[...] + h_new           # running temporal sum

    _lstm_chunk(x_ref, wih_ref, bias_ref, whh_ref, pre_scr, h_scr, c_scr,
                compute_dtype, emit)

    # Accumulator pattern: out index map is constant along the time axis so
    # the output block stays resident in VMEM and is written once at the last
    # chunk.  The time axis MUST therefore stay "arbitrary" (sequential).
    @pl.when(t_idx == pl.num_programs(1) - 1)
    def _():
        mean = acc_scr[...] * inv_t                                   # (Bc, H)
        h1 = jnp.maximum(
            jnp.dot(mean, w1_ref[...], preferred_element_type=jnp.float32)
            + b1_ref[...], 0.0)                                       # Linear+ReLU
        # TODO(synk): nn.Dropout omitted (inference/eval semantics -> identity).
        out_ref[0] = (
            jnp.dot(h1, w2_ref[...], preferred_element_type=jnp.float32)
            + b2_ref[...]).astype(out_ref.dtype)


def _lstm_layer_final(x_tbf, w_ih_t, bias, w_hh_t, w1_t, b1, w2_t, b2,
                      *, compute_dtype):
    T, B, F = x_tbf.shape
    H = w_hh_t.shape[0]
    G = 4 * H
    H2 = w1_t.shape[1]
    C = w2_t.shape[1]
    NB, Bc, TC = _select_tiles(
        B, T, F, H, H2=H2, C=C, itemsize_x=jnp.dtype(compute_dtype).itemsize)
    NT = T // TC

    kernel = functools.partial(_lstm_final_kernel, inv_t=1.0 / T,
                               compute_dtype=compute_dtype)
    out = pl.pallas_call(
        kernel,
        out_shape=jax.ShapeDtypeStruct((NB, Bc, C), jnp.float32),
        grid_spec=pltpu.PrefetchScalarGridSpec(
            num_scalar_prefetch=0,
            grid=(NB, NT),
            in_specs=[
                pl.BlockSpec((TC, Bc, F), lambda b, t: (t, b, 0)),
                _const_spec((F, G)),
                _const_spec((1, G)),
                _const_spec((H, G)),
                _const_spec((H, H2)),
                _const_spec((1, H2)),
                _const_spec((H2, C)),
                _const_spec((1, C)),
            ],
            out_specs=pl.BlockSpec((1, Bc, C), lambda b, t: (b, 0, 0)),
            scratch_shapes=[
                pltpu.VMEM((TC, Bc, G), jnp.float32),   # chunk pre-gates
                pltpu.VMEM((Bc, H), jnp.float32),       # h
                pltpu.VMEM((Bc, H), jnp.float32),       # c
                pltpu.VMEM((Bc, H), jnp.float32),       # temporal-sum accumulator
            ],
        ),
        compiler_params=pltpu.CompilerParams(
            dimension_semantics=("parallel", "arbitrary"),
            vmem_limit_bytes=_vmem_limit_bytes()),
    )(x_tbf, w_ih_t, bias, w_hh_t, w1_t, b1, w2_t, b2)
    return out.reshape(B, C)


# ---------------------------------------------------------------------------
# Full model forward (batch_first interface, like the PyTorch module)
# ---------------------------------------------------------------------------
def lstm_relu_forward(batch_btf, params, compute_dtype=jnp.float32):
    """batch_btf: (B, T, idim) batch-first -> (B, num_classes) logits.

    compute_dtype=jnp.bfloat16 is the recommended setting on v6e/v7x (bf16 MXU
    operands/activations, f32 accumulation, f32 cell state); default f32
    matches the PyTorch reference bit-for-bit-ish.
    """
    # Single upfront transpose to time-major (T, B, F); everything downstream
    # runs time-major so per-step accesses inside the kernels are contiguous.
    x = jnp.transpose(batch_btf, (1, 0, 2)).astype(compute_dtype)
    nlay = len(params["lstm"])
    out = None
    for l, layer in enumerate(params["lstm"]):
        w_ih_t = layer["w_ih_t"].astype(compute_dtype)
        w_hh_t = layer["w_hh_t"].astype(compute_dtype)
        if l < nlay - 1:
            x = _lstm_layer_seq(x, w_ih_t, layer["bias"], w_hh_t,
                                compute_dtype=compute_dtype)
        else:
            out = _lstm_layer_final(x, w_ih_t, layer["bias"], w_hh_t,
                                    params["w1_t"], params["b1"],
                                    params["w2_t"], params["b2"],
                                    compute_dtype=compute_dtype)
    return out


def init_params(key, idim, num_classes, nhu, nhu2, nlay):
    """Weights stored pre-transposed / bias pre-fused (kernel-ready layout)."""
    params = {"lstm": []}
    k = key
    scale = 1.0 / (nhu ** 0.5)
    for l in range(nlay):
        in_f = idim if l == 0 else nhu
        k, k1, k2, k3, k4 = jax.random.split(k, 5)
        w_ih = jax.random.uniform(k1, (4 * nhu, in_f), jnp.float32, -scale, scale)
        w_hh = jax.random.uniform(k2, (4 * nhu, nhu), jnp.float32, -scale, scale)
        b_ih = jax.random.uniform(k3, (4 * nhu,), jnp.float32, -scale, scale)
        b_hh = jax.random.uniform(k4, (4 * nhu,), jnp.float32, -scale, scale)
        params["lstm"].append({
            "w_ih_t": jnp.transpose(w_ih),                 # (F, 4H)
            "w_hh_t": jnp.transpose(w_hh),                 # (H, 4H)
            "bias": (b_ih + b_hh).reshape(1, 4 * nhu),     # (1, 4H)
        })
    k, k1, k2, k3, k4 = jax.random.split(k, 5)
    s1 = 1.0 / (nhu ** 0.5)
    s2 = 1.0 / (nhu2 ** 0.5)
    w1 = jax.random.uniform(k1, (nhu2, nhu), jnp.float32, -s1, s1)
    b1 = jax.random.uniform(k2, (nhu2,), jnp.float32, -s1, s1)
    w2 = jax.random.uniform(k3, (num_classes, nhu2), jnp.float32, -s2, s2)
    b2 = jax.random.uniform(k4, (num_classes,), jnp.float32, -s2, s2)
    params["w1_t"] = jnp.transpose(w1)                     # (H, H2)
    params["b1"] = b1.reshape(1, nhu2)
    params["w2_t"] = jnp.transpose(w2)                     # (H2, C)
    params["b2"] = b2.reshape(1, num_classes)
    return params


# Pure-JAX reference (same math) for a sanity check.
def _reference(batch_btf, params):
    x = jnp.transpose(batch_btf, (1, 0, 2)).astype(jnp.float32)
    T, B, _ = x.shape
    for layer in params["lstm"]:
        H = layer["w_hh_t"].shape[0]

        def step(carry, x_t, layer=layer):
            h, c = carry
            g = x_t @ layer["w_ih_t"] + h @ layer["w_hh_t"] + layer["bias"]
            i, f, gg, o = jnp.split(g, 4, axis=-1)
            c = jax.nn.sigmoid(f) * c + jax.nn.sigmoid(i) * jnp.tanh(gg)
            h = jax.nn.sigmoid(o) * jnp.tanh(c)
            return (h, c), h

        init = (jnp.zeros((B, H)), jnp.zeros((B, H)))
        _, x = jax.lax.scan(step, init, x)
    m = jnp.mean(x, axis=0)
    h1 = jnp.maximum(m @ params["w1_t"] + params["b1"], 0.0)
    return h1 @ params["w2_t"] + params["b2"]


if __name__ == "__main__":
    B, T, idim = 2, 8, 16
    nhu, nhu2, num_classes, nlay = 32, 32, 8, 2

    key = jax.random.PRNGKey(0)
    kp, kx = jax.random.split(key)
    params = init_params(kp, idim, num_classes, nhu, nhu2, nlay)
    batch = jax.random.normal(kx, (B, T, idim), jnp.float32)

    # f32 path: must match the pure-JAX reference tightly.
    out = jax.block_until_ready(jax.jit(lstm_relu_forward)(batch, params))
    ref = jax.block_until_ready(_reference(batch, params))
    assert out.shape == (B, num_classes)
    assert jnp.allclose(out, ref, atol=1e-4, rtol=1e-4), \
        float(jnp.max(jnp.abs(out - ref)))

    # bf16 gate-math path (recommended on v6e/v7x): smoke test only.
    out_bf16 = jax.block_until_ready(
        jax.jit(functools.partial(lstm_relu_forward,
                                  compute_dtype=jnp.bfloat16))(batch, params))
    assert out_bf16.shape == (B, num_classes)
    assert bool(jnp.all(jnp.isfinite(out_bf16)))

    print("KERNEL_OK")
</pallas_src>

<mosaic_0001>
module attributes {stable_mosaic.version = 11 : i64} {
  func.func @_lstm_seq_kernel(%arg0: i32, %arg1: i32, %arg2: memref<8x2x16xf32, #tpu.memory_space<vmem>>, %arg3: memref<16x128xf32, #tpu.memory_space<vmem>>, %arg4: memref<1x128xf32, #tpu.memory_space<vmem>>, %arg5: memref<32x128xf32, #tpu.memory_space<vmem>>, %arg6: memref<8x2x32xf32, #tpu.memory_space<vmem>>, %arg7: memref<8x2x128xf32, #tpu.memory_space<vmem>>, %arg8: memref<2x32xf32, #tpu.memory_space<vmem>>, %arg9: memref<2x32xf32, #tpu.memory_space<vmem>>) attributes {dimension_semantics = [#tpu.dimension_semantics<parallel>, #tpu.dimension_semantics<arbitrary>], iteration_bounds = array<i64: 1, 1>, scalar_prefetch = 0 : i64, scratch_operands = 3 : i64, tpu.core_type = #tpu.core_type<tc>, window_params = [{transform_indices = @transform_0, window_bounds = array<i64: 8, 2, 16>}, {pipeline_mode = #tpu.pipeline_mode<synchronous>, transform_indices = @transform_1, window_bounds = array<i64: 16, 128>}, {pipeline_mode = #tpu.pipeline_mode<synchronous>, transform_indices = @transform_2, window_bounds = array<i64: 1, 128>}, {pipeline_mode = #tpu.pipeline_mode<synchronous>, transform_indices = @transform_3, window_bounds = array<i64: 32, 128>}, {transform_indices = @transform_4, window_bounds = array<i64: 8, 2, 32>}]} {
    %c0_i32 = arith.constant 0 : i32
    %0 = arith.cmpi eq, %arg1, %c0_i32 : i32
    %1 = arith.extui %0 : i1 to i32
    %c0_i32_0 = arith.constant 0 : i32
    %2 = arith.cmpi ne, %1, %c0_i32_0 : i32
    scf.if %2 {
      %cst_173 = arith.constant 0.000000e+00 : f32
      %353 = vector.broadcast %cst_173 : f32 to vector<2x32xf32>
      %c0_174 = arith.constant 0 : index
      %c0_175 = arith.constant 0 : index
      %354 = vector.load %arg8[%c0_174, %c0_175] : memref<2x32xf32, #tpu.memory_space<vmem>>, vector<2x32xf32>
      tpu.vector_store %arg8[%c0_174, %c0_175], %353 {strides = array<i32>} : memref<2x32xf32, #tpu.memory_space<vmem>>, vector<2x32xf32>,
      %cst_176 = arith.constant 0.000000e+00 : f32
      %355 = vector.broadcast %cst_176 : f32 to vector<2x32xf32>
      %c0_177 = arith.constant 0 : index
      %c0_178 = arith.constant 0 : index
      %356 = vector.load %arg9[%c0_177, %c0_178] : memref<2x32xf32, #tpu.memory_space<vmem>>, vector<2x32xf32>
      tpu.vector_store %arg9[%c0_177, %c0_178], %355 {strides = array<i32>} : memref<2x32xf32, #tpu.memory_space<vmem>>, vector<2x32xf32>,
    } else {
    }
    %c0 = arith.constant 0 : index
    %c0_1 = arith.constant 0 : index
    %c0_2 = arith.constant 0 : index
    %3 = vector.load %arg2[%c0, %c0_1, %c0_2] : memref<8x2x16xf32, #tpu.memory_space<vmem>>, vector<8x2x16xf32>
    %4 = vector.shape_cast %3 : vector<8x2x16xf32> to vector<16x16xf32>
    %c0_3 = arith.constant 0 : index
    %c0_4 = arith.constant 0 : index
    %5 = vector.load %arg3[%c0_3, %c0_4] : memref<16x128xf32, #tpu.memory_space<vmem>>, vector<16x128xf32>
    %cst = arith.constant dense<0.000000e+00> : vector<16x128xf32>
    %6 = tpu.matmul %4, %5, %cst {dimension_numbers = #tpu.dot_dimension_numbers<[1], [0], [0], [1], [0, 0, 1, 1], [], []>} : vector<16x16xf32>, vector<16x128xf32>, vector<16x128xf32> -> vector<16x128xf32>
    %c0_5 = arith.constant 0 : index
    %c0_6 = arith.constant 0 : index
    %7 = vector.load %arg4[%c0_5, %c0_6] : memref<1x128xf32, #tpu.memory_space<vmem>>, vector<1x128xf32>
    %8 = vector.broadcast %7 : vector<1x128xf32> to vector<16x128xf32>
    %9 = arith.addf %6, %8 : vector<16x128xf32>
    %10 = vector.shape_cast %9 : vector<16x128xf32> to vector<8x2x128xf32>
    %c0_7 = arith.constant 0 : index
    %c0_8 = arith.constant 0 : index
    %c0_9 = arith.constant 0 : index
    %11 = vector.load %arg7[%c0_7, %c0_8, %c0_9] : memref<8x2x128xf32, #tpu.memory_space<vmem>>, vector<8x2x128xf32>
    tpu.vector_store %arg7[%c0_7, %c0_8, %c0_9], %10 {strides = array<i32>} : memref<8x2x128xf32, #tpu.memory_space<vmem>>, vector<8x2x128xf32>,
    %c0_10 = arith.constant 0 : index
    %c0_11 = arith.constant 0 : index
    %12 = vector.load %arg5[%c0_10, %c0_11] : memref<32x128xf32, #tpu.memory_space<vmem>>, vector<32x128xf32>
    %13 = vector.extract_strided_slice %12 {offsets = [0, 0], sizes = [32, 32], strides = [1, 1]} : vector<32x128xf32> to vector<32x32xf32>
    %14 = vector.extract_strided_slice %12 {offsets = [0, 32], sizes = [32, 32], strides = [1, 1]} : vector<32x128xf32> to vector<32x32xf32>
    %15 = vector.extract_strided_slice %12 {offsets = [0, 64], sizes = [32, 32], strides = [1, 1]} : vector<32x128xf32> to vector<32x32xf32>
    %16 = vector.extract_strided_slice %12 {offsets = [0, 96], sizes = [32, 32], strides = [1, 1]} : vector<32x128xf32> to vector<32x32xf32>
    %c0_12 = arith.constant 0 : index
    %c0_13 = arith.constant 0 : index
    %c0_14 = arith.constant 0 : index
    %17 = vector.load %arg7[%c0_12, %c0_13, %c0_14] : memref<8x2x128xf32, #tpu.memory_space<vmem>>, vector<1x2x128xf32>
    %18 = vector.shape_cast %17 : vector<1x2x128xf32> to vector<2x128xf32>
    %c0_15 = arith.constant 0 : index
    %c0_16 = arith.constant 0 : index
    %19 = vector.load %arg8[%c0_15, %c0_16] : memref<2x32xf32, #tpu.memory_space<vmem>>, vector<2x32xf32>
    %20 = vector.extract_strided_slice %18 {offsets = [0, 0], sizes = [2, 32], strides = [1, 1]} : vector<2x128xf32> to vector<2x32xf32>
    %cst_17 = arith.constant dense<0.000000e+00> : vector<2x32xf32>
    %21 = tpu.matmul %19, %13, %cst_17 {dimension_numbers = #tpu.dot_dimension_numbers<[1], [0], [0], [1], [0, 0, 1, 1], [], []>} : vector<2x32xf32>, vector<32x32xf32>, vector<2x32xf32> -> vector<2x32xf32>
    %22 = arith.addf %20, %21 : vector<2x32xf32>
    %23 = arith.negf %22 : vector<2x32xf32>
    %24 = math.exp %23 : vector<2x32xf32>
    %cst_18 = arith.constant 1.000000e+00 : f32
    %25 = vector.broadcast %cst_18 : f32 to vector<2x32xf32>
    %26 = arith.addf %25, %24 : vector<2x32xf32>
    %27 = arith.divf %25, %26 : vector<2x32xf32>
    %28 = vector.extract_strided_slice %18 {offsets = [0, 32], sizes = [2, 32], strides = [1, 1]} : vector<2x128xf32> to vector<2x32xf32>
    %cst_19 = arith.constant dense<0.000000e+00> : vector<2x32xf32>
    %29 = tpu.matmul %19, %14, %cst_19 {dimension_numbers = #tpu.dot_dimension_numbers<[1], [0], [0], [1], [0, 0, 1, 1], [], []>} : vector<2x32xf32>, vector<32x32xf32>, vector<2x32xf32> -> vector<2x32xf32>
    %30 = arith.addf %28, %29 : vector<2x32xf32>
    %31 = arith.negf %30 : vector<2x32xf32>
    %32 = math.exp %31 : vector<2x32xf32>
    %cst_20 = arith.constant 1.000000e+00 : f32
    %33 = vector.broadcast %cst_20 : f32 to vector<2x32xf32>
    %34 = arith.addf %33, %32 : vector<2x32xf32>
    %35 = arith.divf %33, %34 : vector<2x32xf32>
    %36 = vector.extract_strided_slice %18 {offsets = [0, 64], sizes = [2, 32], strides = [1, 1]} : vector<2x128xf32> to vector<2x32xf32>
    %cst_21 = arith.constant dense<0.000000e+00> : vector<2x32xf32>
    %37 = tpu.matmul %19, %15, %cst_21 {dimension_numbers = #tpu.dot_dimension_numbers<[1], [0], [0], [1], [0, 0, 1, 1], [], []>} : vector<2x32xf32>, vector<32x32xf32>, vector<2x32xf32> -> vector<2x32xf32>
    %38 = arith.addf %36, %37 : vector<2x32xf32>
    %39 = math.tanh %38 : vector<2x32xf32>
    %40 = vector.extract_strided_slice %18 {offsets = [0, 96], sizes = [2, 32], strides = [1, 1]} : vector<2x128xf32> to vector<2x32xf32>
    %cst_22 = arith.constant dense<0.000000e+00> : vector<2x32xf32>
    %41 = tpu.matmul %19, %16, %cst_22 {dimension_numbers = #tpu.dot_dimension_numbers<[1], [0], [0], [1], [0, 0, 1, 1], [], []>} : vector<2x32xf32>, vector<32x32xf32>, vector<2x32xf32> -> vector<2x32xf32>
    %42 = arith.addf %40, %41 : vector<2x32xf32>
    %43 = arith.negf %42 : vector<2x32xf32>
    %44 = math.exp %43 : vector<2x32xf32>
    %cst_23 = arith.constant 1.000000e+00 : f32
    %45 = vector.broadcast %cst_23 : f32 to vector<2x32xf32>
    %46 = arith.addf %45, %44 : vector<2x32xf32>
    %47 = arith.divf %45, %46 : vector<2x32xf32>
    %c0_24 = arith.constant 0 : index
    %c0_25 = arith.constant 0 : index
    %48 = vector.load %arg9[%c0_24, %c0_25] : memref<2x32xf32, #tpu.memory_space<vmem>>, vector<2x32xf32>
    %49 = arith.mulf %35, %48 : vector<2x32xf32>
    %50 = arith.mulf %27, %39 : vector<2x32xf32>
    %51 = arith.addf %49, %50 : vector<2x32xf32>
    %52 = math.tanh %51 : vector<2x32xf32>
    %53 = arith.mulf %47, %52 : vector<2x32xf32>
    %c0_26 = arith.constant 0 : index
    %c0_27 = arith.constant 0 : index
    %54 = vector.load %arg9[%c0_26, %c0_27] : memref<2x32xf32, #tpu.memory_space<vmem>>, vector<2x32xf32>
    tpu.vector_store %arg9[%c0_26, %c0_27], %51 {strides = array<i32>} : memref<2x32xf32, #tpu.memory_space<vmem>>, vector<2x32xf32>,
    %c0_28 = arith.constant 0 : index
    %c0_29 = arith.constant 0 : index
    %55 = vector.load %arg8[%c0_28, %c0_29] : memref<2x32xf32, #tpu.memory_space<vmem>>, vector<2x32xf32>
    tpu.vector_store %arg8[%c0_28, %c0_29], %53 {strides = array<i32>} : memref<2x32xf32, #tpu.memory_space<vmem>>, vector<2x32xf32>,
    %c0_30 = arith.constant 0 : index
    %c0_31 = arith.constant 0 : index
    %c0_32 = arith.constant 0 : index
    %56 = vector.load %arg6[%c0_30, %c0_31, %c0_32] : memref<8x2x32xf32, #tpu.memory_space<vmem>>, vector<1x2x32xf32>
    %57 = vector.shape_cast %56 : vector<1x2x32xf32> to vector<2x32xf32>
    %58 = vector.shape_cast %53 : vector<2x32xf32> to vector<1x2x32xf32>
    tpu.vector_store %arg6[%c0_30, %c0_31, %c0_32], %58 {strides = array<i32>} : memref<8x2x32xf32, #tpu.memory_space<vmem>>, vector<1x2x32xf32>,
    %c1 = arith.constant 1 : index
    %c0_33 = arith.constant 0 : index
    %c0_34 = arith.constant 0 : index
    %59 = vector.load %arg7[%c1, %c0_33, %c0_34] : memref<8x2x128xf32, #tpu.memory_space<vmem>>, vector<1x2x128xf32>
    %60 = vector.shape_cast %59 : vector<1x2x128xf32> to vector<2x128xf32>
    %c0_35 = arith.constant 0 : index
    %c0_36 = arith.constant 0 : index
    %61 = vector.load %arg8[%c0_35, %c0_36] : memref<2x32xf32, #tpu.memory_space<vmem>>, vector<2x32xf32>
    %62 = vector.extract_strided_slice %60 {offsets = [0, 0], sizes = [2, 32], strides = [1, 1]} : vector<2x128xf32> to vector<2x32xf32>
    %cst_37 = arith.constant dense<0.000000e+00> : vector<2x32xf32>
    %63 = tpu.matmul %61, %13, %cst_37 {dimension_numbers = #tpu.dot_dimension_numbers<[1], [0], [0], [1], [0, 0, 1, 1], [], []>} : vector<2x32xf32>, vector<32x32xf32>, vector<2x32xf32> -> vector<2x32xf32>
    %64 = arith.addf %62, %63 : vector<2x32xf32>
    %65 = arith.negf %64 : vector<2x32xf32>
    %66 = math.exp %65 : vector<2x32xf32>
    %cst_38 = arith.constant 1.000000e+00 : f32
    %67 = vector.broadcast %cst_38 : f32 to vector<2x32xf32>
    %68 = arith.addf %67, %66 : vector<2x32xf32>
    %69 = arith.divf %67, %68 : vector<2x32xf32>
    %70 = vector.extract_strided_slice %60 {offsets = [0, 32], sizes = [2, 32], strides = [1, 1]} : vector<2x128xf32> to vector<2x32xf32>
    %cst_39 = arith.constant dense<0.000000e+00> : vector<2x32xf32>
    %71 = tpu.matmul %61, %14, %cst_39 {dimension_numbers = #tpu.dot_dimension_numbers<[1], [0], [0], [1], [0, 0, 1, 1], [], []>} : vector<2x32xf32>, vector<32x32xf32>, vector<2x32xf32> -> vector<2x32xf32>
    %72 = arith.addf %70, %71 : vector<2x32xf32>
    %73 = arith.negf %72 : vector<2x32xf32>
    %74 = math.exp %73 : vector<2x32xf32>
    %cst_40 = arith.constant 1.000000e+00 : f32
    %75 = vector.broadcast %cst_40 : f32 to vector<2x32xf32>
    %76 = arith.addf %75, %74 : vector<2x32xf32>
    %77 = arith.divf %75, %76 : vector<2x32xf32>
    %78 = vector.extract_strided_slice %60 {offsets = [0, 64], sizes = [2, 32], strides = [1, 1]} : vector<2x128xf32> to vector<2x32xf32>
    %cst_41 = arith.constant dense<0.000000e+00> : vector<2x32xf32>
    %79 = tpu.matmul %61, %15, %cst_41 {dimension_numbers = #tpu.dot_dimension_numbers<[1], [0], [0], [1], [0, 0, 1, 1], [], []>} : vector<2x32xf32>, vector<32x32xf32>, vector<2x32xf32> -> vector<2x32xf32>
    %80 = arith.addf %78, %79 : vector<2x32xf32>
    %81 = math.tanh %80 : vector<2x32xf32>
    %82 = vector.extract_strided_slice %60 {offsets = [0, 96], sizes = [2, 32], strides = [1, 1]} : vector<2x128xf32> to vector<2x32xf32>
    %cst_42 = arith.constant dense<0.000000e+00> : vector<2x32xf32>
    %83 = tpu.matmul %61, %16, %cst_42 {dimension_numbers = #tpu.dot_dimension_numbers<[1], [0], [0], [1], [0, 0, 1, 1], [], []>} : vector<2x32xf32>, vector<32x32xf32>, vector<2x32xf32> -> vector<2x32xf32>
    %84 = arith.addf %82, %83 : vector<2x32xf32>
    %85 = arith.negf %84 : vector<2x32xf32>
    %86 = math.exp %85 : vector<2x32xf32>
    %cst_43 = arith.constant 1.000000e+00 : f32
    %87 = vector.broadcast %cst_43 : f32 to vector<2x32xf32>
    %88 = arith.addf %87, %86 : vector<2x32xf32>
    %89 = arith.divf %87, %88 : vector<2x32xf32>
    %c0_44 = arith.constant 0 : index
    %c0_45 = arith.constant 0 : index
    %90 = vector.load %arg9[%c0_44, %c0_45] : memref<2x32xf32, #tpu.memory_space<vmem>>, vector<2x32xf32>
    %91 = arith.mulf %77, %90 : vector<2x32xf32>
    %92 = arith.mulf %69, %81 : vector<2x32xf32>
    %93 = arith.addf %91, %92 : vector<2x32xf32>
    %94 = math.tanh %93 : vector<2x32xf32>
    %95 = arith.mulf %89, %94 : vector<2x32xf32>
    %c0_46 = arith.constant 0 : index
    %c0_47 = arith.constant 0 : index
    %96 = vector.load %arg9[%c0_46, %c0_47] : memref<2x32xf32, #tpu.memory_space<vmem>>, vector<2x32xf32>
    tpu.vector_store %arg9[%c0_46, %c0_47], %93 {strides = array<i32>} : memref<2x32xf32, #tpu.memory_space<vmem>>, vector<2x32xf32>,
    %c0_48 = arith.constant 0 : index
    %c0_49 = arith.constant 0 : index
    %97 = vector.load %arg8[%c0_48, %c0_49] : memref<2x32xf32, #tpu.memory_space<vmem>>, vector<2x32xf32>
    tpu.vector_store %arg8[%c0_48, %c0_49], %95 {strides = array<i32>} : memref<2x32xf32, #tpu.memory_space<vmem>>, vector<2x32xf32>,
    %c1_50 = arith.constant 1 : index
    %c0_51 = arith.constant 0 : index
    %c0_52 = arith.constant 0 : index
    %98 = vector.load %arg6[%c1_50, %c0_51, %c0_52] : memref<8x2x32xf32, #tpu.memory_space<vmem>>, vector<1x2x32xf32>
    %99 = vector.shape_cast %98 : vector<1x2x32xf32> to vector<2x32xf32>
    %100 = vector.shape_cast %95 : vector<2x32xf32> to vector<1x2x32xf32>
    tpu.vector_store %arg6[%c1_50, %c0_51, %c0_52], %100 {strides = array<i32>} : memref<8x2x32xf32, #tpu.memory_space<vmem>>, vector<1x2x32xf32>,
    %c2 = arith.constant 2 : index
    %c0_53 = arith.constant 0 : index
    %c0_54 = arith.constant 0 : index
    %101 = vector.load %arg7[%c2, %c0_53, %c0_54] : memref<8x2x128xf32, #tpu.memory_space<vmem>>, vector<1x2x128xf32>
    %102 = vector.shape_cast %101 : vector<1x2x128xf32> to vector<2x128xf32>
    %c0_55 = arith.constant 0 : index
    %c0_56 = arith.constant 0 : index
    %103 = vector.load %arg8[%c0_55, %c0_56] : memref<2x32xf32, #tpu.memory_space<vmem>>, vector<2x32xf32>
    %104 = vector.extract_strided_slice %102 {offsets = [0, 0], sizes = [2, 32], strides = [1, 1]} : vector<2x128xf32> to vector<2x32xf32>
    %cst_57 = arith.constant dense<0.000000e+00> : vector<2x32xf32>
    %105 = tpu.matmul %103, %13, %cst_57 {dimension_numbers = #tpu.dot_dimension_numbers<[1], [0], [0], [1], [0, 0, 1, 1], [], []>} : vector<2x32xf32>, vector<32x32xf32>, vector<2x32xf32> -> vector<2x32xf32>
    %106 = arith.addf %104, %105 : vector<2x32xf32>
    %107 = arith.negf %106 : vector<2x32xf32>
    %108 = math.exp %107 : vector<2x32xf32>
    %cst_58 = arith.constant 1.000000e+00 : f32
    %109 = vector.broadcast %cst_58 : f32 to vector<2x32xf32>
    %110 = arith.addf %109, %108 : vector<2x32xf32>
    %111 = arith.divf %109, %110 : vector<2x32xf32>
    %112 = vector.extract_strided_slice %102 {offsets = [0, 32], sizes = [2, 32], strides = [1, 1]} : vector<2x128xf32> to vector<2x32xf32>
    %cst_59 = arith.constant dense<0.000000e+00> : vector<2x32xf32>
    %113 = tpu.matmul %103, %14, %cst_59 {dimension_numbers = #tpu.dot_dimension_numbers<[1], [0], [0], [1], [0, 0, 1, 1], [], []>} : vector<2x32xf32>, vector<32x32xf32>, vector<2x32xf32> -> vector<2x32xf32>
    %114 = arith.addf %112, %113 : vector<2x32xf32>
    %115 = arith.negf %114 : vector<2x32xf32>
    %116 = math.exp %115 : vector<2x32xf32>
    %cst_60 = arith.constant 1.000000e+00 : f32
    %117 = vector.broadcast %cst_60 : f32 to vector<2x32xf32>
    %118 = arith.addf %117, %116 : vector<2x32xf32>
    %119 = arith.divf %117, %118 : vector<2x32xf32>
    %120 = vector.extract_strided_slice %102 {offsets = [0, 64], sizes = [2, 32], strides = [1, 1]} : vector<2x128xf32> to vector<2x32xf32>
    %cst_61 = arith.constant dense<0.000000e+00> : vector<2x32xf32>
    %121 = tpu.matmul %103, %15, %cst_61 {dimension_numbers = #tpu.dot_dimension_numbers<[1], [0], [0], [1], [0, 0, 1, 1], [], []>} : vector<2x32xf32>, vector<32x32xf32>, vector<2x32xf32> -> vector<2x32xf32>
    %122 = arith.addf %120, %121 : vector<2x32xf32>
    %123 = math.tanh %122 : vector<2x32xf32>
    %124 = vector.extract_strided_slice %102 {offsets = [0, 96], sizes = [2, 32], strides = [1, 1]} : vector<2x128xf32> to vector<2x32xf32>
    %cst_62 = arith.constant dense<0.000000e+00> : vector<2x32xf32>
    %125 = tpu.matmul %103, %16, %cst_62 {dimension_numbers = #tpu.dot_dimension_numbers<[1], [0], [0], [1], [0, 0, 1, 1], [], []>} : vector<2x32xf32>, vector<32x32xf32>, vector<2x32xf32> -> vector<2x32xf32>
    %126 = arith.addf %124, %125 : vector<2x32xf32>
    %127 = arith.negf %126 : vector<2x32xf32>
    %128 = math.exp %127 : vector<2x32xf32>
    %cst_63 = arith.constant 1.000000e+00 : f32
    %129 = vector.broadcast %cst_63 : f32 to vector<2x32xf32>
    %130 = arith.addf %129, %128 : vector<2x32xf32>
    %131 = arith.divf %129, %130 : vector<2x32xf32>
    %c0_64 = arith.constant 0 : index
    %c0_65 = arith.constant 0 : index
    %132 = vector.load %arg9[%c0_64, %c0_65] : memref<2x32xf32, #tpu.memory_space<vmem>>, vector<2x32xf32>
    %133 = arith.mulf %119, %132 : vector<2x32xf32>
    %134 = arith.mulf %111, %123 : vector<2x32xf32>
    %135 = arith.addf %133, %134 : vector<2x32xf32>
    %136 = math.tanh %135 : vector<2x32xf32>
    %137 = arith.mulf %131, %136 : vector<2x32xf32>
    %c0_66 = arith.constant 0 : index
    %c0_67 = arith.constant 0 : index
    %138 = vector.load %arg9[%c0_66, %c0_67] : memref<2x32xf32, #tpu.memory_space<vmem>>, vector<2x32xf32>
    tpu.vector_store %arg9[%c0_66, %c0_67], %135 {strides = array<i32>} : memref<2x32xf32, #tpu.memory_space<vmem>>, vector<2x32xf32>,
    %c0_68 = arith.constant 0 : index
    %c0_69 = arith.constant 0 : index
    %139 = vector.load %arg8[%c0_68, %c0_69] : memref<2x32xf32, #tpu.memory_space<vmem>>, vector<2x32xf32>
    tpu.vector_store %arg8[%c0_68, %c0_69], %137 {strides = array<i32>} : memref<2x32xf32, #tpu.memory_space<vmem>>, vector<2x32xf32>,
    %c2_70 = arith.constant 2 : index
    %c0_71 = arith.constant 0 : index
    %c0_72 = arith.constant 0 : index
    %140 = vector.load %arg6[%c2_70, %c0_71, %c0_72] : memref<8x2x32xf32, #tpu.memory_space<vmem>>, vector<1x2x32xf32>
    %141 = vector.shape_cast %140 : vector<1x2x32xf32> to vector<2x32xf32>
    %142 = vector.shape_cast %137 : vector<2x32xf32> to vector<1x2x32xf32>
    tpu.vector_store %arg6[%c2_70, %c0_71, %c0_72], %142 {strides = array<i32>} : memref<8x2x32xf32, #tpu.memory_space<vmem>>, vector<1x2x32xf32>,
    %c3 = arith.constant 3 : index
    %c0_73 = arith.constant 0 : index
    %c0_74 = arith.constant 0 : index
    %143 = vector.load %arg7[%c3, %c0_73, %c0_74] : memref<8x2x128xf32, #tpu.memory_space<vmem>>, vector<1x2x128xf32>
    %144 = vector.shape_cast %143 : vector<1x2x128xf32> to vector<2x128xf32>
    %c0_75 = arith.constant 0 : index
    %c0_76 = arith.constant 0 : index
    %145 = vector.load %arg8[%c0_75, %c0_76] : memref<2x32xf32, #tpu.memory_space<vmem>>, vector<2x32xf32>
    %146 = vector.extract_strided_slice %144 {offsets = [0, 0], sizes = [2, 32], strides = [1, 1]} : vector<2x128xf32> to vector<2x32xf32>
    %cst_77 = arith.constant dense<0.000000e+00> : vector<2x32xf32>
    %147 = tpu.matmul %145, %13, %cst_77 {dimension_numbers = #tpu.dot_dimension_numbers<[1], [0], [0], [1], [0, 0, 1, 1], [], []>} : vector<2x32xf32>, vector<32x32xf32>, vector<2x32xf32> -> vector<2x32xf32>
    %148 = arith.addf %146, %147 : vector<2x32xf32>
    %149 = arith.negf %148 : vector<2x32xf32>
    %150 = math.exp %149 : vector<2x32xf32>
    %cst_78 = arith.constant 1.000000e+00 : f32
    %151 = vector.broadcast %cst_78 : f32 to vector<2x32xf32>
    %152 = arith.addf %151, %150 : vector<2x32xf32>
    %153 = arith.divf %151, %152 : vector<2x32xf32>
    %154 = vector.extract_strided_slice %144 {offsets = [0, 32], sizes = [2, 32], strides = [1, 1]} : vector<2x128xf32> to vector<2x32xf32>
    %cst_79 = arith.constant dense<0.000000e+00> : vector<2x32xf32>
    %155 = tpu.matmul %145, %14, %cst_79 {dimension_numbers = #tpu.dot_dimension_numbers<[1], [0], [0], [1], [0, 0, 1, 1], [], []>} : vector<2x32xf32>, vector<32x32xf32>, vector<2x32xf32> -> vector<2x32xf32>
    %156 = arith.addf %154, %155 : vector<2x32xf32>
    %157 = arith.negf %156 : vector<2x32xf32>
    %158 = math.exp %157 : vector<2x32xf32>
    %cst_80 = arith.constant 1.000000e+00 : f32
    %159 = vector.broadcast %cst_80 : f32 to vector<2x32xf32>
    %160 = arith.addf %159, %158 : vector<2x32xf32>
    %161 = arith.divf %159, %160 : vector<2x32xf32>
    %162 = vector.extract_strided_slice %144 {offsets = [0, 64], sizes = [2, 32], strides = [1, 1]} : vector<2x128xf32> to vector<2x32xf32>
    %cst_81 = arith.constant dense<0.000000e+00> : vector<2x32xf32>
    %163 = tpu.matmul %145, %15, %cst_81 {dimension_numbers = #tpu.dot_dimension_numbers<[1], [0], [0], [1], [0, 0, 1, 1], [], []>} : vector<2x32xf32>, vector<32x32xf32>, vector<2x32xf32> -> vector<2x32xf32>
    %164 = arith.addf %162, %163 : vector<2x32xf32>
    %165 = math.tanh %164 : vector<2x32xf32>
    %166 = vector.extract_strided_slice %144 {offsets = [0, 96], sizes = [2, 32], strides = [1, 1]} : vector<2x128xf32> to vector<2x32xf32>
    %cst_82 = arith.constant dense<0.000000e+00> : vector<2x32xf32>
    %167 = tpu.matmul %145, %16, %cst_82 {dimension_numbers = #tpu.dot_dimension_numbers<[1], [0], [0], [1], [0, 0, 1, 1], [], []>} : vector<2x32xf32>, vector<32x32xf32>, vector<2x32xf32> -> vector<2x32xf32>
    %168 = arith.addf %166, %167 : vector<2x32xf32>
    %169 = arith.negf %168 : vector<2x32xf32>
    %170 = math.exp %169 : vector<2x32xf32>
    %cst_83 = arith.constant 1.000000e+00 : f32
    %171 = vector.broadcast %cst_83 : f32 to vector<2x32xf32>
    %172 = arith.addf %171, %170 : vector<2x32xf32>
    %173 = arith.divf %171, %172 : vector<2x32xf32>
    %c0_84 = arith.constant 0 : index
    %c0_85 = arith.constant 0 : index
    %174 = vector.load %arg9[%c0_84, %c0_85] : memref<2x32xf32, #tpu.memory_space<vmem>>, vector<2x32xf32>
    %175 = arith.mulf %161, %174 : vector<2x32xf32>
    %176 = arith.mulf %153, %165 : vector<2x32xf32>
    %177 = arith.addf %175, %176 : vector<2x32xf32>
    %178 = math.tanh %177 : vector<2x32xf32>
    %179 = arith.mulf %173, %178 : vector<2x32xf32>
    %c0_86 = arith.constant 0 : index
    %c0_87 = arith.constant 0 : index
    %180 = vector.load %arg9[%c0_86, %c0_87] : memref<2x32xf32, #tpu.memory_space<vmem>>, vector<2x32xf32>
    tpu.vector_store %arg9[%c0_86, %c0_87], %177 {strides = array<i32>} : memref<2x32xf32, #tpu.memory_space<vmem>>, vector<2x32xf32>,
    %c0_88 = arith.constant 0 : index
    %c0_89 = arith.constant 0 : index
    %181 = vector.load %arg8[%c0_88, %c0_89] : memref<2x32xf32, #tpu.memory_space<vmem>>, vector<2x32xf32>
    tpu.vector_store %arg8[%c0_88, %c0_89], %179 {strides = array<i32>} : memref<2x32xf32, #tpu.memory_space<vmem>>, vector<2x32xf32>,
    %c3_90 = arith.constant 3 : index
    %c0_91 = arith.constant 0 : index
    %c0_92 = arith.constant 0 : index
    %182 = vector.load %arg6[%c3_90, %c0_91, %c0_92] : memref<8x2x32xf32, #tpu.memory_space<vmem>>, vector<1x2x32xf32>
    %183 = vector.shape_cast %182 : vector<1x2x32xf32> to vector<2x32xf32>
    %184 = vector.shape_cast %179 : vector<2x32xf32> to vector<1x2x32xf32>
    tpu.vector_store %arg6[%c3_90, %c0_91, %c0_92], %184 {strides = array<i32>} : memref<8x2x32xf32, #tpu.memory_space<vmem>>, vector<1x2x32xf32>,
    %c4 = arith.constant 4 : index
    %c0_93 = arith.constant 0 : index
    %c0_94 = arith.constant 0 : index
    %185 = vector.load %arg7[%c4, %c0_93, %c0_94] : memref<8x2x128xf32, #tpu.memory_space<vmem>>, vector<1x2x128xf32>
    %186 = vector.shape_cast %185 : vector<1x2x128xf32> to vector<2x128xf32>
    %c0_95 = arith.constant 0 : index
    %c0_96 = arith.constant 0 : index
    %187 = vector.load %arg8[%c0_95, %c0_96] : memref<2x32xf32, #tpu.memory_space<vmem>>, vector<2x32xf32>
    %188 = vector.extract_strided_slice %186 {offsets = [0, 0], sizes = [2, 32], strides = [1, 1]} : vector<2x128xf32> to vector<2x32xf32>
    %cst_97 = arith.constant dense<0.000000e+00> : vector<2x32xf32>
    %189 = tpu.matmul %187, %13, %cst_97 {dimension_numbers = #tpu.dot_dimension_numbers<[1], [0], [0], [1], [0, 0, 1, 1], [], []>} : vector<2x32xf32>, vector<32x32xf32>, vector<2x32xf32> -> vector<2x32xf32>
    %190 = arith.addf %188, %189 : vector<2x32xf32>
    %191 = arith.negf %190 : vector<2x32xf32>
    %192 = math.exp %191 : vector<2x32xf32>
    %cst_98 = arith.constant 1.000000e+00 : f32
    %193 = vector.broadcast %cst_98 : f32 to vector<2x32xf32>
    %194 = arith.addf %193, %192 : vector<2x32xf32>
    %195 = arith.divf %193, %194 : vector<2x32xf32>
    %196 = vector.extract_strided_slice %186 {offsets = [0, 32], sizes = [2, 32], strides = [1, 1]} : vector<2x128xf32> to vector<2x32xf32>
    %cst_99 = arith.constant dense<0.000000e+00> : vector<2x32xf32>
    %197 = tpu.matmul %187, %14, %cst_99 {dimension_numbers = #tpu.dot_dimension_numbers<[1], [0], [0], [1], [0, 0, 1, 1], [], []>} : vector<2x32xf32>, vector<32x32xf32>, vector<2x32xf32> -> vector<2x32xf32>
    %198 = arith.addf %196, %197 : vector<2x32xf32>
    %199 = arith.negf %198 : vector<2x32xf32>
    %200 = math.exp %199 : vector<2x32xf32>
    %cst_100 = arith.constant 1.000000e+00 : f32
    %201 = vector.broadcast %cst_100 : f32 to vector<2x32xf32>
    %202 = arith.addf %201, %200 : vector<2x32xf32>
    %203 = arith.divf %201, %202 : vector<2x32xf32>
    %204 = vector.extract_strided_slice %186 {offsets = [0, 64], sizes = [2, 32], strides = [1, 1]} : vector<2x128xf32> to vector<2x32xf32>
    %cst_101 = arith.constant dense<0.000000e+00> : vector<2x32xf32>
    %205 = tpu.matmul %187, %15, %cst_101 {dimension_numbers = #tpu.dot_dimension_numbers<[1], [0], [0], [1], [0, 0, 1, 1], [], []>} : vector<2x32xf32>, vector<32x32xf32>, vector<2x32xf32> -> vector<2x32xf32>
    %206 = arith.addf %204, %205 : vector<2x32xf32>
    %207 = math.tanh %206 : vector<2x32xf32>
    %208 = vector.extract_strided_slice %186 {offsets = [0, 96], sizes = [2, 32], strides = [1, 1]} : vector<2x128xf32> to vector<2x32xf32>
    %cst_102 = arith.constant dense<0.000000e+00> : vector<2x32xf32>
    %209 = tpu.matmul %187, %16, %cst_102 {dimension_numbers = #tpu.dot_dimension_numbers<[1], [0], [0], [1], [0, 0, 1, 1], [], []>} : vector<2x32xf32>, vector<32x32xf32>, vector<2x32xf32> -> vector<2x32xf32>
    %210 = arith.addf %208, %209 : vector<2x32xf32>
    %211 = arith.negf %210 : vector<2x32xf32>
    %212 = math.exp %211 : vector<2x32xf32>
    %cst_103 = arith.constant 1.000000e+00 : f32
    %213 = vector.broadcast %cst_103 : f32 to vector<2x32xf32>
    %214 = arith.addf %213, %212 : vector<2x32xf32>
    %215 = arith.divf %213, %214 : vector<2x32xf32>
    %c0_104 = arith.constant 0 : index
    %c0_105 = arith.constant 0 : index
    %216 = vector.load %arg9[%c0_104, %c0_105] : memref<2x32xf32, #tpu.memory_space<vmem>>, vector<2x32xf32>
    %217 = arith.mulf %203, %216 : vector<2x32xf32>
    %218 = arith.mulf %195, %207 : vector<2x32xf32>
    %219 = arith.addf %217, %218 : vector<2x32xf32>
    %220 = math.tanh %219 : vector<2x32xf32>
    %221 = arith.mulf %215, %220 : vector<2x32xf32>
    %c0_106 = arith.constant 0 : index
    %c0_107 = arith.constant 0 : index
    %222 = vector.load %arg9[%c0_106, %c0_107] : memref<2x32xf32, #tpu.memory_space<vmem>>, vector<2x32xf32>
    tpu.vector_store %arg9[%c0_106, %c0_107], %219 {strides = array<i32>} : memref<2x32xf32, #tpu.memory_space<vmem>>, vector<2x32xf32>,
    %c0_108 = arith.constant 0 : index
    %c0_109 = arith.constant 0 : index
    %223 = vector.load %arg8[%c0_108, %c0_109] : memref<2x32xf32, #tpu.memory_space<vmem>>, vector<2x32xf32>
    tpu.vector_store %arg8[%c0_108, %c0_109], %221 {strides = array<i32>} : memref<2x32xf32, #tpu.memory_space<vmem>>, vector<2x32xf32>,
    %c4_110 = arith.constant 4 : index
    %c0_111 = arith.constant 0 : index
    %c0_112 = arith.constant 0 : index
    %224 = vector.load %arg6[%c4_110, %c0_111, %c0_112] : memref<8x2x32xf32, #tpu.memory_space<vmem>>, vector<1x2x32xf32>
    %225 = vector.shape_cast %224 : vector<1x2x32xf32> to vector<2x32xf32>
    %226 = vector.shape_cast %221 : vector<2x32xf32> to vector<1x2x32xf32>
    tpu.vector_store %arg6[%c4_110, %c0_111, %c0_112], %226 {strides = array<i32>} : memref<8x2x32xf32, #tpu.memory_space<vmem>>, vector<1x2x32xf32>,
    %c5 = arith.constant 5 : index
    %c0_113 = arith.constant 0 : index
    %c0_114 = arith.constant 0 : index
    %227 = vector.load %arg7[%c5, %c0_113, %c0_114] : memref<8x2x128xf32, #tpu.memory_space<vmem>>, vector<1x2x128xf32>
    %228 = vector.shape_cast %227 : vector<1x2x128xf32> to vector<2x128xf32>
    %c0_115 = arith.constant 0 : index
    %c0_116 = arith.constant 0 : index
    %229 = vector.load %arg8[%c0_115, %c0_116] : memref<2x32xf32, #tpu.memory_space<vmem>>, vector<2x32xf32>
    %230 = vector.extract_strided_slice %228 {offsets = [0, 0], sizes = [2, 32], strides = [1, 1]} : vector<2x128xf32> to vector<2x32xf32>
    %cst_117 = arith.constant dense<0.000000e+00> : vector<2x32xf32>
    %231 = tpu.matmul %229, %13, %cst_117 {dimension_numbers = #tpu.dot_dimension_numbers<[1], [0], [0], [1], [0, 0, 1, 1], [], []>} : vector<2x32xf32>, vector<32x32xf32>, vector<2x32xf32> -> vector<2x32xf32>
    %232 = arith.addf %230, %231 : vector<2x32xf32>
    %233 = arith.negf %232 : vector<2x32xf32>
    %234 = math.exp %233 : vector<2x32xf32>
    %cst_118 = arith.constant 1.000000e+00 : f32
    %235 = vector.broadcast %cst_118 : f32 to vector<2x32xf32>
    %236 = arith.addf %235, %234 : vector<2x32xf32>
    %237 = arith.divf %235, %236 : vector<2x32xf32>
    %238 = vector.extract_strided_slice %228 {offsets = [0, 32], sizes = [2, 32], strides = [1, 1]} : vector<2x128xf32> to vector<2x32xf32>
    %cst_119 = arith.constant dense<0.000000e+00> : vector<2x32xf32>
    %239 = tpu.matmul %229, %14, %cst_119 {dimension_numbers = #tpu.dot_dimension_numbers<[1], [0], [0], [1], [0, 0, 1, 1], [], []>} : vector<2x32xf32>, vector<32x32xf32>, vector<2x32xf32> -> vector<2x32xf32>
    %240 = arith.addf %238, %239 : vector<2x32xf32>
    %241 = arith.negf %240 : vector<2x32xf32>
    %242 = math.exp %241 : vector<2x32xf32>
    %cst_120 = arith.constant 1.000000e+00 : f32
    %243 = vector.broadcast %cst_120 : f32 to vector<2x32xf32>
    %244 = arith.addf %243, %242 : vector<2x32xf32>
    %245 = arith.divf %243, %244 : vector<2x32xf32>
    %246 = vector.extract_strided_slice %228 {offsets = [0, 64], sizes = [2, 32], strides = [1, 1]} : vector<2x128xf32> to vector<2x32xf32>
    %cst_121 = arith.constant dense<0.000000e+00> : vector<2x32xf32>
    %247 = tpu.matmul %229, %15, %cst_121 {dimension_numbers = #tpu.dot_dimension_numbers<[1], [0], [0], [1], [0, 0, 1, 1], [], []>} : vector<2x32xf32>, vector<32x32xf32>, vector<2x32xf32> -> vector<2x32xf32>
    %248 = arith.addf %246, %247 : vector<2x32xf32>
    %249 = math.tanh %248 : vector<2x32xf32>
    %250 = vector.extract_strided_slice %228 {offsets = [0, 96], sizes = [2, 32], strides = [1, 1]} : vector<2x128xf32> to vector<2x32xf32>
    %cst_122 = arith.constant dense<0.000000e+00> : vector<2x32xf32>
    %251 = tpu.matmul %229, %16, %cst_122 {dimension_numbers = #tpu.dot_dimension_numbers<[1], [0], [0], [1], [0, 0, 1, 1], [], []>} : vector<2x32xf32>, vector<32x32xf32>, vector<2x32xf32> -> vector<2x32xf32>
    %252 = arith.addf %250, %251 : vector<2x32xf32>
    %253 = arith.negf %252 : vector<2x32xf32>
    %254 = math.exp %253 : vector<2x32xf32>
    %cst_123 = arith.constant 1.000000e+00 : f32
    %255 = vector.broadcast %cst_123 : f32 to vector<2x32xf32>
    %256 = arith.addf %255, %254 : vector<2x32xf32>
    %257 = arith.divf %255, %256 : vector<2x32xf32>
    %c0_124 = arith.constant 0 : index
    %c0_125 = arith.constant 0 : index
    %258 = vector.load %arg9[%c0_124, %c0_125] : memref<2x32xf32, #tpu.memory_space<vmem>>, vector<2x32xf32>
    %259 = arith.mulf %245, %258 : vector<2x32xf32>
    %260 = arith.mulf %237, %249 : vector<2x32xf32>
    %261 = arith.addf %259, %260 : vector<2x32xf32>
    %262 = math.tanh %261 : vector<2x32xf32>
    %263 = arith.mulf %257, %262 : vector<2x32xf32>
    %c0_126 = arith.constant 0 : index
    %c0_127 = arith.constant 0 : index
    %264 = vector.load %arg9[%c0_126, %c0_127] : memref<2x32xf32, #tpu.memory_space<vmem>>, vector<2x32xf32>
    tpu.vector_store %arg9[%c0_126, %c0_127], %261 {strides = array<i32>} : memref<2x32xf32, #tpu.memory_space<vmem>>, vector<2x32xf32>,
    %c0_128 = arith.constant 0 : index
    %c0_129 = arith.constant 0 : index
    %265 = vector.load %arg8[%c0_128, %c0_129] : memref<2x32xf32, #tpu.memory_space<vmem>>, vector<2x32xf32>
    tpu.vector_store %arg8[%c0_128, %c0_129], %263 {strides = array<i32>} : memref<2x32xf32, #tpu.memory_space<vmem>>, vector<2x32xf32>,
    %c5_130 = arith.constant 5 : index
    %c0_131 = arith.constant 0 : index
    %c0_132 = arith.constant 0 : index
    %266 = vector.load %arg6[%c5_130, %c0_131, %c0_132] : memref<8x2x32xf32, #tpu.memory_space<vmem>>, vector<1x2x32xf32>
    %267 = vector.shape_cast %266 : vector<1x2x32xf32> to vector<2x32xf32>
    %268 = vector.shape_cast %263 : vector<2x32xf32> to vector<1x2x32xf32>
    tpu.vector_store %arg6[%c5_130, %c0_131, %c0_132], %268 {strides = array<i32>} : memref<8x2x32xf32, #tpu.memory_space<vmem>>, vector<1x2x32xf32>,
    %c6 = arith.constant 6 : index
    %c0_133 = arith.constant 0 : index
    %c0_134 = arith.constant 0 : index
    %269 = vector.load %arg7[%c6, %c0_133, %c0_134] : memref<8x2x128xf32, #tpu.memory_space<vmem>>, vector<1x2x128xf32>
    %270 = vector.shape_cast %269 : vector<1x2x128xf32> to vector<2x128xf32>
    %c0_135 = arith.constant 0 : index
    %c0_136 = arith.constant 0 : index
    %271 = vector.load %arg8[%c0_135, %c0_136] : memref<2x32xf32, #tpu.memory_space<vmem>>, vector<2x32xf32>
    %272 = vector.extract_strided_slice %270 {offsets = [0, 0], sizes = [2, 32], strides = [1, 1]} : vector<2x128xf32> to vector<2x32xf32>
    %cst_137 = arith.constant dense<0.000000e+00> : vector<2x32xf32>
    %273 = tpu.matmul %271, %13, %cst_137 {dimension_numbers = #tpu.dot_dimension_numbers<[1], [0], [0], [1], [0, 0, 1, 1], [], []>} : vector<2x32xf32>, vector<32x32xf32>, vector<2x32xf32> -> vector<2x32xf32>
    %274 = arith.addf %272, %273 : vector<2x32xf32>
    %275 = arith.negf %274 : vector<2x32xf32>
    %276 = math.exp %275 : vector<2x32xf32>
    %cst_138 = arith.constant 1.000000e+00 : f32
    %277 = vector.broadcast %cst_138 : f32 to vector<2x32xf32>
    %278 = arith.addf %277, %276 : vector<2x32xf32>
    %279 = arith.divf %277, %278 : vector<2x32xf32>
    %280 = vector.extract_strided_slice %270 {offsets = [0, 32], sizes = [2, 32], strides = [1, 1]} : vector<2x128xf32> to vector<2x32xf32>
    %cst_139 = arith.constant dense<0.000000e+00> : vector<2x32xf32>
    %281 = tpu.matmul %271, %14, %cst_139 {dimension_numbers = #tpu.dot_dimension_numbers<[1], [0], [0], [1], [0, 0, 1, 1], [], []>} : vector<2x32xf32>, vector<32x32xf32>, vector<2x32xf32> -> vector<2x32xf32>
    %282 = arith.addf %280, %281 : vector<2x32xf32>
    %283 = arith.negf %282 : vector<2x32xf32>
    %284 = math.exp %283 : vector<2x32xf32>
    %cst_140 = arith.constant 1.000000e+00 : f32
    %285 = vector.broadcast %cst_140 : f32 to vector<2x32xf32>
    %286 = arith.addf %285, %284 : vector<2x32xf32>
    %287 = arith.divf %285, %286 : vector<2x32xf32>
    %288 = vector.extract_strided_slice %270 {offsets = [0, 64], sizes = [2, 32], strides = [1, 1]} : vector<2x128xf32> to vector<2x32xf32>
    %cst_141 = arith.constant dense<0.000000e+00> : vector<2x32xf32>
    %289 = tpu.matmul %271, %15, %cst_141 {dimension_numbers = #tpu.dot_dimension_numbers<[1], [0], [0], [1], [0, 0, 1, 1], [], []>} : vector<2x32xf32>, vector<32x32xf32>, vector<2x32xf32> -> vector<2x32xf32>
    %290 = arith.addf %288, %289 : vector<2x32xf32>
    %291 = math.tanh %290 : vector<2x32xf32>
    %292 = vector.extract_strided_slice %270 {offsets = [0, 96], sizes = [2, 32], strides = [1, 1]} : vector<2x128xf32> to vector<2x32xf32>
    %cst_142 = arith.constant dense<0.000000e+00> : vector<2x32xf32>
    %293 = tpu.matmul %271, %16, %cst_142 {dimension_numbers = #tpu.dot_dimension_numbers<[1], [0], [0], [1], [0, 0, 1, 1], [], []>} : vector<2x32xf32>, vector<32x32xf32>, vector<2x32xf32> -> vector<2x32xf32>
    %294 = arith.addf %292, %293 : vector<2x32xf32>
    %295 = arith.negf %294 : vector<2x32xf32>
    %296 = math.exp %295 : vector<2x32xf32>
    %cst_143 = arith.constant 1.000000e+00 : f32
    %297 = vector.broadcast %cst_143 : f32 to vector<2x32xf32>
    %298 = arith.addf %297, %296 : vector<2x32xf32>
    %299 = arith.divf %297, %298 : vector<2x32xf32>
    %c0_144 = arith.constant 0 : index
    %c0_145 = arith.constant 0 : index
    %300 = vector.load %arg9[%c0_144, %c0_145] : memref<2x32xf32, #tpu.memory_space<vmem>>, vector<2x32xf32>
    %301 = arith.mulf %287, %300 : vector<2x32xf32>
    %302 = arith.mulf %279, %291 : vector<2x32xf32>
    %303 = arith.addf %301, %302 : vector<2x32xf32>
    %304 = math.tanh %303 : vector<2x32xf32>
    %305 = arith.mulf %299, %304 : vector<2x32xf32>
    %c0_146 = arith.constant 0 : index
    %c0_147 = arith.constant 0 : index
    %306 = vector.load %arg9[%c0_146, %c0_147] : memref<2x32xf32, #tpu.memory_space<vmem>>, vector<2x32xf32>
    tpu.vector_store %arg9[%c0_146, %c0_147], %303 {strides = array<i32>} : memref<2x32xf32, #tpu.memory_space<vmem>>, vector<2x32xf32>,
    %c0_148 = arith.constant 0 : index
    %c0_149 = arith.constant 0 : index
    %307 = vector.load %arg8[%c0_148, %c0_149] : memref<2x32xf32, #tpu.memory_space<vmem>>, vector<2x32xf32>
    tpu.vector_store %arg8[%c0_148, %c0_149], %305 {strides = array<i32>} : memref<2x32xf32, #tpu.memory_space<vmem>>, vector<2x32xf32>,
    %c6_150 = arith.constant 6 : index
    %c0_151 = arith.constant 0 : index
    %c0_152 = arith.constant 0 : index
    %308 = vector.load %arg6[%c6_150, %c0_151, %c0_152] : memref<8x2x32xf32, #tpu.memory_space<vmem>>, vector<1x2x32xf32>
    %309 = vector.shape_cast %308 : vector<1x2x32xf32> to vector<2x32xf32>
    %310 = vector.shape_cast %305 : vector<2x32xf32> to vector<1x2x32xf32>
    tpu.vector_store %arg6[%c6_150, %c0_151, %c0_152], %310 {strides = array<i32>} : memref<8x2x32xf32, #tpu.memory_space<vmem>>, vector<1x2x32xf32>,
    %c7 = arith.constant 7 : index
    %c0_153 = arith.constant 0 : index
    %c0_154 = arith.constant 0 : index
    %311 = vector.load %arg7[%c7, %c0_153, %c0_154] : memref<8x2x128xf32, #tpu.memory_space<vmem>>, vector<1x2x128xf32>
    %312 = vector.shape_cast %311 : vector<1x2x128xf32> to vector<2x128xf32>
    %c0_155 = arith.constant 0 : index
    %c0_156 = arith.constant 0 : index
    %313 = vector.load %arg8[%c0_155, %c0_156] : memref<2x32xf32, #tpu.memory_space<vmem>>, vector<2x32xf32>
    %314 = vector.extract_strided_slice %312 {offsets = [0, 0], sizes = [2, 32], strides = [1, 1]} : vector<2x128xf32> to vector<2x32xf32>
    %cst_157 = arith.constant dense<0.000000e+00> : vector<2x32xf32>
    %315 = tpu.matmul %313, %13, %cst_157 {dimension_numbers = #tpu.dot_dimension_numbers<[1], [0], [0], [1], [0, 0, 1, 1], [], []>} : vector<2x32xf32>, vector<32x32xf32>, vector<2x32xf32> -> vector<2x32xf32>
    %316 = arith.addf %314, %315 : vector<2x32xf32>
    %317 = arith.negf %316 : vector<2x32xf32>
    %318 = math.exp %317 : vector<2x32xf32>
    %cst_158 = arith.constant 1.000000e+00 : f32
    %319 = vector.broadcast %cst_158 : f32 to vector<2x32xf32>
    %320 = arith.addf %319, %318 : vector<2x32xf32>
    %321 = arith.divf %319, %320 : vector<2x32xf32>
    %322 = vector.extract_strided_slice %312 {offsets = [0, 32], sizes = [2, 32], strides = [1, 1]} : vector<2x128xf32> to vector<2x32xf32>
    %cst_159 = arith.constant dense<0.000000e+00> : vector<2x32xf32>
    %323 = tpu.matmul %313, %14, %cst_159 {dimension_numbers = #tpu.dot_dimension_numbers<[1], [0], [0], [1], [0, 0, 1, 1], [], []>} : vector<2x32xf32>, vector<32x32xf32>, vector<2x32xf32> -> vector<2x32xf32>
    %324 = arith.addf %322, %323 : vector<2x32xf32>
    %325 = arith.negf %324 : vector<2x32xf32>
    %326 = math.exp %325 : vector<2x32xf32>
    %cst_160 = arith.constant 1.000000e+00 : f32
    %327 = vector.broadcast %cst_160 : f32 to vector<2x32xf32>
    %328 = arith.addf %327, %326 : vector<2x32xf32>
    %329 = arith.divf %327, %328 : vector<2x32xf32>
    %330 = vector.extract_strided_slice %312 {offsets = [0, 64], sizes = [2, 32], strides = [1, 1]} : vector<2x128xf32> to vector<2x32xf32>
    %cst_161 = arith.constant dense<0.000000e+00> : vector<2x32xf32>
    %331 = tpu.matmul %313, %15, %cst_161 {dimension_numbers = #tpu.dot_dimension_numbers<[1], [0], [0], [1], [0, 0, 1, 1], [], []>} : vector<2x32xf32>, vector<32x32xf32>, vector<2x32xf32> -> vector<2x32xf32>
    %332 = arith.addf %330, %331 : vector<2x32xf32>
    %333 = math.tanh %332 : vector<2x32xf32>
    %334 = vector.extract_strided_slice %312 {offsets = [0, 96], sizes = [2, 32], strides = [1, 1]} : vector<2x128xf32> to vector<2x32xf32>
    %cst_162 = arith.constant dense<0.000000e+00> : vector<2x32xf32>
    %335 = tpu.matmul %313, %16, %cst_162 {dimension_numbers = #tpu.dot_dimension_numbers<[1], [0], [0], [1], [0, 0, 1, 1], [], []>} : vector<2x32xf32>, vector<32x32xf32>, vector<2x32xf32> -> vector<2x32xf32>
    %336 = arith.addf %334, %335 : vector<2x32xf32>
    %337 = arith.negf %336 : vector<2x32xf32>
    %338 = math.exp %337 : vector<2x32xf32>
    %cst_163 = arith.constant 1.000000e+00 : f32
    %339 = vector.broadcast %cst_163 : f32 to vector<2x32xf32>
    %340 = arith.addf %339, %338 : vector<2x32xf32>
    %341 = arith.divf %339, %340 : vector<2x32xf32>
    %c0_164 = arith.constant 0 : index
    %c0_165 = arith.constant 0 : index
    %342 = vector.load %arg9[%c0_164, %c0_165] : memref<2x32xf32, #tpu.memory_space<vmem>>, vector<2x32xf32>
    %343 = arith.mulf %329, %342 : vector<2x32xf32>
    %344 = arith.mulf %321, %333 : vector<2x32xf32>
    %345 = arith.addf %343, %344 : vector<2x32xf32>
    %346 = math.tanh %345 : vector<2x32xf32>
    %347 = arith.mulf %341, %346 : vector<2x32xf32>
    %c0_166 = arith.constant 0 : index
    %c0_167 = arith.constant 0 : index
    %348 = vector.load %arg9[%c0_166, %c0_167] : memref<2x32xf32, #tpu.memory_space<vmem>>, vector<2x32xf32>
    tpu.vector_store %arg9[%c0_166, %c0_167], %345 {strides = array<i32>} : memref<2x32xf32, #tpu.memory_space<vmem>>, vector<2x32xf32>,
    %c0_168 = arith.constant 0 : index
    %c0_169 = arith.constant 0 : index
    %349 = vector.load %arg8[%c0_168, %c0_169] : memref<2x32xf32, #tpu.memory_space<vmem>>, vector<2x32xf32>
    tpu.vector_store %arg8[%c0_168, %c0_169], %347 {strides = array<i32>} : memref<2x32xf32, #tpu.memory_space<vmem>>, vector<2x32xf32>,
    %c7_170 = arith.constant 7 : index
    %c0_171 = arith.constant 0 : index
    %c0_172 = arith.constant 0 : index
    %350 = vector.load %arg6[%c7_170, %c0_171, %c0_172] : memref<8x2x32xf32, #tpu.memory_space<vmem>>, vector<1x2x32xf32>
    %351 = vector.shape_cast %350 : vector<1x2x32xf32> to vector<2x32xf32>
    %352 = vector.shape_cast %347 : vector<2x32xf32> to vector<1x2x32xf32>
    tpu.vector_store %arg6[%c7_170, %c0_171, %c0_172], %352 {strides = array<i32>} : memref<8x2x32xf32, #tpu.memory_space<vmem>>, vector<1x2x32xf32>,
    return
  }
  func.func @transform_0(%arg0: i32, %arg1: i32) -> (i32, i32, i32) {
    %c0_i32 = arith.constant 0 : i32
    %c0_i32_0 = arith.constant 0 : i32
    return %arg1, %arg0, %c0_i32 : i32, i32, i32
  }
  func.func @transform_1(%arg0: i32, %arg1: i32) -> (i32, i32) {
    %c0_i32 = arith.constant 0 : i32
    %c0_i32_0 = arith.constant 0 : i32
    %c0_i32_1 = arith.constant 0 : i32
    return %c0_i32, %c0_i32_0 : i32, i32
  }
  func.func @transform_2(%arg0: i32, %arg1: i32) -> (i32, i32) {
    %c0_i32 = arith.constant 0 : i32
    %c0_i32_0 = arith.constant 0 : i32
    %c0_i32_1 = arith.constant 0 : i32
    return %c0_i32, %c0_i32_0 : i32, i32
  }
  func.func @transform_3(%arg0: i32, %arg1: i32) -> (i32, i32) {
    %c0_i32 = arith.constant 0 : i32
    %c0_i32_0 = arith.constant 0 : i32
    %c0_i32_1 = arith.constant 0 : i32
    return %c0_i32, %c0_i32_0 : i32, i32
  }
  func.func @transform_4(%arg0: i32, %arg1: i32) -> (i32, i32, i32) {
    %c0_i32 = arith.constant 0 : i32
    %c0_i32_0 = arith.constant 0 : i32
    return %arg1, %arg0, %c0_i32 : i32, i32, i32
  }
}

module attributes {stable_mosaic.version = 11 : i64} {
  func.func @_lstm_final_kernel(%arg0: i32, %arg1: i32, %arg2: memref<8x2x32xf32, #tpu.memory_space<vmem>>, %arg3: memref<32x128xf32, #tpu.memory_space<vmem>>, %arg4: memref<1x128xf32, #tpu.memory_space<vmem>>, %arg5: memref<32x128xf32, #tpu.memory_space<vmem>>, %arg6: memref<32x32xf32, #tpu.memory_space<vmem>>, %arg7: memref<1x32xf32, #tpu.memory_space<vmem>>, %arg8: memref<32x8xf32, #tpu.memory_space<vmem>>, %arg9: memref<1x8xf32, #tpu.memory_space<vmem>>, %arg10: memref<1x2x8xf32, #tpu.memory_space<vmem>>, %arg11: memref<8x2x128xf32, #tpu.memory_space<vmem>>, %arg12: memref<2x32xf32, #tpu.memory_space<vmem>>, %arg13: memref<2x32xf32, #tpu.memory_space<vmem>>, %arg14: memref<2x32xf32, #tpu.memory_space<vmem>>) attributes {dimension_semantics = [#tpu.dimension_semantics<parallel>, #tpu.dimension_semantics<arbitrary>], iteration_bounds = array<i64: 1, 1>, scalar_prefetch = 0 : i64, scratch_operands = 4 : i64, tpu.core_type = #tpu.core_type<tc>, window_params = [{transform_indices = @transform_0, window_bounds = array<i64: 8, 2, 32>}, {pipeline_mode = #tpu.pipeline_mode<synchronous>, transform_indices = @transform_1, window_bounds = array<i64: 32, 128>}, {pipeline_mode = #tpu.pipeline_mode<synchronous>, transform_indices = @transform_2, window_bounds = array<i64: 1, 128>}, {pipeline_mode = #tpu.pipeline_mode<synchronous>, transform_indices = @transform_3, window_bounds = array<i64: 32, 128>}, {pipeline_mode = #tpu.pipeline_mode<synchronous>, transform_indices = @transform_4, window_bounds = array<i64: 32, 32>}, {pipeline_mode = #tpu.pipeline_mode<synchronous>, transform_indices = @transform_5, window_bounds = array<i64: 1, 32>}, {pipeline_mode = #tpu.pipeline_mode<synchronous>, transform_indices = @transform_6, window_bounds = array<i64: 32, 8>}, {pipeline_mode = #tpu.pipeline_mode<synchronous>, transform_indices = @transform_7, window_bounds = array<i64: 1, 8>}, {transform_indices = @transform_8, window_bounds = array<i64: 1, 2, 8>}]} {
    %c0_i32 = arith.constant 0 : i32
    %0 = arith.cmpi eq, %arg1, %c0_i32 : i32
    %1 = arith.extui %0 : i1 to i32
    %c0_i32_0 = arith.constant 0 : i32
    %2 = arith.cmpi ne, %1, %c0_i32_0 : i32
    scf.if %2 {
      %cst_183 = arith.constant 0.000000e+00 : f32
      %356 = vector.broadcast %cst_183 : f32 to vector<2x32xf32>
      %c0_184 = arith.constant 0 : index
      %c0_185 = arith.constant 0 : index
      %357 = vector.load %arg12[%c0_184, %c0_185] : memref<2x32xf32, #tpu.memory_space<vmem>>, vector<2x32xf32>
      tpu.vector_store %arg12[%c0_184, %c0_185], %356 {strides = array<i32>} : memref<2x32xf32, #tpu.memory_space<vmem>>, vector<2x32xf32>,
      %cst_186 = arith.constant 0.000000e+00 : f32
      %358 = vector.broadcast %cst_186 : f32 to vector<2x32xf32>
      %c0_187 = arith.constant 0 : index
      %c0_188 = arith.constant 0 : index
      %359 = vector.load %arg13[%c0_187, %c0_188] : memref<2x32xf32, #tpu.memory_space<vmem>>, vector<2x32xf32>
      tpu.vector_store %arg13[%c0_187, %c0_188], %358 {strides = array<i32>} : memref<2x32xf32, #tpu.memory_space<vmem>>, vector<2x32xf32>,
      %cst_189 = arith.constant 0.000000e+00 : f32
      %360 = vector.broadcast %cst_189 : f32 to vector<2x32xf32>
      %c0_190 = arith.constant 0 : index
      %c0_191 = arith.constant 0 : index
      %361 = vector.load %arg14[%c0_190, %c0_191] : memref<2x32xf32, #tpu.memory_space<vmem>>, vector<2x32xf32>
      tpu.vector_store %arg14[%c0_190, %c0_191], %360 {strides = array<i32>} : memref<2x32xf32, #tpu.memory_space<vmem>>, vector<2x32xf32>,
    } else {
    }
    %c0 = arith.constant 0 : index
    %c0_1 = arith.constant 0 : index
    %c0_2 = arith.constant 0 : index
    %3 = vector.load %arg2[%c0, %c0_1, %c0_2] : memref<8x2x32xf32, #tpu.memory_space<vmem>>, vector<8x2x32xf32>
    %4 = vector.shape_cast %3 : vector<8x2x32xf32> to vector<16x32xf32>
    %c0_3 = arith.constant 0 : index
    %c0_4 = arith.constant 0 : index
    %5 = vector.load %arg3[%c0_3, %c0_4] : memref<32x128xf32, #tpu.memory_space<vmem>>, vector<32x128xf32>
    %cst = arith.constant dense<0.000000e+00> : vector<16x128xf32>
    %6 = tpu.matmul %4, %5, %cst {dimension_numbers = #tpu.dot_dimension_numbers<[1], [0], [0], [1], [0, 0, 1, 1], [], []>} : vector<16x32xf32>, vector<32x128xf32>, vector<16x128xf32> -> vector<16x128xf32>
    %c0_5 = arith.constant 0 : index
    %c0_6 = arith.constant 0 : index
    %7 = vector.load %arg4[%c0_5, %c0_6] : memref<1x128xf32, #tpu.memory_space<vmem>>, vector<1x128xf32>
    %8 = vector.broadcast %7 : vector<1x128xf32> to vector<16x128xf32>
    %9 = arith.addf %6, %8 : vector<16x128xf32>
    %10 = vector.shape_cast %9 : vector<16x128xf32> to vector<8x2x128xf32>
    %c0_7 = arith.constant 0 : index
    %c0_8 = arith.constant 0 : index
    %c0_9 = arith.constant 0 : index
    %11 = vector.load %arg11[%c0_7, %c0_8, %c0_9] : memref<8x2x128xf32, #tpu.memory_space<vmem>>, vector<8x2x128xf32>
    tpu.vector_store %arg11[%c0_7, %c0_8, %c0_9], %10 {strides = array<i32>} : memref<8x2x128xf32, #tpu.memory_space<vmem>>, vector<8x2x128xf32>,
    %c0_10 = arith.constant 0 : index
    %c0_11 = arith.constant 0 : index
    %12 = vector.load %arg5[%c0_10, %c0_11] : memref<32x128xf32, #tpu.memory_space<vmem>>, vector<32x128xf32>
    %13 = vector.extract_strided_slice %12 {offsets = [0, 0], sizes = [32, 32], strides = [1, 1]} : vector<32x128xf32> to vector<32x32xf32>
    %14 = vector.extract_strided_slice %12 {offsets = [0, 32], sizes = [32, 32], strides = [1, 1]} : vector<32x128xf32> to vector<32x32xf32>
    %15 = vector.extract_strided_slice %12 {offsets = [0, 64], sizes = [32, 32], strides = [1, 1]} : vector<32x128xf32> to vector<32x32xf32>
    %16 = vector.extract_strided_slice %12 {offsets = [0, 96], sizes = [32, 32], strides = [1, 1]} : vector<32x128xf32> to vector<32x32xf32>
    %c0_12 = arith.constant 0 : index
    %c0_13 = arith.constant 0 : index
    %c0_14 = arith.constant 0 : index
    %17 = vector.load %arg11[%c0_12, %c0_13, %c0_14] : memref<8x2x128xf32, #tpu.memory_space<vmem>>, vector<1x2x128xf32>
    %18 = vector.shape_cast %17 : vector<1x2x128xf32> to vector<2x128xf32>
    %c0_15 = arith.constant 0 : index
    %c0_16 = arith.constant 0 : index
    %19 = vector.load %arg12[%c0_15, %c0_16] : memref<2x32xf32, #tpu.memory_space<vmem>>, vector<2x32xf32>
    %20 = vector.extract_strided_slice %18 {offsets = [0, 0], sizes = [2, 32], strides = [1, 1]} : vector<2x128xf32> to vector<2x32xf32>
    %cst_17 = arith.constant dense<0.000000e+00> : vector<2x32xf32>
    %21 = tpu.matmul %19, %13, %cst_17 {dimension_numbers = #tpu.dot_dimension_numbers<[1], [0], [0], [1], [0, 0, 1, 1], [], []>} : vector<2x32xf32>, vector<32x32xf32>, vector<2x32xf32> -> vector<2x32xf32>
    %22 = arith.addf %20, %21 : vector<2x32xf32>
    %23 = arith.negf %22 : vector<2x32xf32>
    %24 = math.exp %23 : vector<2x32xf32>
    %cst_18 = arith.constant 1.000000e+00 : f32
    %25 = vector.broadcast %cst_18 : f32 to vector<2x32xf32>
    %26 = arith.addf %25, %24 : vector<2x32xf32>
    %27 = arith.divf %25, %26 : vector<2x32xf32>
    %28 = vector.extract_strided_slice %18 {offsets = [0, 32], sizes = [2, 32], strides = [1, 1]} : vector<2x128xf32> to vector<2x32xf32>
    %cst_19 = arith.constant dense<0.000000e+00> : vector<2x32xf32>
    %29 = tpu.matmul %19, %14, %cst_19 {dimension_numbers = #tpu.dot_dimension_numbers<[1], [0], [0], [1], [0, 0, 1, 1], [], []>} : vector<2x32xf32>, vector<32x32xf32>, vector<2x32xf32> -> vector<2x32xf32>
    %30 = arith.addf %28, %29 : vector<2x32xf32>
    %31 = arith.negf %30 : vector<2x32xf32>
    %32 = math.exp %31 : vector<2x32xf32>
    %cst_20 = arith.constant 1.000000e+00 : f32
    %33 = vector.broadcast %cst_20 : f32 to vector<2x32xf32>
    %34 = arith.addf %33, %32 : vector<2x32xf32>
    %35 = arith.divf %33, %34 : vector<2x32xf32>
    %36 = vector.extract_strided_slice %18 {offsets = [0, 64], sizes = [2, 32], strides = [1, 1]} : vector<2x128xf32> to vector<2x32xf32>
    %cst_21 = arith.constant dense<0.000000e+00> : vector<2x32xf32>
    %37 = tpu.matmul %19, %15, %cst_21 {dimension_numbers = #tpu.dot_dimension_numbers<[1], [0], [0], [1], [0, 0, 1, 1], [], []>} : vector<2x32xf32>, vector<32x32xf32>, vector<2x32xf32> -> vector<2x32xf32>
    %38 = arith.addf %36, %37 : vector<2x32xf32>
    %39 = math.tanh %38 : vector<2x32xf32>
    %40 = vector.extract_strided_slice %18 {offsets = [0, 96], sizes = [2, 32], strides = [1, 1]} : vector<2x128xf32> to vector<2x32xf32>
    %cst_22 = arith.constant dense<0.000000e+00> : vector<2x32xf32>
    %41 = tpu.matmul %19, %16, %cst_22 {dimension_numbers = #tpu.dot_dimension_numbers<[1], [0], [0], [1], [0, 0, 1, 1], [], []>} : vector<2x32xf32>, vector<32x32xf32>, vector<2x32xf32> -> vector<2x32xf32>
    %42 = arith.addf %40, %41 : vector<2x32xf32>
    %43 = arith.negf %42 : vector<2x32xf32>
    %44 = math.exp %43 : vector<2x32xf32>
    %cst_23 = arith.constant 1.000000e+00 : f32
    %45 = vector.broadcast %cst_23 : f32 to vector<2x32xf32>
    %46 = arith.addf %45, %44 : vector<2x32xf32>
    %47 = arith.divf %45, %46 : vector<2x32xf32>
    %c0_24 = arith.constant 0 : index
    %c0_25 = arith.constant 0 : index
    %48 = vector.load %arg13[%c0_24, %c0_25] : memref<2x32xf32, #tpu.memory_space<vmem>>, vector<2x32xf32>
    %49 = arith.mulf %35, %48 : vector<2x32xf32>
    %50 = arith.mulf %27, %39 : vector<2x32xf32>
    %51 = arith.addf %49, %50 : vector<2x32xf32>
    %52 = math.tanh %51 : vector<2x32xf32>
    %53 = arith.mulf %47, %52 : vector<2x32xf32>
    %c0_26 = arith.constant 0 : index
    %c0_27 = arith.constant 0 : index
    %54 = vector.load %arg13[%c0_26, %c0_27] : memref<2x32xf32, #tpu.memory_space<vmem>>, vector<2x32xf32>
    tpu.vector_store %arg13[%c0_26, %c0_27], %51 {strides = array<i32>} : memref<2x32xf32, #tpu.memory_space<vmem>>, vector<2x32xf32>,
    %c0_28 = arith.constant 0 : index
    %c0_29 = arith.constant 0 : index
    %55 = vector.load %arg12[%c0_28, %c0_29] : memref<2x32xf32, #tpu.memory_space<vmem>>, vector<2x32xf32>
    tpu.vector_store %arg12[%c0_28, %c0_29], %53 {strides = array<i32>} : memref<2x32xf32, #tpu.memory_space<vmem>>, vector<2x32xf32>,
    %c0_30 = arith.constant 0 : index
    %c0_31 = arith.constant 0 : index
    %56 = vector.load %arg14[%c0_30, %c0_31] : memref<2x32xf32, #tpu.memory_space<vmem>>, vector<2x32xf32>
    %57 = arith.addf %56, %53 : vector<2x32xf32>
    %c0_32 = arith.constant 0 : index
    %c0_33 = arith.constant 0 : index
    %58 = vector.load %arg14[%c0_32, %c0_33] : memref<2x32xf32, #tpu.memory_space<vmem>>, vector<2x32xf32>
    tpu.vector_store %arg14[%c0_32, %c0_33], %57 {strides = array<i32>} : memref<2x32xf32, #tpu.memory_space<vmem>>, vector<2x32xf32>,
    %c1 = arith.constant 1 : index
    %c0_34 = arith.constant 0 : index
    %c0_35 = arith.constant 0 : index
    %59 = vector.load %arg11[%c1, %c0_34, %c0_35] : memref<8x2x128xf32, #tpu.memory_space<vmem>>, vector<1x2x128xf32>
    %60 = vector.shape_cast %59 : vector<1x2x128xf32> to vector<2x128xf32>
    %c0_36 = arith.constant 0 : index
    %c0_37 = arith.constant 0 : index
    %61 = vector.load %arg12[%c0_36, %c0_37] : memref<2x32xf32, #tpu.memory_space<vmem>>, vector<2x32xf32>
    %62 = vector.extract_strided_slice %60 {offsets = [0, 0], sizes = [2, 32], strides = [1, 1]} : vector<2x128xf32> to vector<2x32xf32>
    %cst_38 = arith.constant dense<0.000000e+00> : vector<2x32xf32>
    %63 = tpu.matmul %61, %13, %cst_38 {dimension_numbers = #tpu.dot_dimension_numbers<[1], [0], [0], [1], [0, 0, 1, 1], [], []>} : vector<2x32xf32>, vector<32x32xf32>, vector<2x32xf32> -> vector<2x32xf32>
    %64 = arith.addf %62, %63 : vector<2x32xf32>
    %65 = arith.negf %64 : vector<2x32xf32>
    %66 = math.exp %65 : vector<2x32xf32>
    %cst_39 = arith.constant 1.000000e+00 : f32
    %67 = vector.broadcast %cst_39 : f32 to vector<2x32xf32>
    %68 = arith.addf %67, %66 : vector<2x32xf32>
    %69 = arith.divf %67, %68 : vector<2x32xf32>
    %70 = vector.extract_strided_slice %60 {offsets = [0, 32], sizes = [2, 32], strides = [1, 1]} : vector<2x128xf32> to vector<2x32xf32>
    %cst_40 = arith.constant dense<0.000000e+00> : vector<2x32xf32>
    %71 = tpu.matmul %61, %14, %cst_40 {dimension_numbers = #tpu.dot_dimension_numbers<[1], [0], [0], [1], [0, 0, 1, 1], [], []>} : vector<2x32xf32>, vector<32x32xf32>, vector<2x32xf32> -> vector<2x32xf32>
    %72 = arith.addf %70, %71 : vector<2x32xf32>
    %73 = arith.negf %72 : vector<2x32xf32>
    %74 = math.exp %73 : vector<2x32xf32>
    %cst_41 = arith.constant 1.000000e+00 : f32
    %75 = vector.broadcast %cst_41 : f32 to vector<2x32xf32>
    %76 = arith.addf %75, %74 : vector<2x32xf32>
    %77 = arith.divf %75, %76 : vector<2x32xf32>
    %78 = vector.extract_strided_slice %60 {offsets = [0, 64], sizes = [2, 32], strides = [1, 1]} : vector<2x128xf32> to vector<2x32xf32>
    %cst_42 = arith.constant dense<0.000000e+00> : vector<2x32xf32>
    %79 = tpu.matmul %61, %15, %cst_42 {dimension_numbers = #tpu.dot_dimension_numbers<[1], [0], [0], [1], [0, 0, 1, 1], [], []>} : vector<2x32xf32>, vector<32x32xf32>, vector<2x32xf32> -> vector<2x32xf32>
    %80 = arith.addf %78, %79 : vector<2x32xf32>
    %81 = math.tanh %80 : vector<2x32xf32>
    %82 = vector.extract_strided_slice %60 {offsets = [0, 96], sizes = [2, 32], strides = [1, 1]} : vector<2x128xf32> to vector<2x32xf32>
    %cst_43 = arith.constant dense<0.000000e+00> : vector<2x32xf32>
    %83 = tpu.matmul %61, %16, %cst_43 {dimension_numbers = #tpu.dot_dimension_numbers<[1], [0], [0], [1], [0, 0, 1, 1], [], []>} : vector<2x32xf32>, vector<32x32xf32>, vector<2x32xf32> -> vector<2x32xf32>
    %84 = arith.addf %82, %83 : vector<2x32xf32>
    %85 = arith.negf %84 : vector<2x32xf32>
    %86 = math.exp %85 : vector<2x32xf32>
    %cst_44 = arith.constant 1.000000e+00 : f32
    %87 = vector.broadcast %cst_44 : f32 to vector<2x32xf32>
    %88 = arith.addf %87, %86 : vector<2x32xf32>
    %89 = arith.divf %87, %88 : vector<2x32xf32>
    %c0_45 = arith.constant 0 : index
    %c0_46 = arith.constant 0 : index
    %90 = vector.load %arg13[%c0_45, %c0_46] : memref<2x32xf32, #tpu.memory_space<vmem>>, vector<2x32xf32>
    %91 = arith.mulf %77, %90 : vector<2x32xf32>
    %92 = arith.mulf %69, %81 : vector<2x32xf32>
    %93 = arith.addf %91, %92 : vector<2x32xf32>
    %94 = math.tanh %93 : vector<2x32xf32>
    %95 = arith.mulf %89, %94 : vector<2x32xf32>
    %c0_47 = arith.constant 0 : index
    %c0_48 = arith.constant 0 : index
    %96 = vector.load %arg13[%c0_47, %c0_48] : memref<2x32xf32, #tpu.memory_space<vmem>>, vector<2x32xf32>
    tpu.vector_store %arg13[%c0_47, %c0_48], %93 {strides = array<i32>} : memref<2x32xf32, #tpu.memory_space<vmem>>, vector<2x32xf32>,
    %c0_49 = arith.constant 0 : index
    %c0_50 = arith.constant 0 : index
    %97 = vector.load %arg12[%c0_49, %c0_50] : memref<2x32xf32, #tpu.memory_space<vmem>>, vector<2x32xf32>
    tpu.vector_store %arg12[%c0_49, %c0_50], %95 {strides = array<i32>} : memref<2x32xf32, #tpu.memory_space<vmem>>, vector<2x32xf32>,
    %c0_51 = arith.constant 0 : index
    %c0_52 = arith.constant 0 : index
    %98 = vector.load %arg14[%c0_51, %c0_52] : memref<2x32xf32, #tpu.memory_space<vmem>>, vector<2x32xf32>
    %99 = arith.addf %98, %95 : vector<2x32xf32>
    %c0_53 = arith.constant 0 : index
    %c0_54 = arith.constant 0 : index
    %100 = vector.load %arg14[%c0_53, %c0_54] : memref<2x32xf32, #tpu.memory_space<vmem>>, vector<2x32xf32>
    tpu.vector_store %arg14[%c0_53, %c0_54], %99 {strides = array<i32>} : memref<2x32xf32, #tpu.memory_space<vmem>>, vector<2x32xf32>,
    %c2 = arith.constant 2 : index
    %c0_55 = arith.constant 0 : index
    %c0_56 = arith.constant 0 : index
    %101 = vector.load %arg11[%c2, %c0_55, %c0_56] : memref<8x2x128xf32, #tpu.memory_space<vmem>>, vector<1x2x128xf32>
    %102 = vector.shape_cast %101 : vector<1x2x128xf32> to vector<2x128xf32>
    %c0_57 = arith.constant 0 : index
    %c0_58 = arith.constant 0 : index
    %103 = vector.load %arg12[%c0_57, %c0_58] : memref<2x32xf32, #tpu.memory_space<vmem>>, vector<2x32xf32>
    %104 = vector.extract_strided_slice %102 {offsets = [0, 0], sizes = [2, 32], strides = [1, 1]} : vector<2x128xf32> to vector<2x32xf32>
    %cst_59 = arith.constant dense<0.000000e+00> : vector<2x32xf32>
    %105 = tpu.matmul %103, %13, %cst_59 {dimension_numbers = #tpu.dot_dimension_numbers<[1], [0], [0], [1], [0, 0, 1, 1], [], []>} : vector<2x32xf32>, vector<32x32xf32>, vector<2x32xf32> -> vector<2x32xf32>
    %106 = arith.addf %104, %105 : vector<2x32xf32>
    %107 = arith.negf %106 : vector<2x32xf32>
    %108 = math.exp %107 : vector<2x32xf32>
    %cst_60 = arith.constant 1.000000e+00 : f32
    %109 = vector.broadcast %cst_60 : f32 to vector<2x32xf32>
    %110 = arith.addf %109, %108 : vector<2x32xf32>
    %111 = arith.divf %109, %110 : vector<2x32xf32>
    %112 = vector.extract_strided_slice %102 {offsets = [0, 32], sizes = [2, 32], strides = [1, 1]} : vector<2x128xf32> to vector<2x32xf32>
    %cst_61 = arith.constant dense<0.000000e+00> : vector<2x32xf32>
    %113 = tpu.matmul %103, %14, %cst_61 {dimension_numbers = #tpu.dot_dimension_numbers<[1], [0], [0], [1], [0, 0, 1, 1], [], []>} : vector<2x32xf32>, vector<32x32xf32>, vector<2x32xf32> -> vector<2x32xf32>
    %114 = arith.addf %112, %113 : vector<2x32xf32>
    %115 = arith.negf %114 : vector<2x32xf32>
    %116 = math.exp %115 : vector<2x32xf32>
    %cst_62 = arith.constant 1.000000e+00 : f32
    %117 = vector.broadcast %cst_62 : f32 to vector<2x32xf32>
    %118 = arith.addf %117, %116 : vector<2x32xf32>
    %119 = arith.divf %117, %118 : vector<2x32xf32>
    %120 = vector.extract_strided_slice %102 {offsets = [0, 64], sizes = [2, 32], strides = [1, 1]} : vector<2x128xf32> to vector<2x32xf32>
    %cst_63 = arith.constant dense<0.000000e+00> : vector<2x32xf32>
    %121 = tpu.matmul %103, %15, %cst_63 {dimension_numbers = #tpu.dot_dimension_numbers<[1], [0], [0], [1], [0, 0, 1, 1], [], []>} : vector<2x32xf32>, vector<32x32xf32>, vector<2x32xf32> -> vector<2x32xf32>
    %122 = arith.addf %120, %121 : vector<2x32xf32>
    %123 = math.tanh %122 : vector<2x32xf32>
    %124 = vector.extract_strided_slice %102 {offsets = [0, 96], sizes = [2, 32], strides = [1, 1]} : vector<2x128xf32> to vector<2x32xf32>
    %cst_64 = arith.constant dense<0.000000e+00> : vector<2x32xf32>
    %125 = tpu.matmul %103, %16, %cst_64 {dimension_numbers = #tpu.dot_dimension_numbers<[1], [0], [0], [1], [0, 0, 1, 1], [], []>} : vector<2x32xf32>, vector<32x32xf32>, vector<2x32xf32> -> vector<2x32xf32>
    %126 = arith.addf %124, %125 : vector<2x32xf32>
    %127 = arith.negf %126 : vector<2x32xf32>
    %128 = math.exp %127 : vector<2x32xf32>
    %cst_65 = arith.constant 1.000000e+00 : f32
    %129 = vector.broadcast %cst_65 : f32 to vector<2x32xf32>
    %130 = arith.addf %129, %128 : vector<2x32xf32>
    %131 = arith.divf %129, %130 : vector<2x32xf32>
    %c0_66 = arith.constant 0 : index
    %c0_67 = arith.constant 0 : index
    %132 = vector.load %arg13[%c0_66, %c0_67] : memref<2x32xf32, #tpu.memory_space<vmem>>, vector<2x32xf32>
    %133 = arith.mulf %119, %132 : vector<2x32xf32>
    %134 = arith.mulf %111, %123 : vector<2x32xf32>
    %135 = arith.addf %133, %134 : vector<2x32xf32>
    %136 = math.tanh %135 : vector<2x32xf32>
    %137 = arith.mulf %131, %136 : vector<2x32xf32>
    %c0_68 = arith.constant 0 : index
    %c0_69 = arith.constant 0 : index
    %138 = vector.load %arg13[%c0_68, %c0_69] : memref<2x32xf32, #tpu.memory_space<vmem>>, vector<2x32xf32>
    tpu.vector_store %arg13[%c0_68, %c0_69], %135 {strides = array<i32>} : memref<2x32xf32, #tpu.memory_space<vmem>>, vector<2x32xf32>,
    %c0_70 = arith.constant 0 : index
    %c0_71 = arith.constant 0 : index
    %139 = vector.load %arg12[%c0_70, %c0_71] : memref<2x32xf32, #tpu.memory_space<vmem>>, vector<2x32xf32>
    tpu.vector_store %arg12[%c0_70, %c0_71], %137 {strides = array<i32>} : memref<2x32xf32, #tpu.memory_space<vmem>>, vector<2x32xf32>,
    %c0_72 = arith.constant 0 : index
    %c0_73 = arith.constant 0 : index
    %140 = vector.load %arg14[%c0_72, %c0_73] : memref<2x32xf32, #tpu.memory_space<vmem>>, vector<2x32xf32>
    %141 = arith.addf %140, %137 : vector<2x32xf32>
    %c0_74 = arith.constant 0 : index
    %c0_75 = arith.constant 0 : index
    %142 = vector.load %arg14[%c0_74, %c0_75] : memref<2x32xf32, #tpu.memory_space<vmem>>, vector<2x32xf32>
    tpu.vector_store %arg14[%c0_74, %c0_75], %141 {strides = array<i32>} : memref<2x32xf32, #tpu.memory_space<vmem>>, vector<2x32xf32>,
    %c3 = arith.constant 3 : index
    %c0_76 = arith.constant 0 : index
    %c0_77 = arith.constant 0 : index
    %143 = vector.load %arg11[%c3, %c0_76, %c0_77] : memref<8x2x128xf32, #tpu.memory_space<vmem>>, vector<1x2x128xf32>
    %144 = vector.shape_cast %143 : vector<1x2x128xf32> to vector<2x128xf32>
    %c0_78 = arith.constant 0 : index
    %c0_79 = arith.constant 0 : index
    %145 = vector.load %arg12[%c0_78, %c0_79] : memref<2x32xf32, #tpu.memory_space<vmem>>, vector<2x32xf32>
    %146 = vector.extract_strided_slice %144 {offsets = [0, 0], sizes = [2, 32], strides = [1, 1]} : vector<2x128xf32> to vector<2x32xf32>
    %cst_80 = arith.constant dense<0.000000e+00> : vector<2x32xf32>
    %147 = tpu.matmul %145, %13, %cst_80 {dimension_numbers = #tpu.dot_dimension_numbers<[1], [0], [0], [1], [0, 0, 1, 1], [], []>} : vector<2x32xf32>, vector<32x32xf32>, vector<2x32xf32> -> vector<2x32xf32>
    %148 = arith.addf %146, %147 : vector<2x32xf32>
    %149 = arith.negf %148 : vector<2x32xf32>
    %150 = math.exp %149 : vector<2x32xf32>
    %cst_81 = arith.constant 1.000000e+00 : f32
    %151 = vector.broadcast %cst_81 : f32 to vector<2x32xf32>
    %152 = arith.addf %151, %150 : vector<2x32xf32>
    %153 = arith.divf %151, %152 : vector<2x32xf32>
    %154 = vector.extract_strided_slice %144 {offsets = [0, 32], sizes = [2, 32], strides = [1, 1]} : vector<2x128xf32> to vector<2x32xf32>
    %cst_82 = arith.constant dense<0.000000e+00> : vector<2x32xf32>
    %155 = tpu.matmul %145, %14, %cst_82 {dimension_numbers = #tpu.dot_dimension_numbers<[1], [0], [0], [1], [0, 0, 1, 1], [], []>} : vector<2x32xf32>, vector<32x32xf32>, vector<2x32xf32> -> vector<2x32xf32>
    %156 = arith.addf %154, %155 : vector<2x32xf32>
    %157 = arith.negf %156 : vector<2x32xf32>
    %158 = math.exp %157 : vector<2x32xf32>
    %cst_83 = arith.constant 1.000000e+00 : f32
    %159 = vector.broadcast %cst_83 : f32 to vector<2x32xf32>
    %160 = arith.addf %159, %158 : vector<2x32xf32>
    %161 = arith.divf %159, %160 : vector<2x32xf32>
    %162 = vector.extract_strided_slice %144 {offsets = [0, 64], sizes = [2, 32], strides = [1, 1]} : vector<2x128xf32> to vector<2x32xf32>
    %cst_84 = arith.constant dense<0.000000e+00> : vector<2x32xf32>
    %163 = tpu.matmul %145, %15, %cst_84 {dimension_numbers = #tpu.dot_dimension_numbers<[1], [0], [0], [1], [0, 0, 1, 1], [], []>} : vector<2x32xf32>, vector<32x32xf32>, vector<2x32xf32> -> vector<2x32xf32>
    %164 = arith.addf %162, %163 : vector<2x32xf32>
    %165 = math.tanh %164 : vector<2x32xf32>
    %166 = vector.extract_strided_slice %144 {offsets = [0, 96], sizes = [2, 32], strides = [1, 1]} : vector<2x128xf32> to vector<2x32xf32>
    %cst_85 = arith.constant dense<0.000000e+00> : vector<2x32xf32>
    %167 = tpu.matmul %145, %16, %cst_85 {dimension_numbers = #tpu.dot_dimension_numbers<[1], [0], [0], [1], [0, 0, 1, 1], [], []>} : vector<2x32xf32>, vector<32x32xf32>, vector<2x32xf32> -> vector<2x32xf32>
    %168 = arith.addf %166, %167 : vector<2x32xf32>
    %169 = arith.negf %168 : vector<2x32xf32>
    %170 = math.exp %169 : vector<2x32xf32>
    %cst_86 = arith.constant 1.000000e+00 : f32
    %171 = vector.broadcast %cst_86 : f32 to vector<2x32xf32>
    %172 = arith.addf %171, %170 : vector<2x32xf32>
    %173 = arith.divf %171, %172 : vector<2x32xf32>
    %c0_87 = arith.constant 0 : index
    %c0_88 = arith.constant 0 : index
    %174 = vector.load %arg13[%c0_87, %c0_88] : memref<2x32xf32, #tpu.memory_space<vmem>>, vector<2x32xf32>
    %175 = arith.mulf %161, %174 : vector<2x32xf32>
    %176 = arith.mulf %153, %165 : vector<2x32xf32>
    %177 = arith.addf %175, %176 : vector<2x32xf32>
    %178 = math.tanh %177 : vector<2x32xf32>
    %179 = arith.mulf %173, %178 : vector<2x32xf32>
    %c0_89 = arith.constant 0 : index
    %c0_90 = arith.constant 0 : index
    %180 = vector.load %arg13[%c0_89, %c0_90] : memref<2x32xf32, #tpu.memory_space<vmem>>, vector<2x32xf32>
    tpu.vector_store %arg13[%c0_89, %c0_90], %177 {strides = array<i32>} : memref<2x32xf32, #tpu.memory_space<vmem>>, vector<2x32xf32>,
    %c0_91 = arith.constant 0 : index
    %c0_92 = arith.constant 0 : index
    %181 = vector.load %arg12[%c0_91, %c0_92] : memref<2x32xf32, #tpu.memory_space<vmem>>, vector<2x32xf32>
    tpu.vector_store %arg12[%c0_91, %c0_92], %179 {strides = array<i32>} : memref<2x32xf32, #tpu.memory_space<vmem>>, vector<2x32xf32>,
    %c0_93 = arith.constant 0 : index
    %c0_94 = arith.constant 0 : index
    %182 = vector.load %arg14[%c0_93, %c0_94] : memref<2x32xf32, #tpu.memory_space<vmem>>, vector<2x32xf32>
    %183 = arith.addf %182, %179 : vector<2x32xf32>
    %c0_95 = arith.constant 0 : index
    %c0_96 = arith.constant 0 : index
    %184 = vector.load %arg14[%c0_95, %c0_96] : memref<2x32xf32, #tpu.memory_space<vmem>>, vector<2x32xf32>
    tpu.vector_store %arg14[%c0_95, %c0_96], %183 {strides = array<i32>} : memref<2x32xf32, #tpu.memory_space<vmem>>, vector<2x32xf32>,
    %c4 = arith.constant 4 : index
    %c0_97 = arith.constant 0 : index
    %c0_98 = arith.constant 0 : index
    %185 = vector.load %arg11[%c4, %c0_97, %c0_98] : memref<8x2x128xf32, #tpu.memory_space<vmem>>, vector<1x2x128xf32>
    %186 = vector.shape_cast %185 : vector<1x2x128xf32> to vector<2x128xf32>
    %c0_99 = arith.constant 0 : index
    %c0_100 = arith.constant 0 : index
    %187 = vector.load %arg12[%c0_99, %c0_100] : memref<2x32xf32, #tpu.memory_space<vmem>>, vector<2x32xf32>
    %188 = vector.extract_strided_slice %186 {offsets = [0, 0], sizes = [2, 32], strides = [1, 1]} : vector<2x128xf32> to vector<2x32xf32>
    %cst_101 = arith.constant dense<0.000000e+00> : vector<2x32xf32>
    %189 = tpu.matmul %187, %13, %cst_101 {dimension_numbers = #tpu.dot_dimension_numbers<[1], [0], [0], [1], [0, 0, 1, 1], [], []>} : vector<2x32xf32>, vector<32x32xf32>, vector<2x32xf32> -> vector<2x32xf32>
    %190 = arith.addf %188, %189 : vector<2x32xf32>
    %191 = arith.negf %190 : vector<2x32xf32>
    %192 = math.exp %191 : vector<2x32xf32>
    %cst_102 = arith.constant 1.000000e+00 : f32
    %193 = vector.broadcast %cst_102 : f32 to vector<2x32xf32>
    %194 = arith.addf %193, %192 : vector<2x32xf32>
    %195 = arith.divf %193, %194 : vector<2x32xf32>
    %196 = vector.extract_strided_slice %186 {offsets = [0, 32], sizes = [2, 32], strides = [1, 1]} : vector<2x128xf32> to vector<2x32xf32>
    %cst_103 = arith.constant dense<0.000000e+00> : vector<2x32xf32>
    %197 = tpu.matmul %187, %14, %cst_103 {dimension_numbers = #tpu.dot_dimension_numbers<[1], [0], [0], [1], [0, 0, 1, 1], [], []>} : vector<2x32xf32>, vector<32x32xf32>, vector<2x32xf32> -> vector<2x32xf32>
    %198 = arith.addf %196, %197 : vector<2x32xf32>
    %199 = arith.negf %198 : vector<2x32xf32>
    %200 = math.exp %199 : vector<2x32xf32>
    %cst_104 = arith.constant 1.000000e+00 : f32
    %201 = vector.broadcast %cst_104 : f32 to vector<2x32xf32>
    %202 = arith.addf %201, %200 : vector<2x32xf32>
    %203 = arith.divf %201, %202 : vector<2x32xf32>
    %204 = vector.extract_strided_slice %186 {offsets = [0, 64], sizes = [2, 32], strides = [1, 1]} : vector<2x128xf32> to vector<2x32xf32>
    %cst_105 = arith.constant dense<0.000000e+00> : vector<2x32xf32>
    %205 = tpu.matmul %187, %15, %cst_105 {dimension_numbers = #tpu.dot_dimension_numbers<[1], [0], [0], [1], [0, 0, 1, 1], [], []>} : vector<2x32xf32>, vector<32x32xf32>, vector<2x32xf32> -> vector<2x32xf32>
    %206 = arith.addf %204, %205 : vector<2x32xf32>
    %207 = math.tanh %206 : vector<2x32xf32>
    %208 = vector.extract_strided_slice %186 {offsets = [0, 96], sizes = [2, 32], strides = [1, 1]} : vector<2x128xf32> to vector<2x32xf32>
    %cst_106 = arith.constant dense<0.000000e+00> : vector<2x32xf32>
    %209 = tpu.matmul %187, %16, %cst_106 {dimension_numbers = #tpu.dot_dimension_numbers<[1], [0], [0], [1], [0, 0, 1, 1], [], []>} : vector<2x32xf32>, vector<32x32xf32>, vector<2x32xf32> -> vector<2x32xf32>
    %210 = arith.addf %208, %209 : vector<2x32xf32>
    %211 = arith.negf %210 : vector<2x32xf32>
    %212 = math.exp %211 : vector<2x32xf32>
    %cst_107 = arith.constant 1.000000e+00 : f32
    %213 = vector.broadcast %cst_107 : f32 to vector<2x32xf32>
    %214 = arith.addf %213, %212 : vector<2x32xf32>
    %215 = arith.divf %213, %214 : vector<2x32xf32>
    %c0_108 = arith.constant 0 : index
    %c0_109 = arith.constant 0 : index
    %216 = vector.load %arg13[%c0_108, %c0_109] : memref<2x32xf32, #tpu.memory_space<vmem>>, vector<2x32xf32>
    %217 = arith.mulf %203, %216 : vector<2x32xf32>
    %218 = arith.mulf %195, %207 : vector<2x32xf32>
    %219 = arith.addf %217, %218 : vector<2x32xf32>
    %220 = math.tanh %219 : vector<2x32xf32>
    %221 = arith.mulf %215, %220 : vector<2x32xf32>
    %c0_110 = arith.constant 0 : index
    %c0_111 = arith.constant 0 : index
    %222 = vector.load %arg13[%c0_110, %c0_111] : memref<2x32xf32, #tpu.memory_space<vmem>>, vector<2x32xf32>
    tpu.vector_store %arg13[%c0_110, %c0_111], %219 {strides = array<i32>} : memref<2x32xf32, #tpu.memory_space<vmem>>, vector<2x32xf32>,
    %c0_112 = arith.constant 0 : index
    %c0_113 = arith.constant 0 : index
    %223 = vector.load %arg12[%c0_112, %c0_113] : memref<2x32xf32, #tpu.memory_space<vmem>>, vector<2x32xf32>
    tpu.vector_store %arg12[%c0_112, %c0_113], %221 {strides = array<i32>} : memref<2x32xf32, #tpu.memory_space<vmem>>, vector<2x32xf32>,
    %c0_114 = arith.constant 0 : index
    %c0_115 = arith.constant 0 : index
    %224 = vector.load %arg14[%c0_114, %c0_115] : memref<2x32xf32, #tpu.memory_space<vmem>>, vector<2x32xf32>
    %225 = arith.addf %224, %221 : vector<2x32xf32>
    %c0_116 = arith.constant 0 : index
    %c0_117 = arith.constant 0 : index
    %226 = vector.load %arg14[%c0_116, %c0_117] : memref<2x32xf32, #tpu.memory_space<vmem>>, vector<2x32xf32>
    tpu.vector_store %arg14[%c0_116, %c0_117], %225 {strides = array<i32>} : memref<2x32xf32, #tpu.memory_space<vmem>>, vector<2x32xf32>,
    %c5 = arith.constant 5 : index
    %c0_118 = arith.constant 0 : index
    %c0_119 = arith.constant 0 : index
    %227 = vector.load %arg11[%c5, %c0_118, %c0_119] : memref<8x2x128xf32, #tpu.memory_space<vmem>>, vector<1x2x128xf32>
    %228 = vector.shape_cast %227 : vector<1x2x128xf32> to vector<2x128xf32>
    %c0_120 = arith.constant 0 : index
    %c0_121 = arith.constant 0 : index
    %229 = vector.load %arg12[%c0_120, %c0_121] : memref<2x32xf32, #tpu.memory_space<vmem>>, vector<2x32xf32>
    %230 = vector.extract_strided_slice %228 {offsets = [0, 0], sizes = [2, 32], strides = [1, 1]} : vector<2x128xf32> to vector<2x32xf32>
    %cst_122 = arith.constant dense<0.000000e+00> : vector<2x32xf32>
    %231 = tpu.matmul %229, %13, %cst_122 {dimension_numbers = #tpu.dot_dimension_numbers<[1], [0], [0], [1], [0, 0, 1, 1], [], []>} : vector<2x32xf32>, vector<32x32xf32>, vector<2x32xf32> -> vector<2x32xf32>
    %232 = arith.addf %230, %231 : vector<2x32xf32>
    %233 = arith.negf %232 : vector<2x32xf32>
    %234 = math.exp %233 : vector<2x32xf32>
    %cst_123 = arith.constant 1.000000e+00 : f32
    %235 = vector.broadcast %cst_123 : f32 to vector<2x32xf32>
    %236 = arith.addf %235, %234 : vector<2x32xf32>
    %237 = arith.divf %235, %236 : vector<2x32xf32>
    %238 = vector.extract_strided_slice %228 {offsets = [0, 32], sizes = [2, 32], strides = [1, 1]} : vector<2x128xf32> to vector<2x32xf32>
    %cst_124 = arith.constant dense<0.000000e+00> : vector<2x32xf32>
    %239 = tpu.matmul %229, %14, %cst_124 {dimension_numbers = #tpu.dot_dimension_numbers<[1], [0], [0], [1], [0, 0, 1, 1], [], []>} : vector<2x32xf32>, vector<32x32xf32>, vector<2x32xf32> -> vector<2x32xf32>
    %240 = arith.addf %238, %239 : vector<2x32xf32>
    %241 = arith.negf %240 : vector<2x32xf32>
    %242 = math.exp %241 : vector<2x32xf32>
    %cst_125 = arith.constant 1.000000e+00 : f32
    %243 = vector.broadcast %cst_125 : f32 to vector<2x32xf32>
    %244 = arith.addf %243, %242 : vector<2x32xf32>
    %245 = arith.divf %243, %244 : vector<2x32xf32>
    %246 = vector.extract_strided_slice %228 {offsets = [0, 64], sizes = [2, 32], strides = [1, 1]} : vector<2x128xf32> to vector<2x32xf32>
    %cst_126 = arith.constant dense<0.000000e+00> : vector<2x32xf32>
    %247 = tpu.matmul %229, %15, %cst_126 {dimension_numbers = #tpu.dot_dimension_numbers<[1], [0], [0], [1], [0, 0, 1, 1], [], []>} : vector<2x32xf32>, vector<32x32xf32>, vector<2x32xf32> -> vector<2x32xf32>
    %248 = arith.addf %246, %247 : vector<2x32xf32>
    %249 = math.tanh %248 : vector<2x32xf32>
    %250 = vector.extract_strided_slice %228 {offsets = [0, 96], sizes = [2, 32], strides = [1, 1]} : vector<2x128xf32> to vector<2x32xf32>
    %cst_127 = arith.constant dense<0.000000e+00> : vector<2x32xf32>
    %251 = tpu.matmul %229, %16, %cst_127 {dimension_numbers = #tpu.dot_dimension_numbers<[1], [0], [0], [1], [0, 0, 1, 1], [], []>} : vector<2x32xf32>, vector<32x32xf32>, vector<2x32xf32> -> vector<2x32xf32>
    %252 = arith.addf %250, %251 : vector<2x32xf32>
    %253 = arith.negf %252 : vector<2x32xf32>
    %254 = math.exp %253 : vector<2x32xf32>
    %cst_128 = arith.constant 1.000000e+00 : f32
    %255 = vector.broadcast %cst_128 : f32 to vector<2x32xf32>
    %256 = arith.addf %255, %254 : vector<2x32xf32>
    %257 = arith.divf %255, %256 : vector<2x32xf32>
    %c0_129 = arith.constant 0 : index
    %c0_130 = arith.constant 0 : index
    %258 = vector.load %arg13[%c0_129, %c0_130] : memref<2x32xf32, #tpu.memory_space<vmem>>, vector<2x32xf32>
    %259 = arith.mulf %245, %258 : vector<2x32xf32>
    %260 = arith.mulf %237, %249 : vector<2x32xf32>
    %261 = arith.addf %259, %260 : vector<2x32xf32>
    %262 = math.tanh %261 : vector<2x32xf32>
    %263 = arith.mulf %257, %262 : vector<2x32xf32>
    %c0_131 = arith.constant 0 : index
    %c0_132 = arith.constant 0 : index
    %264 = vector.load %arg13[%c0_131, %c0_132] : memref<2x32xf32, #tpu.memory_space<vmem>>, vector<2x32xf32>
    tpu.vector_store %arg13[%c0_131, %c0_132], %261 {strides = array<i32>} : memref<2x32xf32, #tpu.memory_space<vmem>>, vector<2x32xf32>,
    %c0_133 = arith.constant 0 : index
    %c0_134 = arith.constant 0 : index
    %265 = vector.load %arg12[%c0_133, %c0_134] : memref<2x32xf32, #tpu.memory_space<vmem>>, vector<2x32xf32>
    tpu.vector_store %arg12[%c0_133, %c0_134], %263 {strides = array<i32>} : memref<2x32xf32, #tpu.memory_space<vmem>>, vector<2x32xf32>,
    %c0_135 = arith.constant 0 : index
    %c0_136 = arith.constant 0 : index
    %266 = vector.load %arg14[%c0_135, %c0_136] : memref<2x32xf32, #tpu.memory_space<vmem>>, vector<2x32xf32>
    %267 = arith.addf %266, %263 : vector<2x32xf32>
    %c0_137 = arith.constant 0 : index
    %c0_138 = arith.constant 0 : index
    %268 = vector.load %arg14[%c0_137, %c0_138] : memref<2x32xf32, #tpu.memory_space<vmem>>, vector<2x32xf32>
    tpu.vector_store %arg14[%c0_137, %c0_138], %267 {strides = array<i32>} : memref<2x32xf32, #tpu.memory_space<vmem>>, vector<2x32xf32>,
    %c6 = arith.constant 6 : index
    %c0_139 = arith.constant 0 : index
    %c0_140 = arith.constant 0 : index
    %269 = vector.load %arg11[%c6, %c0_139, %c0_140] : memref<8x2x128xf32, #tpu.memory_space<vmem>>, vector<1x2x128xf32>
    %270 = vector.shape_cast %269 : vector<1x2x128xf32> to vector<2x128xf32>
    %c0_141 = arith.constant 0 : index
    %c0_142 = arith.constant 0 : index
    %271 = vector.load %arg12[%c0_141, %c0_142] : memref<2x32xf32, #tpu.memory_space<vmem>>, vector<2x32xf32>
    %272 = vector.extract_strided_slice %270 {offsets = [0, 0], sizes = [2, 32], strides = [1, 1]} : vector<2x128xf32> to vector<2x32xf32>
    %cst_143 = arith.constant dense<0.000000e+00> : vector<2x32xf32>
    %273 = tpu.matmul %271, %13, %cst_143 {dimension_numbers = #tpu.dot_dimension_numbers<[1], [0], [0], [1], [0, 0, 1, 1], [], []>} : vector<2x32xf32>, vector<32x32xf32>, vector<2x32xf32> -> vector<2x32xf32>
    %274 = arith.addf %272, %273 : vector<2x32xf32>
    %275 = arith.negf %274 : vector<2x32xf32>
    %276 = math.exp %275 : vector<2x32xf32>
    %cst_144 = arith.constant 1.000000e+00 : f32
    %277 = vector.broadcast %cst_144 : f32 to vector<2x32xf32>
    %278 = arith.addf %277, %276 : vector<2x32xf32>
    %279 = arith.divf %277, %278 : vector<2x32xf32>
    %280 = vector.extract_strided_slice %270 {offsets = [0, 32], sizes = [2, 32], strides = [1, 1]} : vector<2x128xf32> to vector<2x32xf32>
    %cst_145 = arith.constant dense<0.000000e+00> : vector<2x32xf32>
    %281 = tpu.matmul %271, %14, %cst_145 {dimension_numbers = #tpu.dot_dimension_numbers<[1], [0], [0], [1], [0, 0, 1, 1], [], []>} : vector<2x32xf32>, vector<32x32xf32>, vector<2x32xf32> -> vector<2x32xf32>
    %282 = arith.addf %280, %281 : vector<2x32xf32>
    %283 = arith.negf %282 : vector<2x32xf32>
    %284 = math.exp %283 : vector<2x32xf32>
    %cst_146 = arith.constant 1.000000e+00 : f32
    %285 = vector.broadcast %cst_146 : f32 to vector<2x32xf32>
    %286 = arith.addf %285, %284 : vector<2x32xf32>
    %287 = arith.divf %285, %286 : vector<2x32xf32>
    %288 = vector.extract_strided_slice %270 {offsets = [0, 64], sizes = [2, 32], strides = [1, 1]} : vector<2x128xf32> to vector<2x32xf32>
    %cst_147 = arith.constant dense<0.000000e+00> : vector<2x32xf32>
    %289 = tpu.matmul %271, %15, %cst_147 {dimension_numbers = #tpu.dot_dimension_numbers<[1], [0], [0], [1], [0, 0, 1, 1], [], []>} : vector<2x32xf32>, vector<32x32xf32>, vector<2x32xf32> -> vector<2x32xf32>
    %290 = arith.addf %288, %289 : vector<2x32xf32>
    %291 = math.tanh %290 : vector<2x32xf32>
    %292 = vector.extract_strided_slice %270 {offsets = [0, 96], sizes = [2, 32], strides = [1, 1]} : vector<2x128xf32> to vector<2x32xf32>
    %cst_148 = arith.constant dense<0.000000e+00> : vector<2x32xf32>
    %293 = tpu.matmul %271, %16, %cst_148 {dimension_numbers = #tpu.dot_dimension_numbers<[1], [0], [0], [1], [0, 0, 1, 1], [], []>} : vector<2x32xf32>, vector<32x32xf32>, vector<2x32xf32> -> vector<2x32xf32>
    %294 = arith.addf %292, %293 : vector<2x32xf32>
    %295 = arith.negf %294 : vector<2x32xf32>
    %296 = math.exp %295 : vector<2x32xf32>
    %cst_149 = arith.constant 1.000000e+00 : f32
    %297 = vector.broadcast %cst_149 : f32 to vector<2x32xf32>
    %298 = arith.addf %297, %296 : vector<2x32xf32>
    %299 = arith.divf %297, %298 : vector<2x32xf32>
    %c0_150 = arith.constant 0 : index
    %c0_151 = arith.constant 0 : index
    %300 = vector.load %arg13[%c0_150, %c0_151] : memref<2x32xf32, #tpu.memory_space<vmem>>, vector<2x32xf32>
    %301 = arith.mulf %287, %300 : vector<2x32xf32>
    %302 = arith.mulf %279, %291 : vector<2x32xf32>
    %303 = arith.addf %301, %302 : vector<2x32xf32>
    %304 = math.tanh %303 : vector<2x32xf32>
    %305 = arith.mulf %299, %304 : vector<2x32xf32>
    %c0_152 = arith.constant 0 : index
    %c0_153 = arith.constant 0 : index
    %306 = vector.load %arg13[%c0_152, %c0_153] : memref<2x32xf32, #tpu.memory_space<vmem>>, vector<2x32xf32>
    tpu.vector_store %arg13[%c0_152, %c0_153], %303 {strides = array<i32>} : memref<2x32xf32, #tpu.memory_space<vmem>>, vector<2x32xf32>,
    %c0_154 = arith.constant 0 : index
    %c0_155 = arith.constant 0 : index
    %307 = vector.load %arg12[%c0_154, %c0_155] : memref<2x32xf32, #tpu.memory_space<vmem>>, vector<2x32xf32>
    tpu.vector_store %arg12[%c0_154, %c0_155], %305 {strides = array<i32>} : memref<2x32xf32, #tpu.memory_space<vmem>>, vector<2x32xf32>,
    %c0_156 = arith.constant 0 : index
    %c0_157 = arith.constant 0 : index
    %308 = vector.load %arg14[%c0_156, %c0_157] : memref<2x32xf32, #tpu.memory_space<vmem>>, vector<2x32xf32>
    %309 = arith.addf %308, %305 : vector<2x32xf32>
    %c0_158 = arith.constant 0 : index
    %c0_159 = arith.constant 0 : index
    %310 = vector.load %arg14[%c0_158, %c0_159] : memref<2x32xf32, #tpu.memory_space<vmem>>, vector<2x32xf32>
    tpu.vector_store %arg14[%c0_158, %c0_159], %309 {strides = array<i32>} : memref<2x32xf32, #tpu.memory_space<vmem>>, vector<2x32xf32>,
    %c7 = arith.constant 7 : index
    %c0_160 = arith.constant 0 : index
    %c0_161 = arith.constant 0 : index
    %311 = vector.load %arg11[%c7, %c0_160, %c0_161] : memref<8x2x128xf32, #tpu.memory_space<vmem>>, vector<1x2x128xf32>
    %312 = vector.shape_cast %311 : vector<1x2x128xf32> to vector<2x128xf32>
    %c0_162 = arith.constant 0 : index
    %c0_163 = arith.constant 0 : index
    %313 = vector.load %arg12[%c0_162, %c0_163] : memref<2x32xf32, #tpu.memory_space<vmem>>, vector<2x32xf32>
    %314 = vector.extract_strided_slice %312 {offsets = [0, 0], sizes = [2, 32], strides = [1, 1]} : vector<2x128xf32> to vector<2x32xf32>
    %cst_164 = arith.constant dense<0.000000e+00> : vector<2x32xf32>
    %315 = tpu.matmul %313, %13, %cst_164 {dimension_numbers = #tpu.dot_dimension_numbers<[1], [0], [0], [1], [0, 0, 1, 1], [], []>} : vector<2x32xf32>, vector<32x32xf32>, vector<2x32xf32> -> vector<2x32xf32>
    %316 = arith.addf %314, %315 : vector<2x32xf32>
    %317 = arith.negf %316 : vector<2x32xf32>
    %318 = math.exp %317 : vector<2x32xf32>
    %cst_165 = arith.constant 1.000000e+00 : f32
    %319 = vector.broadcast %cst_165 : f32 to vector<2x32xf32>
    %320 = arith.addf %319, %318 : vector<2x32xf32>
    %321 = arith.divf %319, %320 : vector<2x32xf32>
    %322 = vector.extract_strided_slice %312 {offsets = [0, 32], sizes = [2, 32], strides = [1, 1]} : vector<2x128xf32> to vector<2x32xf32>
    %cst_166 = arith.constant dense<0.000000e+00> : vector<2x32xf32>
    %323 = tpu.matmul %313, %14, %cst_166 {dimension_numbers = #tpu.dot_dimension_numbers<[1], [0], [0], [1], [0, 0, 1, 1], [], []>} : vector<2x32xf32>, vector<32x32xf32>, vector<2x32xf32> -> vector<2x32xf32>
    %324 = arith.addf %322, %323 : vector<2x32xf32>
    %325 = arith.negf %324 : vector<2x32xf32>
    %326 = math.exp %325 : vector<2x32xf32>
    %cst_167 = arith.constant 1.000000e+00 : f32
    %327 = vector.broadcast %cst_167 : f32 to vector<2x32xf32>
    %328 = arith.addf %327, %326 : vector<2x32xf32>
    %329 = arith.divf %327, %328 : vector<2x32xf32>
    %330 = vector.extract_strided_slice %312 {offsets = [0, 64], sizes = [2, 32], strides = [1, 1]} : vector<2x128xf32> to vector<2x32xf32>
    %cst_168 = arith.constant dense<0.000000e+00> : vector<2x32xf32>
    %331 = tpu.matmul %313, %15, %cst_168 {dimension_numbers = #tpu.dot_dimension_numbers<[1], [0], [0], [1], [0, 0, 1, 1], [], []>} : vector<2x32xf32>, vector<32x32xf32>, vector<2x32xf32> -> vector<2x32xf32>
    %332 = arith.addf %330, %331 : vector<2x32xf32>
    %333 = math.tanh %332 : vector<2x32xf32>
    %334 = vector.extract_strided_slice %312 {offsets = [0, 96], sizes = [2, 32], strides = [1, 1]} : vector<2x128xf32> to vector<2x32xf32>
    %cst_169 = arith.constant dense<0.000000e+00> : vector<2x32xf32>
    %335 = tpu.matmul %313, %16, %cst_169 {dimension_numbers = #tpu.dot_dimension_numbers<[1], [0], [0], [1], [0, 0, 1, 1], [], []>} : vector<2x32xf32>, vector<32x32xf32>, vector<2x32xf32> -> vector<2x32xf32>
    %336 = arith.addf %334, %335 : vector<2x32xf32>
    %337 = arith.negf %336 : vector<2x32xf32>
    %338 = math.exp %337 : vector<2x32xf32>
    %cst_170 = arith.constant 1.000000e+00 : f32
    %339 = vector.broadcast %cst_170 : f32 to vector<2x32xf32>
    %340 = arith.addf %339, %338 : vector<2x32xf32>
    %341 = arith.divf %339, %340 : vector<2x32xf32>
    %c0_171 = arith.constant 0 : index
    %c0_172 = arith.constant 0 : index
    %342 = vector.load %arg13[%c0_171, %c0_172] : memref<2x32xf32, #tpu.memory_space<vmem>>, vector<2x32xf32>
    %343 = arith.mulf %329, %342 : vector<2x32xf32>
    %344 = arith.mulf %321, %333 : vector<2x32xf32>
    %345 = arith.addf %343, %344 : vector<2x32xf32>
    %346 = math.tanh %345 : vector<2x32xf32>
    %347 = arith.mulf %341, %346 : vector<2x32xf32>
    %c0_173 = arith.constant 0 : index
    %c0_174 = arith.constant 0 : index
    %348 = vector.load %arg13[%c0_173, %c0_174] : memref<2x32xf32, #tpu.memory_space<vmem>>, vector<2x32xf32>
    tpu.vector_store %arg13[%c0_173, %c0_174], %345 {strides = array<i32>} : memref<2x32xf32, #tpu.memory_space<vmem>>, vector<2x32xf32>,
    %c0_175 = arith.constant 0 : index
    %c0_176 = arith.constant 0 : index
    %349 = vector.load %arg12[%c0_175, %c0_176] : memref<2x32xf32, #tpu.memory_space<vmem>>, vector<2x32xf32>
    tpu.vector_store %arg12[%c0_175, %c0_176], %347 {strides = array<i32>} : memref<2x32xf32, #tpu.memory_space<vmem>>, vector<2x32xf32>,
    %c0_177 = arith.constant 0 : index
    %c0_178 = arith.constant 0 : index
    %350 = vector.load %arg14[%c0_177, %c0_178] : memref<2x32xf32, #tpu.memory_space<vmem>>, vector<2x32xf32>
    %351 = arith.addf %350, %347 : vector<2x32xf32>
    %c0_179 = arith.constant 0 : index
    %c0_180 = arith.constant 0 : index
    %352 = vector.load %arg14[%c0_179, %c0_180] : memref<2x32xf32, #tpu.memory_space<vmem>>, vector<2x32xf32>
    tpu.vector_store %arg14[%c0_179, %c0_180], %351 {strides = array<i32>} : memref<2x32xf32, #tpu.memory_space<vmem>>, vector<2x32xf32>,
    %c0_i32_181 = arith.constant 0 : i32
    %353 = arith.cmpi eq, %arg1, %c0_i32_181 : i32
    %354 = arith.extui %353 : i1 to i32
    %c0_i32_182 = arith.constant 0 : i32
    %355 = arith.cmpi ne, %354, %c0_i32_182 : i32
    scf.if %355 {
      %c0_183 = arith.constant 0 : index
      %c0_184 = arith.constant 0 : index
      %356 = vector.load %arg14[%c0_183, %c0_184] : memref<2x32xf32, #tpu.memory_space<vmem>>, vector<2x32xf32>
      %cst_185 = arith.constant 1.250000e-01 : f32
      %357 = vector.broadcast %cst_185 : f32 to vector<2x32xf32>
      %358 = arith.mulf %356, %357 : vector<2x32xf32>
      %c0_186 = arith.constant 0 : index
      %c0_187 = arith.constant 0 : index
      %359 = vector.load %arg6[%c0_186, %c0_187] : memref<32x32xf32, #tpu.memory_space<vmem>>, vector<32x32xf32>
      %cst_188 = arith.constant dense<0.000000e+00> : vector<2x32xf32>
      %360 = tpu.matmul %358, %359, %cst_188 {dimension_numbers = #tpu.dot_dimension_numbers<[1], [0], [0], [1], [0, 0, 1, 1], [], []>} : vector<2x32xf32>, vector<32x32xf32>, vector<2x32xf32> -> vector<2x32xf32>
      %c0_189 = arith.constant 0 : index
      %c0_190 = arith.constant 0 : index
      %361 = vector.load %arg7[%c0_189, %c0_190] : memref<1x32xf32, #tpu.memory_space<vmem>>, vector<1x32xf32>
      %362 = vector.broadcast %361 : vector<1x32xf32> to vector<2x32xf32>
      %363 = arith.addf %360, %362 : vector<2x32xf32>
      %cst_191 = arith.constant 0.000000e+00 : f32
      %364 = vector.broadcast %cst_191 : f32 to vector<2x32xf32>
      %365 = arith.maximumf %363, %364 : vector<2x32xf32>
      %c0_192 = arith.constant 0 : index
      %c0_193 = arith.constant 0 : index
      %366 = vector.load %arg8[%c0_192, %c0_193] : memref<32x8xf32, #tpu.memory_space<vmem>>, vector<32x8xf32>
      %cst_194 = arith.constant dense<0.000000e+00> : vector<2x8xf32>
      %367 = tpu.matmul %365, %366, %cst_194 {dimension_numbers = #tpu.dot_dimension_numbers<[1], [0], [0], [1], [0, 0, 1, 1], [], []>} : vector<2x32xf32>, vector<32x8xf32>, vector<2x8xf32> -> vector<2x8xf32>
      %c0_195 = arith.constant 0 : index
      %c0_196 = arith.constant 0 : index
      %368 = vector.load %arg9[%c0_195, %c0_196] : memref<1x8xf32, #tpu.memory_space<vmem>>, vector<1x8xf32>
      %369 = vector.broadcast %368 : vector<1x8xf32> to vector<2x8xf32>
      %370 = arith.addf %367, %369 : vector<2x8xf32>
      %c0_197 = arith.constant 0 : index
      %c0_198 = arith.constant 0 : index
      %c0_199 = arith.constant 0 : index
      %371 = vector.load %arg10[%c0_197, %c0_198, %c0_199] : memref<1x2x8xf32, #tpu.memory_space<vmem>>, vector<1x2x8xf32>
      %372 = vector.shape_cast %371 : vector<1x2x8xf32> to vector<2x8xf32>
      %373 = vector.shape_cast %370 : vector<2x8xf32> to vector<1x2x8xf32>
      tpu.vector_store %arg10[%c0_197, %c0_198, %c0_199], %373 {strides = array<i32>} : memref<1x2x8xf32, #tpu.memory_space<vmem>>, vector<1x2x8xf32>,
    } else {
    }
    return
  }
  func.func @transform_0(%arg0: i32, %arg1: i32) -> (i32, i32, i32) {
    %c0_i32 = arith.constant 0 : i32
    %c0_i32_0 = arith.constant 0 : i32
    return %arg1, %arg0, %c0_i32 : i32, i32, i32
  }
  func.func @transform_1(%arg0: i32, %arg1: i32) -> (i32, i32) {
    %c0_i32 = arith.constant 0 : i32
    %c0_i32_0 = arith.constant 0 : i32
    %c0_i32_1 = arith.constant 0 : i32
    return %c0_i32, %c0_i32_0 : i32, i32
  }
  func.func @transform_2(%arg0: i32, %arg1: i32) -> (i32, i32) {
    %c0_i32 = arith.constant 0 : i32
    %c0_i32_0 = arith.constant 0 : i32
    %c0_i32_1 = arith.constant 0 : i32
    return %c0_i32, %c0_i32_0 : i32, i32
  }
  func.func @transform_3(%arg0: i32, %arg1: i32) -> (i32, i32) {
    %c0_i32 = arith.constant 0 : i32
    %c0_i32_0 = arith.constant 0 : i32
    %c0_i32_1 = arith.constant 0 : i32
    return %c0_i32, %c0_i32_0 : i32, i32
  }
  func.func @transform_4(%arg0: i32, %arg1: i32) -> (i32, i32) {
    %c0_i32 = arith.constant 0 : i32
    %c0_i32_0 = arith.constant 0 : i32
    %c0_i32_1 = arith.constant 0 : i32
    return %c0_i32, %c0_i32_0 : i32, i32
  }
  func.func @transform_5(%arg0: i32, %arg1: i32) -> (i32, i32) {
    %c0_i32 = arith.constant 0 : i32
    %c0_i32_0 = arith.constant 0 : i32
    %c0_i32_1 = arith.constant 0 : i32
    return %c0_i32, %c0_i32_0 : i32, i32
  }
  func.func @transform_6(%arg0: i32, %arg1: i32) -> (i32, i32) {
    %c0_i32 = arith.constant 0 : i32
    %c0_i32_0 = arith.constant 0 : i32
    %c0_i32_1 = arith.constant 0 : i32
    return %c0_i32, %c0_i32_0 : i32, i32
  }
  func.func @transform_7(%arg0: i32, %arg1: i32) -> (i32, i32) {
    %c0_i32 = arith.constant 0 : i32
    %c0_i32_0 = arith.constant 0 : i32
    %c0_i32_1 = arith.constant 0 : i32
    return %c0_i32, %c0_i32_0 : i32, i32
  }
  func.func @transform_8(%arg0: i32, %arg1: i32) -> (i32, i32, i32) {
    %c0_i32 = arith.constant 0 : i32
    %c0_i32_0 = arith.constant 0 : i32
    %c0_i32_1 = arith.constant 0 : i32
    return %arg0, %c0_i32, %c0_i32_0 : i32, i32, i32
  }
}

</mosaic_0001>

<bundles_post_ra>
// kernel: lstm_relu_forward.2
= control target key start
LH: loop header
LB: loop body
LE: loop exit
PB: predicated region body
PF: predicated region fallthrough
CT: control target
= control target key end

     0   :  { %v54_v0 = vlaneseq  ;;  %v4057_v4 = vmov 1983009808   ;;  %v4058_v6 = vmov 0.0|0.0   ;;  %vm21_vm0 = vcmask 254976   ;;  %s4061_s5 = smov 64   ;;  %s4062_s6 = smov 96   ;;  %s4514_s3 = inlined_call_operand.vmem [shape: f32[32,128], index: 3, kind: input, shape index: {}]   ;;  %s4515_s1 = inlined_call_operand.vmem [shape: f32[16,128], index: 1, kind: input, shape index: {}]   ;;  %s4516_s0 = inlined_call_operand.vmem [shape: f32[8,2,16], index: 0, kind: input, shape index: {}]   ;;  %s4517_s2 = inlined_call_operand.vmem [shape: f32[1,128], index: 2, kind: input, shape index: {}]   ;;  %s4518_s4 = inlined_call_operand.vmem [shape: f32[8,2,32], index: 4, kind: output, shape index: {}]  }
   0x1   :  { %v215_v1 = vld [vmem:[%s4514_s3] sm:$0xff]  ;;  %v216_v2 = vld [vmem:[%s4514_s3 + $0x8] sm:$0xff]  ;;  %v217_v3 = vld [vmem:[%s4514_s3 + $0x10] sm:$0xff]  ;;  %v52_v5 = vunpack.c.l.s4 %v4057_v4  ;;  %3700 = vmatprep.subr.bf16.mxu1 %v4058_v6  ;;  %vm4059_vm1 = vmmov 0   ;;  %v4060_v13 = vmov 0.0   ;;  %vm83_vm2 = vcmask 130048  }
   0x2   :  { %v3899_v7 = vpack.i.bf16 %v216_v2, %v215_v1  ;;  %v4099_v8 = vpack.c.bf16 %v216_v2, %v215_v1  ;;  %v218_v9 = vld [vmem:[%s4514_s3 + $0x18] sm:$0xff]  ;;  %v32_v10 = vld [vmem:[%s4515_s1] sm:$0xff]  ;;  %v33_v11 = vld [vmem:[%s4515_s1 + $0x8] sm:$0xff]  ;;  %v55_v12 = vshrl.u32 %v54_v0, 7  ;;  %3352 = vmatprep.mubr.msk.f32.mxu1 %vm4059_vm1, %v4060_v13  ;;  %22 = vst.msk [vmem:[#allocation3] sm:$0x3] %vm21_vm0, %v4060_v13 }
   0x3   :  { %23 = vst.msk [vmem:[#allocation4] sm:$0x3] %vm21_vm0, %v4060_v13  ;;  %v3696_v14 = vpack.c.bf16 %v33_v11, %v32_v10  ;;  %v24_v15 = vld [vmem:[%s4516_s0] sm:$0x3]  ;;  %v25_v16 = vld [vmem:[%s4516_s0 + $0x2] sm:$0x3]  ;;  %v3904_v18 = vpack.i.bf16 %v218_v9, %v217_v3  ;;  %v53_v21 = vunpack.c.0.s8 %v52_v5  ;;  %v4133_v23 = vpack.c.bf16 %v218_v9, %v217_v3 }
   0x4   :  { %v26_v17 = vld [vmem:[%s4516_s0 + $0x4] sm:$0x3]  ;;  %3900 = vrot.lane.b32.xlu0 %v3899_v7, %s4061_s5  ;;  %3910 = vrot.lane.b32.xlu1 %v3899_v7, %s4062_s6  ;;  %v27_v19 = vld [vmem:[%s4516_s0 + $0x6] sm:$0x3]  ;;  %v49_v20 = vcombine.low %v24_v15, %v25_v16  ;;  %vm221_vm3 = vcmask 261120  }
   0x5   :  { %v28_v22 = vld [vmem:[%s4516_s0 + $0x8] sm:$0x3]  ;;  %3697 = vmatprep.subr.bf16.mxu0 %v3696_v14  ;;  %v50_v24 = vcombine.low %v26_v17, %v27_v19  ;;  %v29_v25 = vld [vmem:[%s4516_s0 + $0xa] sm:$0x3]  ;;  %v30_v26 = vld [vmem:[%s4516_s0 + $0xc] sm:$0x3]  ;;  %3702 = vmatpush3.bf16.msra.mxu1 %v4099_v8  ;;  %v4145_v28 = vsub.s32 %v53_v21, %v55_v12 }
   0x6   :  { %v31_v27 = vld [vmem:[%s4516_s0 + $0xe] sm:$0x3]  ;;  %3699 = vmatpush3.bf16.msra.mxu0 %v3696_v14  ;;  %v66_v29 = vcombine.low %v28_v22, %v29_v25  ;;  %3703 = vmatprep.subr.bf16.mxu1 %v4058_v6  ;;  %s4063_s0 = smov 32   ;;  %v3103_v62 = vld [vmem:[%s4517_s2] ss:$0 sm:$0xff] }
   0x7   :  { %v67_v30 = vcombine.low %v30_v26, %v31_v27  ;;  %3706 = vmatprep.subr.bf16.mxu0 %v4058_v6  ;;  %v57_v31 = vrot.slane %v49_v20, %v4145_v28  ;;  %v64_v32 = vrot.slane %v50_v24, %v4145_v28 }
   0x8   :  { %3905 = vrot.lane.b32.xlu0 %v3904_v18, %s4061_s5  ;;  %3915 = vrot.lane.b32.xlu1 %v3904_v18, %s4062_s6  ;;  %v74_v33 = vrot.slane %v66_v29, %v4145_v28 }
   0x9   :  { %v81_v34 = vrot.slane %v67_v30, %v4145_v28  ;;  %3705 = vmatpush3.bf16.msra.mxu1 %v4133_v23  ;;  %v220_v35 = vld [vmem:[#allocation3] sm:$0x3]  ;;  %v65_v36 = vcombine.low %v57_v31, %v64_v32 }
   0xa   :  { %3712 = vmatprep.subr.bf16.mxu1 %v4058_v6  ;;  %v580_v29 = vld [vmem:[#allocation4] sm:$0x3] }
   0xb   :  { %v82_v37 = vcombine.low %v74_v33, %v81_v34  ;;  %3341 = vmatprep.mubr.msk.f32.mxu0 %vm83_vm2, %v65_v36 }
   0xc   :  { %3353 = vmatmul.mubr.msk.f32.vlgmr.msra.gmra.mrb[0].mxu1 %vm221_vm3, %v220_v35  ;;  %3920 = vrot.lane.b32.xlu0 %v3899_v7, %s4063_s0 }
   0xd   :  { %3342 = vmatmul.mubr.msk.f32.vlgmr.msra.gmra.mrb[0].mxu0 %vm83_vm2, %v82_v37  ;;  %3374 = vmatprep.mubr.msk.f32.mxu1 %vm4059_vm1, %v4060_v13 }
   0xe   :  { %3363 = vmatprep.mubr.msk.f32.mxu0 %vm4059_vm1, %v4060_v13  ;;  %3925 = vrot.lane.b32.xlu1 %v3904_v18, %s4063_s0 }
  0x76   :  { %v3901_v38 = vpop.permute.xlu0 %3900  ;;  %v3911_v39 = vpop.permute.xlu1 %3910 }
  0x77   :  { %v3903_v40 = vunpack.i.h.bf16 %v3901_v38  ;;  %v3902_v41 = vunpack.i.l.bf16 %v3901_v38  ;;  %v3913_v42 = vunpack.i.h.bf16 %v3911_v39  ;;  %v3912_v43 = vunpack.i.l.bf16 %v3911_v39 }
  0x79   :  { %v4164_v44 = vpack.c.bf16 %v3903_v40, %v3902_v41  ;;  %v4166_v45 = vpack.c.bf16 %v3913_v42, %v3912_v43 }
  0x7a   :  { %v3906_v46 = vpop.permute.xlu0 %3905  ;;  %v3916_v47 = vpop.permute.xlu1 %3915 }
  0x7b   :  { %v3908_v48 = vunpack.i.h.bf16 %v3906_v46  ;;  %v3907_v49 = vunpack.i.l.bf16 %v3906_v46  ;;  %3714 = vmatpush3.bf16.msra.mxu1 %v4164_v44  ;;  %v3918_v50 = vunpack.i.h.bf16 %v3916_v47  ;;  %v3917_v51 = vunpack.i.l.bf16 %v3916_v47  ;;  %3708 = vmatpush3.bf16.msra.mxu0 %v4166_v45 }
  0x7c   :  { %3715 = vmatprep.subr.bf16.mxu1 %v4058_v6  ;;  %3709 = vmatprep.subr.bf16.mxu0 %v4058_v6 }
  0x7d   :  { %v4172_v52 = vpack.c.bf16 %v3908_v48, %v3907_v49  ;;  %v4174_v53 = vpack.c.bf16 %v3918_v50, %v3917_v51 }
  0x7e   :  { %v3921_v54 = vpop.permute.xlu0 %3920 }
  0x7f   :  { %3717 = vmatpush3.bf16.msra.mxu1 %v4172_v52  ;;  %3711 = vmatpush3.bf16.msra.mxu0 %v4174_v53  ;;  %v3923_v55 = vunpack.i.h.bf16 %v3921_v54  ;;  %v3922_v56 = vunpack.i.l.bf16 %v3921_v54 }
  0x80   :  { %3718 = vmatprep.subr.bf16.mxu0 %v4058_v6  ;;  %3724 = vmatprep.subr.bf16.mxu1 %v4058_v6  ;;  %v3926_v57 = vpop.permute.xlu1 %3925 }
  0x81   :  { %v3928_v58 = vunpack.i.h.bf16 %v3926_v57  ;;  %v3927_v59 = vunpack.i.l.bf16 %v3926_v57  ;;  %v4182_v60 = vpack.c.bf16 %v3923_v55, %v3922_v56 }
  0x82   :  { %3375 = vmatmul.mubr.msk.f32.vlgmr.msra.gmra.mrb[2].mxu1 %vm221_vm3, %v220_v35  ;;  %3364 = vmatmul.mubr.msk.f32.vlgmr.msra.gmra.mrb[2].mxu0 %vm221_vm3, %v220_v35 }
  0x83   :  { %3385 = vmatprep.mubr.msk.f32.mxu0 %vm4059_vm1, %v4060_v13  ;;  %3726 = vmatpush3.bf16.msra.mxu1 %v4099_v8  ;;  %v4190_v61 = vpack.c.bf16 %v3928_v58, %v3927_v59 }
  0x84   :  { %3727 = vmatprep.subr.bf16.mxu1 %v4058_v6  ;;  %3396 = vmatprep.mubr.msk.f32.mxu1 %vm4059_vm1, %v4060_v13 }
  0x85   :  { %3720 = vmatpush3.bf16.msra.mxu0 %v4182_v60 }
  0x86   :  { %3721 = vmatprep.subr.bf16.mxu0 %v4058_v6 }
  0x87   :  { %3729 = vmatpush3.bf16.msra.mxu1 %v4133_v23 }
  0x88   :  { %3736 = vmatprep.subr.bf16.mxu1 %v4058_v6 }
  0x89   :  { %3723 = vmatpush3.bf16.msra.mxu0 %v4190_v61 }
  0x8a   :  { %3730 = vmatprep.subr.bf16.mxu0 %v4058_v6 }
  0x8c   :  { %3386 = vmatmul.mubr.msk.f32.vlgmr.msra.gmra.mrb[4].mxu0 %vm221_vm3, %v220_v35 }
  0x8d   :  { %3732 = vmatpush3.bf16.msra.mxu0 %v4166_v45  ;;  %3407 = vmatprep.mubr.msk.f32.mxu0 %vm4059_vm1, %v4060_v13 }
  0x8e   :  { %3733 = vmatprep.subr.bf16.mxu0 %v4058_v6 }
  0x91   :  { %3735 = vmatpush3.bf16.msra.mxu0 %v4174_v53 }
  0x92   :  { %3742 = vmatprep.subr.bf16.mxu0 %v4058_v6 }
  0xdf   :  { %v291_v63 = vpop.f32.mrb[0].mxu1 }
  0xe0   :  { %v3343_v0 = vpop.f32.mrb[0].mxu0  ;;  %v3354_v1 = vpop.f32.mrb[1].mxu1 }
  0xe1   :  { %v160_v2 = vadd.f32 %v3343_v0, %v3103_v62  ;;  %v154_v3 = vpop.f32.mrb[1].mxu0 }
  0xe2   :  { %v155_v4 = vadd.f32 %v3103_v62, %v154_v3 }
  0xe3   :  { %v182_v5 = vcombine.high %v160_v2, %v160_v2  ;;  %v189_v7 = vrot.slane %v160_v2, %v4145_v28  ;;  %3108 = vst.sshfl [vmem:[#allocation2 + $0x8] sm:$0x3 pattern:$0x76325410] %v160_v2 }
  0xe4   :  { %v165_v9 = vcombine.high %v155_v4, %v155_v4  ;;  %v172_v10 = vrot.slane %v155_v4, %v4145_v28  ;;  %3106 = vst.sshfl [vmem:[#allocation2] sm:$0x3 pattern:$0x76325410] %v155_v4 }
  0xe5   :  { %v196_v11 = vrot.slane %v182_v5, %v4145_v28  ;;  %v197_v12 = vcombine.high %v189_v7, %v189_v7  ;;  %3109 = vst.sshfl [vmem:[#allocation2 + $0xc] sm:$0x3 pattern:$0x76325410] %v182_v5 }
  0xe6   :  { %v179_v14 = vrot.slane %v165_v9, %v4145_v28  ;;  %v180_v15 = vcombine.high %v172_v10, %v172_v10  ;;  %3107 = vst.sshfl [vmem:[#allocation2 + $0x4] sm:$0x3 pattern:$0x76325410] %v165_v9 }
  0xe7   :  { %v198_v16 = vcombine.high %v196_v11, %v196_v11  ;;  %212 = vst [vmem:[#allocation2 + $0xa] sm:$0x3] %v197_v12 }
  0xe8   :  { %v181_v17 = vcombine.high %v179_v14, %v179_v14  ;;  %208 = vst [vmem:[#allocation2 + $0x2] sm:$0x3] %v180_v15 }
  0xe9   :  { %214 = vst [vmem:[#allocation2 + $0xe] sm:$0x3] %v198_v16 }
  0xea   :  { %210 = vst [vmem:[#allocation2 + $0x6] sm:$0x3] %v181_v17 }
  0xeb   :  { %v219_v25 = vld [vmem:[#allocation2] sm:$0x3] }
  0xec   :  { %v295_v30 = vadd.f32 %v291_v63, %v219_v25 }
  0xee   :  { %v3111_v31 = vmul.f32 -1.442695, %v295_v30 }
  0xef   :  { %v615_v11 = vld [vmem:[#allocation2 + $0x2] sm:$0x3] }
 0x155   :  { %v477_v18 = vpop.f32.mrb[2].mxu1  ;;  %v384_v19 = vpop.f32.mrb[2].mxu0 }
 0x156   :  { %482 = vrot.lane.b32.xlu0 %v477_v18, %s4061_s5  ;;  %v3376_v20 = vpop.f32.mrb[3].mxu1  ;;  %v3365_v21 = vpop.f32.mrb[3].mxu0 }
 0x15a   :  { %389 = vrot.lane.b32.xlu0 %v384_v19, %s4063_s0 }
 0x15f   :  { %v565_v22 = vpop.f32.mrb[4].mxu0 }
 0x160   :  { %v3387_v24 = vpop.f32.mrb[5].mxu0 }
 0x1c8   :  { %v483_v26 = vpop.permute.xlu0 %482 }
 0x1c9   :  { %v485_v27 = vadd.f32 %v483_v26, %v219_v25 }
 0x1cb   :  { %3929 = vtanh.f32 %v485_v27 }
 0x1cc   :  { %3931 = vpow2.f32 %v3111_v31  ;;  %v390_v37 = vpop.permute.xlu0 %389 }
 0x1cd   :  { %v392_v38 = vadd.f32 %v390_v37, %v219_v25 }
 0x1cf   :  { %v3113_v39 = vmul.f32 -1.442695, %v392_v38 }
 0x1d5   :  { %v3930_v28 = vpop.eup %3929 }
 0x1d6   :  { %587 = vrot.lane.b32.xlu1 %v3930_v28, %s4061_s5  ;;  %v3932_v32 = vpop.eup %3931 }
 0x1d7   :  { %v299_v33 = vadd.f32 1.0, %v3932_v32 }
 0x1d9   :  { %3933 = vrcp.f32 %v299_v33 }
 0x1da   :  { %582 = vrot.lane.b32.xlu1 %v580_v29, %s4063_s0  ;;  %3935 = vpow2.f32 %v3113_v39 }
 0x1de   :  { %570 = vrot.lane.b32.xlu1 %v565_v22, %s4062_s6 }
 0x1e3   :  { %v3934_v34 = vpop.eup %3933 }
 0x1e4   :  { %v3936_v40 = vpop.eup %3935 }
 0x1e5   :  { %v396_v41 = vadd.f32 1.0, %v3936_v40 }
 0x1e7   :  { %3937 = vrcp.f32 %v396_v41 }
 0x1f1   :  { %v3938_v43 = vpop.eup %3937 }
 0x248   :  { %v588_v35 = vpop.permute.xlu1 %587 }
 0x249   :  { %v590_v36 = vmul.f32 %v3934_v34, %v588_v35 }
 0x24b   :  { %592 = vrot.lane.b32.xlu0 %v590_v36, %s4063_s0 }
 0x24c   :  { %v583_v42 = vpop.permute.xlu1 %582 }
 0x24d   :  { %v585_v46 = vmul.f32 %v3938_v43, %v583_v42 }
 0x250   :  { %v571_v50 = vpop.permute.xlu1 %570 }
 0x251   :  { %v573_v51 = vadd.f32 %v571_v50, %v219_v25 }
 0x253   :  { %v3116_v54 = vmul.f32 -1.442695, %v573_v51 }
 0x2bd   :  { %v593_v47 = vpop.permute.xlu0 %592 }
 0x2be   :  { %v595_v48 = vadd.f32 %v593_v47, %v585_v46 }
 0x2c0   :  { %3939 = vtanh.f32 %v595_v48 }
 0x2c1   :  { %3941 = vpow2.f32 %v3116_v54 }
 0x2ca   :  { %v3940_v49 = vpop.eup %3939 }
 0x2cb   :  { %598 = vrot.lane.b32.xlu0 %v3940_v49, %s4061_s5  ;;  %v3942_v55 = vpop.eup %3941 }
 0x2cc   :  { %v577_v56 = vadd.f32 1.0, %v3942_v55 }
 0x2ce   :  { %3943 = vrcp.f32 %v577_v56 }
 0x2d8   :  { %v3944_v57 = vpop.eup %3943 }
 0x33d   :  { %v599_v58 = vpop.permute.xlu0 %598 }
 0x33e   :  { %v601_v59 = vmul.f32 %v3944_v57, %v599_v58 }
 0x340   :  { %609 = vrot.lane.b32.xlu1 %v601_v59, %s4063_s0  ;;  %v970_v59 = vld [vmem:[#allocation2 + $0x4] sm:$0x3] }
 0x344   :  { %603 = vrot.lane.b32.xlu1 %v595_v48, %s4062_s6 }
 0x3b2   :  { %v610_v62 = vpop.permute.xlu1 %609 }
 0x3b3   :  { %612 = vst.msk [vmem:[#allocation3] sm:$0x3] %vm21_vm0, %v610_v62  ;;  %613 = vst.msk [vmem:[%s4518_s4] sm:$0x3] %vm21_vm0, %v610_v62 }
 0x3b6   :  { %v604_v63 = vpop.permute.xlu1 %603 }
 0x3b7   :  { %607 = vst.msk [vmem:[#allocation4] sm:$0x3] %vm21_vm0, %v604_v63 }
 0x3ba   :  { %v616_v0 = vld [vmem:[#allocation3] sm:$0x3] }
 0x3bb   :  { %3397 = vmatmul.mubr.msk.f32.vlgmr.msra.gmra.mrb[4].mxu1 %vm221_vm3, %v616_v0  ;;  %3408 = vmatmul.mubr.msk.f32.vlgmr.msra.gmra.mrb[6].mxu0 %vm221_vm3, %v616_v0 }
 0x3bc   :  { %3738 = vmatpush3.bf16.msra.mxu1 %v4164_v44  ;;  %3744 = vmatpush3.bf16.msra.mxu0 %v4182_v60 }
 0x3bd   :  { %3739 = vmatprep.subr.bf16.mxu1 %v4058_v6  ;;  %3745 = vmatprep.subr.bf16.mxu0 %v4058_v6 }
 0x3be   :  { %3418 = vmatprep.mubr.msk.f32.mxu1 %vm4059_vm1, %v4060_v13  ;;  %3429 = vmatprep.mubr.msk.f32.mxu0 %vm4059_vm1, %v4060_v13  ;;  %v935_v16 = vld [vmem:[#allocation4] sm:$0x3] }
 0x3c0   :  { %3741 = vmatpush3.bf16.msra.mxu1 %v4172_v52  ;;  %3747 = vmatpush3.bf16.msra.mxu0 %v4190_v61 }
 0x3c1   :  { %3754 = vmatprep.subr.bf16.mxu0 %v4058_v6  ;;  %3748 = vmatprep.subr.bf16.mxu1 %v4058_v6 }
 0x3c3   :  { %3419 = vmatmul.mubr.msk.f32.vlgmr.msra.gmra.mrb[6].mxu1 %vm221_vm3, %v616_v0  ;;  %3430 = vmatmul.mubr.msk.f32.vlgmr.msra.gmra.mrb[8].mxu0 %vm221_vm3, %v616_v0 }
 0x3c4   :  { %3756 = vmatpush3.bf16.msra.mxu0 %v4166_v45  ;;  %3750 = vmatpush3.bf16.msra.mxu1 %v4099_v8 }
 0x3c5   :  { %3757 = vmatprep.subr.bf16.mxu0 %v4058_v6  ;;  %3751 = vmatprep.subr.bf16.mxu1 %v4058_v6 }
 0x3c6   :  { %3440 = vmatprep.mubr.msk.f32.mxu1 %vm4059_vm1, %v4060_v13  ;;  %3451 = vmatprep.mubr.msk.f32.mxu0 %vm4059_vm1, %v4060_v13 }
 0x3c8   :  { %3759 = vmatpush3.bf16.msra.mxu0 %v4174_v53  ;;  %3753 = vmatpush3.bf16.msra.mxu1 %v4133_v23 }
 0x3c9   :  { %3760 = vmatprep.subr.bf16.mxu1 %v4058_v6  ;;  %3766 = vmatprep.subr.bf16.mxu0 %v4058_v6 }
 0x48e   :  { %v686_v1 = vpop.f32.mrb[4].mxu1  ;;  %v763_v2 = vpop.f32.mrb[6].mxu0 }
 0x48f   :  { %768 = vrot.lane.b32.xlu1 %v763_v2, %s4063_s0  ;;  %v3398_v3 = vpop.f32.mrb[5].mxu1  ;;  %v3409_v4 = vpop.f32.mrb[7].mxu0  ;;  %v690_v17 = vadd.f32 %v686_v1, %v615_v11 }
 0x491   :  { %v3118_v18 = vmul.f32 -1.442695, %v690_v17 }
 0x496   :  { %v844_v5 = vpop.f32.mrb[6].mxu1  ;;  %v920_v7 = vpop.f32.mrb[8].mxu0 }
 0x497   :  { %v3431_v9 = vpop.f32.mrb[9].mxu0  ;;  %849 = vrot.lane.b32.xlu0 %v844_v5, %s4061_s5  ;;  %v3420_v10 = vpop.f32.mrb[7].mxu1 }
 0x501   :  { %v769_v25 = vpop.permute.xlu1 %768 }
 0x502   :  { %v771_v26 = vadd.f32 %v769_v25, %v615_v11 }
 0x504   :  { %v3120_v27 = vmul.f32 -1.442695, %v771_v26 }
 0x509   :  { %v850_v12 = vpop.permute.xlu0 %849 }
 0x50a   :  { %v852_v14 = vadd.f32 %v850_v12, %v615_v11 }
 0x50c   :  { %3945 = vtanh.f32 %v852_v14 }
 0x50d   :  { %3947 = vpow2.f32 %v3118_v18 }
 0x516   :  { %v3946_v15 = vpop.eup %3945 }
 0x517   :  { %942 = vrot.lane.b32.xlu0 %v3946_v15, %s4061_s5  ;;  %v3948_v19 = vpop.eup %3947 }
 0x518   :  { %v694_v20 = vadd.f32 1.0, %v3948_v19 }
 0x51a   :  { %3949 = vrcp.f32 %v694_v20 }
 0x51b   :  { %937 = vrot.lane.b32.xlu0 %v935_v16, %s4063_s0  ;;  %3951 = vpow2.f32 %v3120_v27 }
 0x51f   :  { %925 = vrot.lane.b32.xlu0 %v920_v7, %s4062_s6 }
 0x524   :  { %v3950_v21 = vpop.eup %3949 }
 0x525   :  { %v3952_v28 = vpop.eup %3951 }
 0x526   :  { %v775_v29 = vadd.f32 1.0, %v3952_v28 }
 0x528   :  { %3953 = vrcp.f32 %v775_v29 }
 0x532   :  { %v3954_v31 = vpop.eup %3953 }
 0x589   :  { %v943_v22 = vpop.permute.xlu0 %942 }
 0x58a   :  { %v945_v24 = vmul.f32 %v3950_v21, %v943_v22 }
 0x58c   :  { %947 = vrot.lane.b32.xlu1 %v945_v24, %s4063_s0 }
 0x58d   :  { %v938_v30 = vpop.permute.xlu0 %937 }
 0x58e   :  { %v940_v32 = vmul.f32 %v3954_v31, %v938_v30 }
 0x591   :  { %v926_v36 = vpop.permute.xlu0 %925 }
 0x592   :  { %v928_v37 = vadd.f32 %v926_v36, %v615_v11 }
 0x594   :  { %v3123_v38 = vmul.f32 -1.442695, %v928_v37 }
 0x5fe   :  { %v948_v33 = vpop.permute.xlu1 %947 }
 0x5ff   :  { %v950_v34 = vadd.f32 %v948_v33, %v940_v32 }
 0x601   :  { %3955 = vtanh.f32 %v950_v34 }
 0x602   :  { %3957 = vpow2.f32 %v3123_v38 }
 0x60b   :  { %v3956_v35 = vpop.eup %3955 }
 0x60c   :  { %953 = vrot.lane.b32.xlu1 %v3956_v35, %s4061_s5  ;;  %v3958_v39 = vpop.eup %3957 }
 0x60d   :  { %v932_v40 = vadd.f32 1.0, %v3958_v39 }
 0x60f   :  { %3959 = vrcp.f32 %v932_v40 }
 0x619   :  { %v3960_v41 = vpop.eup %3959 }
 0x67e   :  { %v954_v42 = vpop.permute.xlu1 %953 }
 0x67f   :  { %v956_v43 = vmul.f32 %v3960_v41, %v954_v42 }
 0x681   :  { %963 = vrot.lane.b32.xlu0 %v956_v43, %s4063_s0  ;;  %v1325_v43 = vld [vmem:[#allocation2 + $0x6] sm:$0x3] }
 0x685   :  { %958 = vrot.lane.b32.xlu0 %v950_v34, %s4062_s6 }
 0x6f3   :  { %v964_v46 = vpop.permute.xlu0 %963 }
 0x6f4   :  { %966 = vst.msk [vmem:[#allocation3] sm:$0x3] %vm21_vm0, %v964_v46  ;;  %3124 = vst.msk [vmem:[%s4518_s4 + $0x2] sm:$0x3] %vm21_vm0, %v964_v46 }
 0x6f7   :  { %v959_v47 = vpop.permute.xlu0 %958 }
 0x6f8   :  { %961 = vst.msk [vmem:[#allocation4] sm:$0x3] %vm21_vm0, %v959_v47 }
 0x6fb   :  { %v971_v48 = vld [vmem:[#allocation3] sm:$0x3] }
 0x6fc   :  { %3441 = vmatmul.mubr.msk.f32.vlgmr.msra.gmra.mrb[8].mxu1 %vm221_vm3, %v971_v48  ;;  %3452 = vmatmul.mubr.msk.f32.vlgmr.msra.gmra.mrb[10].mxu0 %vm221_vm3, %v971_v48 }
 0x6fd   :  { %3762 = vmatpush3.bf16.msra.mxu1 %v4164_v44  ;;  %3768 = vmatpush3.bf16.msra.mxu0 %v4182_v60 }
 0x6fe   :  { %3763 = vmatprep.subr.bf16.mxu1 %v4058_v6  ;;  %3769 = vmatprep.subr.bf16.mxu0 %v4058_v6 }
 0x6ff   :  { %3462 = vmatprep.mubr.msk.f32.mxu1 %vm4059_vm1, %v4060_v13  ;;  %3473 = vmatprep.mubr.msk.f32.mxu0 %vm4059_vm1, %v4060_v13  ;;  %v1290_v1 = vld [vmem:[#allocation4] sm:$0x3] }
 0x701   :  { %3765 = vmatpush3.bf16.msra.mxu1 %v4172_v52  ;;  %3771 = vmatpush3.bf16.msra.mxu0 %v4190_v61 }
 0x702   :  { %3778 = vmatprep.subr.bf16.mxu0 %v4058_v6  ;;  %3772 = vmatprep.subr.bf16.mxu1 %v4058_v6 }
 0x704   :  { %3463 = vmatmul.mubr.msk.f32.vlgmr.msra.gmra.mrb[10].mxu1 %vm221_vm3, %v971_v48  ;;  %3474 = vmatmul.mubr.msk.f32.vlgmr.msra.gmra.mrb[12].mxu0 %vm221_vm3, %v971_v48 }
 0x705   :  { %3780 = vmatpush3.bf16.msra.mxu0 %v4166_v45  ;;  %3774 = vmatpush3.bf16.msra.mxu1 %v4099_v8 }
 0x706   :  { %3781 = vmatprep.subr.bf16.mxu0 %v4058_v6  ;;  %3775 = vmatprep.subr.bf16.mxu1 %v4058_v6 }
 0x707   :  { %3484 = vmatprep.mubr.msk.f32.mxu1 %vm4059_vm1, %v4060_v13  ;;  %3495 = vmatprep.mubr.msk.f32.mxu0 %vm4059_vm1, %v4060_v13 }
 0x709   :  { %3783 = vmatpush3.bf16.msra.mxu0 %v4174_v53  ;;  %3777 = vmatpush3.bf16.msra.mxu1 %v4133_v23 }
 0x70a   :  { %3784 = vmatprep.subr.bf16.mxu1 %v4058_v6  ;;  %3790 = vmatprep.subr.bf16.mxu0 %v4058_v6 }
 0x7cf   :  { %v1041_v49 = vpop.f32.mrb[8].mxu1  ;;  %v1118_v50 = vpop.f32.mrb[10].mxu0 }
 0x7d0   :  { %1123 = vrot.lane.b32.xlu0 %v1118_v50, %s4063_s0  ;;  %v3442_v51 = vpop.f32.mrb[9].mxu1  ;;  %v3453_v54 = vpop.f32.mrb[11].mxu0  ;;  %v1045_v2 = vadd.f32 %v1041_v49, %v970_v59 }
 0x7d2   :  { %v3126_v3 = vmul.f32 -1.442695, %v1045_v2 }
 0x7d7   :  { %v1199_v55 = vpop.f32.mrb[10].mxu1  ;;  %v1275_v56 = vpop.f32.mrb[12].mxu0 }
 0x7d8   :  { %v3475_v57 = vpop.f32.mrb[13].mxu0  ;;  %1204 = vrot.lane.b32.xlu1 %v1199_v55, %s4061_s5  ;;  %v3464_v58 = vpop.f32.mrb[11].mxu1 }
 0x842   :  { %v1124_v11 = vpop.permute.xlu0 %1123 }
 0x843   :  { %v1126_v12 = vadd.f32 %v1124_v11, %v970_v59 }
 0x845   :  { %v3128_v14 = vmul.f32 -1.442695, %v1126_v12 }
 0x84a   :  { %v1205_v62 = vpop.permute.xlu1 %1204 }
 0x84b   :  { %v1207_v63 = vadd.f32 %v1205_v62, %v970_v59 }
 0x84d   :  { %3961 = vtanh.f32 %v1207_v63 }
 0x84e   :  { %3963 = vpow2.f32 %v3126_v3 }
 0x857   :  { %v3962_v0 = vpop.eup %3961 }
 0x858   :  { %1297 = vrot.lane.b32.xlu1 %v3962_v0, %s4061_s5  ;;  %v3964_v4 = vpop.eup %3963 }
 0x859   :  { %v1049_v5 = vadd.f32 1.0, %v3964_v4 }
 0x85b   :  { %3965 = vrcp.f32 %v1049_v5 }
 0x85c   :  { %1292 = vrot.lane.b32.xlu1 %v1290_v1, %s4063_s0  ;;  %3967 = vpow2.f32 %v3128_v14 }
 0x860   :  { %1280 = vrot.lane.b32.xlu1 %v1275_v56, %s4062_s6 }
 0x865   :  { %v3966_v7 = vpop.eup %3965 }
 0x866   :  { %v3968_v15 = vpop.eup %3967 }
 0x867   :  { %v1130_v16 = vadd.f32 1.0, %v3968_v15 }
 0x869   :  { %3969 = vrcp.f32 %v1130_v16 }
 0x873   :  { %v3970_v18 = vpop.eup %3969 }
 0x8ca   :  { %v1298_v9 = vpop.permute.xlu1 %1297 }
 0x8cb   :  { %v1300_v10 = vmul.f32 %v3966_v7, %v1298_v9 }
 0x8cd   :  { %1302 = vrot.lane.b32.xlu0 %v1300_v10, %s4063_s0 }
 0x8ce   :  { %v1293_v17 = vpop.permute.xlu1 %1292 }
 0x8cf   :  { %v1295_v19 = vmul.f32 %v3970_v18, %v1293_v17 }
 0x8d2   :  { %v1281_v24 = vpop.permute.xlu1 %1280 }
 0x8d3   :  { %v1283_v25 = vadd.f32 %v1281_v24, %v970_v59 }
 0x8d5   :  { %v3131_v26 = vmul.f32 -1.442695, %v1283_v25 }
 0x93f   :  { %v1303_v20 = vpop.permute.xlu0 %1302 }
 0x940   :  { %v1305_v21 = vadd.f32 %v1303_v20, %v1295_v19 }
 0x942   :  { %3971 = vtanh.f32 %v1305_v21 }
 0x943   :  { %3973 = vpow2.f32 %v3131_v26 }
 0x94c   :  { %v3972_v22 = vpop.eup %3971 }
 0x94d   :  { %1308 = vrot.lane.b32.xlu0 %v3972_v22, %s4061_s5  ;;  %v3974_v27 = vpop.eup %3973 }
 0x94e   :  { %v1287_v28 = vadd.f32 1.0, %v3974_v27 }
 0x950   :  { %3975 = vrcp.f32 %v1287_v28 }
 0x95a   :  { %v3976_v29 = vpop.eup %3975 }
 0x9bf   :  { %v1309_v30 = vpop.permute.xlu0 %1308 }
 0x9c0   :  { %v1311_v31 = vmul.f32 %v3976_v29, %v1309_v30 }
 0x9c2   :  { %1318 = vrot.lane.b32.xlu1 %v1311_v31, %s4063_s0  ;;  %v1680_v31 = vld [vmem:[#allocation2 + $0x8] sm:$0x3] }
 0x9c6   :  { %1313 = vrot.lane.b32.xlu1 %v1305_v21, %s4062_s6 }
 0xa34   :  { %v1319_v32 = vpop.permute.xlu1 %1318 }
 0xa35   :  { %1321 = vst.msk [vmem:[#allocation3] sm:$0x3] %vm21_vm0, %v1319_v32  ;;  %3132 = vst.msk [vmem:[%s4518_s4 + $0x4] sm:$0x3] %vm21_vm0, %v1319_v32 }
 0xa38   :  { %v1314_v33 = vpop.permute.xlu1 %1313 }
 0xa39   :  { %1316 = vst.msk [vmem:[#allocation4] sm:$0x3] %vm21_vm0, %v1314_v33 }
 0xa3c   :  { %v1326_v34 = vld [vmem:[#allocation3] sm:$0x3] }
 0xa3d   :  { %3485 = vmatmul.mubr.msk.f32.vlgmr.msra.gmra.mrb[12].mxu1 %vm221_vm3, %v1326_v34  ;;  %3496 = vmatmul.mubr.msk.f32.vlgmr.msra.gmra.mrb[14].mxu0 %vm221_vm3, %v1326_v34 }
 0xa3e   :  { %3786 = vmatpush3.bf16.msra.mxu1 %v4164_v44  ;;  %3792 = vmatpush3.bf16.msra.mxu0 %v4182_v60 }
 0xa3f   :  { %3787 = vmatprep.subr.bf16.mxu1 %v4058_v6  ;;  %3793 = vmatprep.subr.bf16.mxu0 %v4058_v6 }
 0xa40   :  { %3506 = vmatprep.mubr.msk.f32.mxu1 %vm4059_vm1, %v4060_v13  ;;  %3517 = vmatprep.mubr.msk.f32.mxu0 %vm4059_vm1, %v4060_v13  ;;  %v1645_v49 = vld [vmem:[#allocation4] sm:$0x3] }
 0xa42   :  { %3789 = vmatpush3.bf16.msra.mxu1 %v4172_v52  ;;  %3795 = vmatpush3.bf16.msra.mxu0 %v4190_v61 }
 0xa43   :  { %3802 = vmatprep.subr.bf16.mxu0 %v4058_v6  ;;  %3796 = vmatprep.subr.bf16.mxu1 %v4058_v6 }
 0xa45   :  { %3507 = vmatmul.mubr.msk.f32.vlgmr.msra.gmra.mrb[14].mxu1 %vm221_vm3, %v1326_v34  ;;  %3518 = vmatmul.mubr.msk.f32.vlgmr.msra.gmra.mrb[16].mxu0 %vm221_vm3, %v1326_v34 }
 0xa46   :  { %3804 = vmatpush3.bf16.msra.mxu0 %v4166_v45  ;;  %3798 = vmatpush3.bf16.msra.mxu1 %v4099_v8 }
 0xa47   :  { %3805 = vmatprep.subr.bf16.mxu0 %v4058_v6  ;;  %3799 = vmatprep.subr.bf16.mxu1 %v4058_v6 }
 0xa48   :  { %3528 = vmatprep.mubr.msk.f32.mxu1 %vm4059_vm1, %v4060_v13  ;;  %3539 = vmatprep.mubr.msk.f32.mxu0 %vm4059_vm1, %v4060_v13 }
 0xa4a   :  { %3807 = vmatpush3.bf16.msra.mxu0 %v4174_v53  ;;  %3801 = vmatpush3.bf16.msra.mxu1 %v4133_v23 }
 0xa4b   :  { %3808 = vmatprep.subr.bf16.mxu1 %v4058_v6  ;;  %3814 = vmatprep.subr.bf16.mxu0 %v4058_v6 }
 0xb10   :  { %v1396_v35 = vpop.f32.mrb[12].mxu1  ;;  %v1473_v36 = vpop.f32.mrb[14].mxu0 }
 0xb11   :  { %1478 = vrot.lane.b32.xlu1 %v1473_v36, %s4063_s0  ;;  %v3486_v37 = vpop.f32.mrb[13].mxu1  ;;  %v3497_v38 = vpop.f32.mrb[15].mxu0  ;;  %v1400_v50 = vadd.f32 %v1396_v35, %v1325_v43 }
 0xb13   :  { %v3134_v51 = vmul.f32 -1.442695, %v1400_v50 }
 0xb18   :  { %v1554_v39 = vpop.f32.mrb[14].mxu1  ;;  %v1630_v40 = vpop.f32.mrb[16].mxu0 }
 0xb19   :  { %v3519_v41 = vpop.f32.mrb[17].mxu0  ;;  %1559 = vrot.lane.b32.xlu0 %v1554_v39, %s4061_s5  ;;  %v3508_v42 = vpop.f32.mrb[15].mxu1 }
 0xb83   :  { %v1479_v59 = vpop.permute.xlu1 %1478 }
 0xb84   :  { %v1481_v62 = vadd.f32 %v1479_v59, %v1325_v43 }
 0xb86   :  { %v3136_v63 = vmul.f32 -1.442695, %v1481_v62 }
 0xb8b   :  { %v1560_v46 = vpop.permute.xlu0 %1559 }
 0xb8c   :  { %v1562_v47 = vadd.f32 %v1560_v46, %v1325_v43 }
 0xb8e   :  { %3977 = vtanh.f32 %v1562_v47 }
 0xb8f   :  { %3979 = vpow2.f32 %v3134_v51 }
 0xb98   :  { %v3978_v48 = vpop.eup %3977 }
 0xb99   :  { %1652 = vrot.lane.b32.xlu0 %v3978_v48, %s4061_s5  ;;  %v3980_v54 = vpop.eup %3979 }
 0xb9a   :  { %v1404_v55 = vadd.f32 1.0, %v3980_v54 }
 0xb9c   :  { %3981 = vrcp.f32 %v1404_v55 }
 0xb9d   :  { %1647 = vrot.lane.b32.xlu0 %v1645_v49, %s4063_s0  ;;  %3983 = vpow2.f32 %v3136_v63 }
 0xba1   :  { %1635 = vrot.lane.b32.xlu0 %v1630_v40, %s4062_s6 }
 0xba6   :  { %v3982_v56 = vpop.eup %3981 }
 0xba7   :  { %v3984_v0 = vpop.eup %3983 }
 0xba8   :  { %v1485_v1 = vadd.f32 1.0, %v3984_v0 }
 0xbaa   :  { %3985 = vrcp.f32 %v1485_v1 }
 0xbb4   :  { %v3986_v3 = vpop.eup %3985 }
 0xc0b   :  { %v1653_v57 = vpop.permute.xlu0 %1652 }
 0xc0c   :  { %v1655_v58 = vmul.f32 %v3982_v56, %v1653_v57 }
 0xc0e   :  { %1657 = vrot.lane.b32.xlu1 %v1655_v58, %s4063_s0 }
 0xc0f   :  { %v1648_v2 = vpop.permute.xlu0 %1647 }
 0xc10   :  { %v1650_v4 = vmul.f32 %v3986_v3, %v1648_v2 }
 0xc13   :  { %v1636_v10 = vpop.permute.xlu0 %1635 }
 0xc14   :  { %v1638_v11 = vadd.f32 %v1636_v10, %v1325_v43 }
 0xc16   :  { %v3139_v12 = vmul.f32 -1.442695, %v1638_v11 }
 0xc80   :  { %v1658_v5 = vpop.permute.xlu1 %1657 }
 0xc81   :  { %v1660_v7 = vadd.f32 %v1658_v5, %v1650_v4 }
 0xc83   :  { %3987 = vtanh.f32 %v1660_v7 }
 0xc84   :  { %3989 = vpow2.f32 %v3139_v12 }
 0xc8d   :  { %v3988_v9 = vpop.eup %3987 }
 0xc8e   :  { %1663 = vrot.lane.b32.xlu1 %v3988_v9, %s4061_s5  ;;  %v3990_v14 = vpop.eup %3989 }
 0xc8f   :  { %v1642_v15 = vadd.f32 1.0, %v3990_v14 }
 0xc91   :  { %3991 = vrcp.f32 %v1642_v15 }
 0xc9b   :  { %v3992_v16 = vpop.eup %3991 }
 0xd00   :  { %v1664_v17 = vpop.permute.xlu1 %1663 }
 0xd01   :  { %v1666_v18 = vmul.f32 %v3992_v16, %v1664_v17 }
 0xd03   :  { %1673 = vrot.lane.b32.xlu0 %v1666_v18, %s4063_s0  ;;  %v2035_v18 = vld [vmem:[#allocation2 + $0xa] sm:$0x3] }
 0xd07   :  { %1668 = vrot.lane.b32.xlu0 %v1660_v7, %s4062_s6 }
 0xd75   :  { %v1674_v19 = vpop.permute.xlu0 %1673 }
 0xd76   :  { %1676 = vst.msk [vmem:[#allocation3] sm:$0x3] %vm21_vm0, %v1674_v19  ;;  %3140 = vst.msk [vmem:[%s4518_s4 + $0x6] sm:$0x3] %vm21_vm0, %v1674_v19 }
 0xd79   :  { %v1669_v20 = vpop.permute.xlu0 %1668 }
 0xd7a   :  { %1671 = vst.msk [vmem:[#allocation4] sm:$0x3] %vm21_vm0, %v1669_v20 }
 0xd7d   :  { %v1681_v21 = vld [vmem:[#allocation3] sm:$0x3] }
 0xd7e   :  { %3529 = vmatmul.mubr.msk.f32.vlgmr.msra.gmra.mrb[16].mxu1 %vm221_vm3, %v1681_v21  ;;  %3540 = vmatmul.mubr.msk.f32.vlgmr.msra.gmra.mrb[18].mxu0 %vm221_vm3, %v1681_v21 }
 0xd7f   :  { %3810 = vmatpush3.bf16.msra.mxu1 %v4164_v44  ;;  %3816 = vmatpush3.bf16.msra.mxu0 %v4182_v60 }
 0xd80   :  { %3811 = vmatprep.subr.bf16.mxu1 %v4058_v6  ;;  %3817 = vmatprep.subr.bf16.mxu0 %v4058_v6 }
 0xd81   :  { %3550 = vmatprep.mubr.msk.f32.mxu1 %vm4059_vm1, %v4060_v13  ;;  %3561 = vmatprep.mubr.msk.f32.mxu0 %vm4059_vm1, %v4060_v13  ;;  %v2000_v35 = vld [vmem:[#allocation4] sm:$0x3] }
 0xd83   :  { %3813 = vmatpush3.bf16.msra.mxu1 %v4172_v52  ;;  %3819 = vmatpush3.bf16.msra.mxu0 %v4190_v61 }
 0xd84   :  { %3826 = vmatprep.subr.bf16.mxu0 %v4058_v6  ;;  %3820 = vmatprep.subr.bf16.mxu1 %v4058_v6 }
 0xd86   :  { %3551 = vmatmul.mubr.msk.f32.vlgmr.msra.gmra.mrb[18].mxu1 %vm221_vm3, %v1681_v21  ;;  %3562 = vmatmul.mubr.msk.f32.vlgmr.msra.gmra.mrb[20].mxu0 %vm221_vm3, %v1681_v21 }
 0xd87   :  { %3828 = vmatpush3.bf16.msra.mxu0 %v4166_v45  ;;  %3822 = vmatpush3.bf16.msra.mxu1 %v4099_v8 }
 0xd88   :  { %3829 = vmatprep.subr.bf16.mxu0 %v4058_v6  ;;  %3823 = vmatprep.subr.bf16.mxu1 %v4058_v6 }
 0xd89   :  { %3572 = vmatprep.mubr.msk.f32.mxu1 %vm4059_vm1, %v4060_v13  ;;  %3583 = vmatprep.mubr.msk.f32.mxu0 %vm4059_vm1, %v4060_v13 }
 0xd8b   :  { %3831 = vmatpush3.bf16.msra.mxu0 %v4174_v53  ;;  %3825 = vmatpush3.bf16.msra.mxu1 %v4133_v23 }
 0xd8c   :  { %3832 = vmatprep.subr.bf16.mxu1 %v4058_v6  ;;  %3838 = vmatprep.subr.bf16.mxu0 %v4058_v6 }
 0xe51   :  { %v1751_v22 = vpop.f32.mrb[16].mxu1  ;;  %v1828_v24 = vpop.f32.mrb[18].mxu0 }
 0xe52   :  { %1833 = vrot.lane.b32.xlu0 %v1828_v24, %s4063_s0  ;;  %v3530_v25 = vpop.f32.mrb[17].mxu1  ;;  %v3541_v26 = vpop.f32.mrb[19].mxu0  ;;  %v1755_v36 = vadd.f32 %v1751_v22, %v1680_v31 }
 0xe54   :  { %v3142_v37 = vmul.f32 -1.442695, %v1755_v36 }
 0xe59   :  { %v1909_v27 = vpop.f32.mrb[18].mxu1  ;;  %v1985_v28 = vpop.f32.mrb[20].mxu0 }
 0xe5a   :  { %v3563_v29 = vpop.f32.mrb[21].mxu0  ;;  %1914 = vrot.lane.b32.xlu1 %v1909_v27, %s4061_s5  ;;  %v3552_v30 = vpop.f32.mrb[19].mxu1 }
 0xec4   :  { %v1834_v43 = vpop.permute.xlu0 %1833 }
 0xec5   :  { %v1836_v46 = vadd.f32 %v1834_v43, %v1680_v31 }
 0xec7   :  { %v3144_v47 = vmul.f32 -1.442695, %v1836_v46 }
 0xecc   :  { %v1915_v32 = vpop.permute.xlu1 %1914 }
 0xecd   :  { %v1917_v33 = vadd.f32 %v1915_v32, %v1680_v31 }
 0xecf   :  { %3993 = vtanh.f32 %v1917_v33 }
 0xed0   :  { %3995 = vpow2.f32 %v3142_v37 }
 0xed9   :  { %v3994_v34 = vpop.eup %3993 }
 0xeda   :  { %2007 = vrot.lane.b32.xlu1 %v3994_v34, %s4061_s5  ;;  %v3996_v38 = vpop.eup %3995 }
 0xedb   :  { %v1759_v39 = vadd.f32 1.0, %v3996_v38 }
 0xedd   :  { %3997 = vrcp.f32 %v1759_v39 }
 0xede   :  { %2002 = vrot.lane.b32.xlu1 %v2000_v35, %s4063_s0  ;;  %3999 = vpow2.f32 %v3144_v47 }
 0xee2   :  { %1990 = vrot.lane.b32.xlu1 %v1985_v28, %s4062_s6 }
 0xee7   :  { %v3998_v40 = vpop.eup %3997 }
 0xee8   :  { %v4000_v48 = vpop.eup %3999 }
 0xee9   :  { %v1840_v49 = vadd.f32 1.0, %v4000_v48 }
 0xeeb   :  { %4001 = vrcp.f32 %v1840_v49 }
 0xef5   :  { %v4002_v51 = vpop.eup %4001 }
 0xf4c   :  { %v2008_v41 = vpop.permute.xlu1 %2007 }
 0xf4d   :  { %v2010_v42 = vmul.f32 %v3998_v40, %v2008_v41 }
 0xf4f   :  { %2012 = vrot.lane.b32.xlu0 %v2010_v42, %s4063_s0 }
 0xf50   :  { %v2003_v50 = vpop.permute.xlu1 %2002 }
 0xf51   :  { %v2005_v54 = vmul.f32 %v4002_v51, %v2003_v50 }
 0xf54   :  { %v1991_v58 = vpop.permute.xlu1 %1990 }
 0xf55   :  { %v1993_v59 = vadd.f32 %v1991_v58, %v1680_v31 }
 0xf57   :  { %v3147_v62 = vmul.f32 -1.442695, %v1993_v59 }
 0xfc1   :  { %v2013_v55 = vpop.permute.xlu0 %2012 }
 0xfc2   :  { %v2015_v56 = vadd.f32 %v2013_v55, %v2005_v54 }
 0xfc4   :  { %4003 = vtanh.f32 %v2015_v56 }
 0xfc5   :  { %4005 = vpow2.f32 %v3147_v62 }
 0xfce   :  { %v4004_v57 = vpop.eup %4003 }
 0xfcf   :  { %2018 = vrot.lane.b32.xlu0 %v4004_v57, %s4061_s5  ;;  %v4006_v63 = vpop.eup %4005 }
 0xfd0   :  { %v1997_v0 = vadd.f32 1.0, %v4006_v63 }
 0xfd2   :  { %4007 = vrcp.f32 %v1997_v0 }
 0xfdc   :  { %v4008_v1 = vpop.eup %4007 }
0x1041   :  { %v2019_v2 = vpop.permute.xlu0 %2018 }
0x1042   :  { %v2021_v3 = vmul.f32 %v4008_v1, %v2019_v2  ;;  %v2390_v1 = vld [vmem:[#allocation2 + $0xc] sm:$0x3] }
0x1044   :  { %2028 = vrot.lane.b32.xlu1 %v2021_v3, %s4063_s0 }
0x1048   :  { %2023 = vrot.lane.b32.xlu1 %v2015_v56, %s4062_s6 }
0x10b6   :  { %v2029_v4 = vpop.permute.xlu1 %2028 }
0x10b7   :  { %2031 = vst.msk [vmem:[#allocation3] sm:$0x3] %vm21_vm0, %v2029_v4  ;;  %3148 = vst.msk [vmem:[%s4518_s4 + $0x8] sm:$0x3] %vm21_vm0, %v2029_v4 }
0x10ba   :  { %v2024_v5 = vpop.permute.xlu1 %2023 }
0x10bb   :  { %2026 = vst.msk [vmem:[#allocation4] sm:$0x3] %vm21_vm0, %v2024_v5 }
0x10be   :  { %v2036_v7 = vld [vmem:[#allocation3] sm:$0x3] }
0x10bf   :  { %3573 = vmatmul.mubr.msk.f32.vlgmr.msra.gmra.mrb[20].mxu1 %vm221_vm3, %v2036_v7  ;;  %3584 = vmatmul.mubr.msk.f32.vlgmr.msra.gmra.mrb[22].mxu0 %vm221_vm3, %v2036_v7 }
0x10c0   :  { %3834 = vmatpush3.bf16.msra.mxu1 %v4164_v44  ;;  %3840 = vmatpush3.bf16.msra.mxu0 %v4182_v60 }
0x10c1   :  { %3835 = vmatprep.subr.bf16.mxu1 %v4058_v6  ;;  %3841 = vmatprep.subr.bf16.mxu0 %v4058_v6 }
0x10c2   :  { %3594 = vmatprep.mubr.msk.f32.mxu1 %vm4059_vm1, %v4060_v13  ;;  %3605 = vmatprep.mubr.msk.f32.mxu0 %vm4059_vm1, %v4060_v13  ;;  %v2355_v22 = vld [vmem:[#allocation4] sm:$0x3] }
0x10c4   :  { %3837 = vmatpush3.bf16.msra.mxu1 %v4172_v52  ;;  %3843 = vmatpush3.bf16.msra.mxu0 %v4190_v61 }
0x10c5   :  { %3850 = vmatprep.subr.bf16.mxu0 %v4058_v6  ;;  %3844 = vmatprep.subr.bf16.mxu1 %v4058_v6 }
0x10c7   :  { %3595 = vmatmul.mubr.msk.f32.vlgmr.msra.gmra.mrb[22].mxu1 %vm221_vm3, %v2036_v7  ;;  %3606 = vmatmul.mubr.msk.f32.vlgmr.msra.gmra.mrb[24].mxu0 %vm221_vm3, %v2036_v7 }
0x10c8   :  { %3852 = vmatpush3.bf16.msra.mxu0 %v4166_v45  ;;  %3846 = vmatpush3.bf16.msra.mxu1 %v4099_v8 }
0x10c9   :  { %3853 = vmatprep.subr.bf16.mxu0 %v4058_v6  ;;  %3847 = vmatprep.subr.bf16.mxu1 %v4058_v6 }
0x10ca   :  { %3616 = vmatprep.mubr.msk.f32.mxu1 %vm4059_vm1, %v4060_v13  ;;  %3627 = vmatprep.mubr.msk.f32.mxu0 %vm4059_vm1, %v4060_v13 }
0x10cc   :  { %3855 = vmatpush3.bf16.msra.mxu0 %v4174_v53  ;;  %3849 = vmatpush3.bf16.msra.mxu1 %v4133_v23 }
0x10cd   :  { %3856 = vmatprep.subr.bf16.mxu1 %v4058_v6  ;;  %3862 = vmatprep.subr.bf16.mxu0 %v4058_v6 }
0x1192   :  { %v2106_v9 = vpop.f32.mrb[20].mxu1  ;;  %v2183_v10 = vpop.f32.mrb[22].mxu0 }
0x1193   :  { %2188 = vrot.lane.b32.xlu1 %v2183_v10, %s4063_s0  ;;  %v3574_v11 = vpop.f32.mrb[21].mxu1  ;;  %v3585_v12 = vpop.f32.mrb[23].mxu0  ;;  %v2110_v24 = vadd.f32 %v2106_v9, %v2035_v18 }
0x1195   :  { %v3150_v25 = vmul.f32 -1.442695, %v2110_v24 }
0x119a   :  { %v2264_v14 = vpop.f32.mrb[22].mxu1  ;;  %v2340_v15 = vpop.f32.mrb[24].mxu0 }
0x119b   :  { %v3607_v16 = vpop.f32.mrb[25].mxu0  ;;  %2269 = vrot.lane.b32.xlu0 %v2264_v14, %s4061_s5  ;;  %v3596_v17 = vpop.f32.mrb[23].mxu1 }
0x1205   :  { %v2189_v31 = vpop.permute.xlu1 %2188 }
0x1206   :  { %v2191_v32 = vadd.f32 %v2189_v31, %v2035_v18 }
0x1208   :  { %v3152_v33 = vmul.f32 -1.442695, %v2191_v32 }
0x120d   :  { %v2270_v19 = vpop.permute.xlu0 %2269 }
0x120e   :  { %v2272_v20 = vadd.f32 %v2270_v19, %v2035_v18 }
0x1210   :  { %4009 = vtanh.f32 %v2272_v20 }
0x1211   :  { %4011 = vpow2.f32 %v3150_v25 }
0x121a   :  { %v4010_v21 = vpop.eup %4009 }
0x121b   :  { %2362 = vrot.lane.b32.xlu0 %v4010_v21, %s4061_s5  ;;  %v4012_v26 = vpop.eup %4011 }
0x121c   :  { %v2114_v27 = vadd.f32 1.0, %v4012_v26 }
0x121e   :  { %4013 = vrcp.f32 %v2114_v27 }
0x121f   :  { %2357 = vrot.lane.b32.xlu0 %v2355_v22, %s4063_s0  ;;  %4015 = vpow2.f32 %v3152_v33 }
0x1223   :  { %2345 = vrot.lane.b32.xlu0 %v2340_v15, %s4062_s6 }
0x1228   :  { %v4014_v28 = vpop.eup %4013 }
0x1229   :  { %v4016_v34 = vpop.eup %4015 }
0x122a   :  { %v2195_v35 = vadd.f32 1.0, %v4016_v34 }
0x122c   :  { %4017 = vrcp.f32 %v2195_v35 }
0x1236   :  { %v4018_v37 = vpop.eup %4017 }
0x128d   :  { %v2363_v29 = vpop.permute.xlu0 %2362 }
0x128e   :  { %v2365_v30 = vmul.f32 %v4014_v28, %v2363_v29 }
0x1290   :  { %2367 = vrot.lane.b32.xlu1 %v2365_v30, %s4063_s0 }
0x1291   :  { %v2358_v36 = vpop.permute.xlu0 %2357 }
0x1292   :  { %v2360_v38 = vmul.f32 %v4018_v37, %v2358_v36 }
0x1295   :  { %v2346_v42 = vpop.permute.xlu0 %2345 }
0x1296   :  { %v2348_v43 = vadd.f32 %v2346_v42, %v2035_v18 }
0x1298   :  { %v3155_v46 = vmul.f32 -1.442695, %v2348_v43 }
0x1302   :  { %v2368_v39 = vpop.permute.xlu1 %2367 }
0x1303   :  { %v2370_v40 = vadd.f32 %v2368_v39, %v2360_v38 }
0x1305   :  { %4019 = vtanh.f32 %v2370_v40 }
0x1306   :  { %4021 = vpow2.f32 %v3155_v46 }
0x130f   :  { %v4020_v41 = vpop.eup %4019 }
0x1310   :  { %2373 = vrot.lane.b32.xlu1 %v4020_v41, %s4061_s5  ;;  %v4022_v47 = vpop.eup %4021  ;;  %v2745_v41 = vld [vmem:[#allocation2 + $0xe] sm:$0x3] }
0x1311   :  { %v2352_v48 = vadd.f32 1.0, %v4022_v47 }
0x1313   :  { %4023 = vrcp.f32 %v2352_v48 }
0x131d   :  { %v4024_v49 = vpop.eup %4023 }
0x1382   :  { %v2374_v50 = vpop.permute.xlu1 %2373 }
0x1383   :  { %v2376_v51 = vmul.f32 %v4024_v49, %v2374_v50 }
0x1385   :  { %2383 = vrot.lane.b32.xlu0 %v2376_v51, %s4063_s0 }
0x1389   :  { %2378 = vrot.lane.b32.xlu0 %v2370_v40, %s4062_s6 }
0x13f7   :  { %v2384_v54 = vpop.permute.xlu0 %2383 }
0x13f8   :  { %2386 = vst.msk [vmem:[#allocation3] sm:$0x3] %vm21_vm0, %v2384_v54  ;;  %3156 = vst.msk [vmem:[%s4518_s4 + $0xa] sm:$0x3] %vm21_vm0, %v2384_v54 }
0x13fb   :  { %v2379_v55 = vpop.permute.xlu0 %2378 }
0x13fc   :  { %2381 = vst.msk [vmem:[#allocation4] sm:$0x3] %vm21_vm0, %v2379_v55 }
0x13ff   :  { %v2391_v56 = vld [vmem:[#allocation3] sm:$0x3] }
0x1400   :  { %3617 = vmatmul.mubr.msk.f32.vlgmr.msra.gmra.mrb[24].mxu1 %vm221_vm3, %v2391_v56  ;;  %3628 = vmatmul.mubr.msk.f32.vlgmr.msra.gmra.mrb[26].mxu0 %vm221_vm3, %v2391_v56 }
0x1401   :  { %3858 = vmatpush3.bf16.msra.mxu1 %v4164_v44  ;;  %3864 = vmatpush3.bf16.msra.mxu0 %v4182_v60 }
0x1402   :  { %3859 = vmatprep.subr.bf16.mxu1 %v4058_v6  ;;  %3865 = vmatprep.subr.bf16.mxu0 %v4058_v6 }
0x1403   :  { %3638 = vmatprep.mubr.msk.f32.mxu1 %vm4059_vm1, %v4060_v13  ;;  %3649 = vmatprep.mubr.msk.f32.mxu0 %vm4059_vm1, %v4060_v13  ;;  %v2710_v3 = vld [vmem:[#allocation4] sm:$0x3] }
0x1405   :  { %3861 = vmatpush3.bf16.msra.mxu1 %v4172_v52  ;;  %3867 = vmatpush3.bf16.msra.mxu0 %v4190_v61 }
0x1406   :  { %3874 = vmatprep.subr.bf16.mxu0 %v4058_v6  ;;  %3868 = vmatprep.subr.bf16.mxu1 %v4058_v6 }
0x1408   :  { %3639 = vmatmul.mubr.msk.f32.vlgmr.msra.gmra.mrb[26].mxu1 %vm221_vm3, %v2391_v56  ;;  %3650 = vmatmul.mubr.msk.f32.vlgmr.msra.gmra.mrb[28].mxu0 %vm221_vm3, %v2391_v56 }
0x1409   :  { %3876 = vmatpush3.bf16.msra.mxu0 %v4166_v45  ;;  %3870 = vmatpush3.bf16.msra.mxu1 %v4099_v8 }
0x140a   :  { %3877 = vmatprep.subr.bf16.mxu0 %v4058_v6  ;;  %3871 = vmatprep.subr.bf16.mxu1 %v4058_v6 }
0x140b   :  { %3660 = vmatprep.mubr.msk.f32.mxu1 %vm4059_vm1, %v4060_v13  ;;  %3671 = vmatprep.mubr.msk.f32.mxu0 %vm4059_vm1, %v4060_v13 }
0x140d   :  { %3879 = vmatpush3.bf16.msra.mxu0 %v4174_v53  ;;  %3873 = vmatpush3.bf16.msra.mxu1 %v4133_v23 }
0x140e   :  { %3880 = vmatprep.subr.bf16.mxu1 %v4058_v6  ;;  %3886 = vmatprep.subr.bf16.mxu0 %v4058_v6 }
0x14d3   :  { %v2461_v45 = vpop.f32.mrb[24].mxu1  ;;  %v2538_v8 = vpop.f32.mrb[26].mxu0 }
0x14d4   :  { %2543 = vrot.lane.b32.xlu0 %v2538_v8, %s4063_s0  ;;  %v3618_v57 = vpop.f32.mrb[25].mxu1  ;;  %v3629_v58 = vpop.f32.mrb[27].mxu0  ;;  %v2465_v4 = vadd.f32 %v2461_v45, %v2390_v1 }
0x14d6   :  { %v3158_v5 = vmul.f32 -1.442695, %v2465_v4 }
0x14db   :  { %v2619_v59 = vpop.f32.mrb[26].mxu1  ;;  %v2695_v62 = vpop.f32.mrb[28].mxu0 }
0x14dc   :  { %v3651_v63 = vpop.f32.mrb[29].mxu0  ;;  %2624 = vrot.lane.b32.xlu1 %v2619_v59, %s4061_s5  ;;  %v3640_v0 = vpop.f32.mrb[27].mxu1 }
0x1546   :  { %v2544_v14 = vpop.permute.xlu0 %2543 }
0x1547   :  { %v2546_v15 = vadd.f32 %v2544_v14, %v2390_v1 }
0x1549   :  { %v3160_v16 = vmul.f32 -1.442695, %v2546_v15 }
0x154e   :  { %v2625_v53 = vpop.permute.xlu1 %2624 }
0x154f   :  { %v2627_v2 = vadd.f32 %v2625_v53, %v2390_v1 }
0x1551   :  { %4025 = vtanh.f32 %v2627_v2 }
0x1552   :  { %4027 = vpow2.f32 %v3158_v5 }
0x155b   :  { %v4026_v23 = vpop.eup %4025 }
0x155c   :  { %2717 = vrot.lane.b32.xlu1 %v4026_v23, %s4061_s5  ;;  %v4028_v7 = vpop.eup %4027 }
0x155d   :  { %v2469_v9 = vadd.f32 1.0, %v4028_v7 }
0x155f   :  { %4029 = vrcp.f32 %v2469_v9 }
0x1560   :  { %2712 = vrot.lane.b32.xlu1 %v2710_v3, %s4063_s0  ;;  %4031 = vpow2.f32 %v3160_v16 }
0x1564   :  { %2700 = vrot.lane.b32.xlu1 %v2695_v62, %s4062_s6 }
0x1569   :  { %v4030_v10 = vpop.eup %4029 }
0x156a   :  { %v4032_v17 = vpop.eup %4031 }
0x156b   :  { %v2550_v18 = vadd.f32 1.0, %v4032_v17 }
0x156d   :  { %4033 = vrcp.f32 %v2550_v18 }
0x1577   :  { %v4034_v20 = vpop.eup %4033 }
0x15ce   :  { %v2718_v11 = vpop.permute.xlu1 %2717 }
0x15cf   :  { %v2720_v12 = vmul.f32 %v4030_v10, %v2718_v11 }
0x15d1   :  { %2722 = vrot.lane.b32.xlu0 %v2720_v12, %s4063_s0 }
0x15d2   :  { %v2713_v19 = vpop.permute.xlu1 %2712 }
0x15d3   :  { %v2715_v21 = vmul.f32 %v4034_v20, %v2713_v19 }
0x15d6   :  { %v2701_v26 = vpop.permute.xlu1 %2700 }
0x15d7   :  { %v2703_v27 = vadd.f32 %v2701_v26, %v2390_v1 }
0x15d9   :  { %v3163_v28 = vmul.f32 -1.442695, %v2703_v27 }
0x1643   :  { %v2723_v22 = vpop.permute.xlu0 %2722 }
0x1644   :  { %v2725_v24 = vadd.f32 %v2723_v22, %v2715_v21 }
0x1646   :  { %4035 = vtanh.f32 %v2725_v24 }
0x1647   :  { %4037 = vpow2.f32 %v3163_v28 }
0x1650   :  { %v4036_v25 = vpop.eup %4035 }
0x1651   :  { %2728 = vrot.lane.b32.xlu0 %v4036_v25, %s4061_s5  ;;  %v4038_v29 = vpop.eup %4037 }
0x1652   :  { %v2707_v30 = vadd.f32 1.0, %v4038_v29 }
0x1654   :  { %4039 = vrcp.f32 %v2707_v30 }
0x165e   :  { %v4040_v31 = vpop.eup %4039 }
0x16c3   :  { %v2729_v32 = vpop.permute.xlu0 %2728 }
0x16c4   :  { %v2731_v33 = vmul.f32 %v4040_v31, %v2729_v32 }
0x16c6   :  { %2738 = vrot.lane.b32.xlu1 %v2731_v33, %s4063_s0 }
0x16ca   :  { %2733 = vrot.lane.b32.xlu1 %v2725_v24, %s4062_s6 }
0x1738   :  { %v2739_v34 = vpop.permute.xlu1 %2738 }
0x1739   :  { %2741 = vst.msk [vmem:[#allocation3] sm:$0x3] %vm21_vm0, %v2739_v34  ;;  %3164 = vst.msk [vmem:[%s4518_s4 + $0xc] sm:$0x3] %vm21_vm0, %v2739_v34 }
0x173c   :  { %v2734_v35 = vpop.permute.xlu1 %2733 }
0x173d   :  { %2736 = vst.msk [vmem:[#allocation4] sm:$0x3] %vm21_vm0, %v2734_v35 }
0x1740   :  { %v2746_v36 = vld [vmem:[#allocation3] sm:$0x3] }
0x1741   :  { %3661 = vmatmul.mubr.msk.f32.vlgmr.msra.gmra.mrb[28].mxu1 %vm221_vm3, %v2746_v36  ;;  %3672 = vmatmul.mubr.msk.f32.vlgmr.msra.gmra.mrb[30].mxu0 %vm221_vm3, %v2746_v36 }
0x1742   :  { %3882 = vmatpush3.bf16.msra.mxu1 %v4164_v44  ;;  %3888 = vmatpush3.bf16.msra.mxu0 %v4182_v60 }
0x1743   :  { %3883 = vmatprep.subr.bf16.mxu1 %v4058_v6  ;;  %3889 = vmatprep.subr.bf16.mxu0 %v4058_v6 }
0x1744   :  { %3682 = vmatprep.mubr.msk.f32.mxu1 %vm4059_vm1, %v4060_v13  ;;  %3693 = vmatprep.mubr.msk.f32.mxu0 %vm4059_vm1, %v4060_v13  ;;  %v3065_v43 = vld [vmem:[#allocation4] sm:$0x3] }
0x1746   :  { %3885 = vmatpush3.bf16.msra.mxu1 %v4172_v52  ;;  %3891 = vmatpush3.bf16.msra.mxu0 %v4190_v61 }
0x1749   :  { %3683 = vmatmul.mubr.msk.f32.vlgmr.msra.gmra.mrb[30].mxu1 %vm221_vm3, %v2746_v36  ;;  %3694 = vmatmul.mubr.msk.f32.vlgmr.msra.gmra.mrb[32].mxu0 %vm221_vm3, %v2746_v36 }
0x1814   :  { %v2816_v44 = vpop.f32.mrb[28].mxu1  ;;  %v2893_v60 = vpop.f32.mrb[30].mxu0 }
0x1815   :  { %2898 = vrot.lane.b32.xlu1 %v2893_v60, %s4063_s0  ;;  %v3662_v37 = vpop.f32.mrb[29].mxu1  ;;  %v3673_v6 = vpop.f32.mrb[31].mxu0  ;;  %v2820_v46 = vadd.f32 %v2816_v44, %v2745_v41 }
0x1817   :  { %v3166_v47 = vmul.f32 -1.442695, %v2820_v46 }
0x181c   :  { %v2974_v38 = vpop.f32.mrb[30].mxu1  ;;  %v3050_v39 = vpop.f32.mrb[32].mxu0 }
0x181d   :  { %v3695_v40 = vpop.f32.mrb[33].mxu0  ;;  %2979 = vrot.lane.b32.xlu0 %v2974_v38, %s4061_s5  ;;  %v3684_v13 = vpop.f32.mrb[31].mxu1 }
0x1887   :  { %v2899_v55 = vpop.permute.xlu1 %2898 }
0x1888   :  { %v2901_v56 = vadd.f32 %v2899_v55, %v2745_v41 }
0x188a   :  { %v3168_v45 = vmul.f32 -1.442695, %v2901_v56 }
0x188f   :  { %v2980_v52 = vpop.permute.xlu0 %2979 }
0x1890   :  { %v2982_v42 = vadd.f32 %v2980_v52, %v2745_v41 }
0x1892   :  { %4041 = vtanh.f32 %v2982_v42 }
0x1893   :  { %4043 = vpow2.f32 %v3166_v47 }
0x189c   :  { %v4042_v61 = vpop.eup %4041 }
0x189d   :  { %3072 = vrot.lane.b32.xlu0 %v4042_v61, %s4061_s5  ;;  %v4044_v48 = vpop.eup %4043 }
0x189e   :  { %v2824_v49 = vadd.f32 1.0, %v4044_v48 }
0x18a0   :  { %4045 = vrcp.f32 %v2824_v49 }
0x18a1   :  { %3067 = vrot.lane.b32.xlu0 %v3065_v43, %s4063_s0  ;;  %4047 = vpow2.f32 %v3168_v45 }
0x18a5   :  { %3055 = vrot.lane.b32.xlu0 %v3050_v39, %s4062_s6 }
0x18aa   :  { %v4046_v50 = vpop.eup %4045 }
0x18ab   :  { %v4048_v8 = vpop.eup %4047 }
0x18ac   :  { %v2905_v57 = vadd.f32 1.0, %v4048_v8 }
0x18ae   :  { %4049 = vrcp.f32 %v2905_v57 }
0x18b8   :  { %v4050_v59 = vpop.eup %4049 }
0x190f   :  { %v3073_v51 = vpop.permute.xlu0 %3072 }
0x1910   :  { %v3075_v54 = vmul.f32 %v4046_v50, %v3073_v51 }
0x1912   :  { %3077 = vrot.lane.b32.xlu1 %v3075_v54, %s4063_s0 }
0x1913   :  { %v3068_v58 = vpop.permute.xlu0 %3067 }
0x1914   :  { %v3070_v62 = vmul.f32 %v4050_v59, %v3068_v58 }
0x1917   :  { %v3056_v53 = vpop.permute.xlu0 %3055 }
0x1918   :  { %v3058_v2 = vadd.f32 %v3056_v53, %v2745_v41 }
0x191a   :  { %v3171_v23 = vmul.f32 -1.442695, %v3058_v2 }
0x1984   :  { %v3078_v63 = vpop.permute.xlu1 %3077 }
0x1985   :  { %v3080_v0 = vadd.f32 %v3078_v63, %v3070_v62 }
0x1987   :  { %4051 = vtanh.f32 %v3080_v0  ;;  %3088 = vrot.lane.b32.xlu0 %v3080_v0, %s4062_s6 }
0x1988   :  { %4053 = vpow2.f32 %v3171_v23 }
0x1991   :  { %v4052_v1 = vpop.eup %4051 }
0x1992   :  { %3083 = vrot.lane.b32.xlu1 %v4052_v1, %s4061_s5  ;;  %v4054_v3 = vpop.eup %4053 }
0x1993   :  { %v3062_v4 = vadd.f32 1.0, %v4054_v3 }
0x1995   :  { %4055 = vrcp.f32 %v3062_v4 }
0x199f   :  { %v4056_v7 = vpop.eup %4055 }
0x19f9   :  { %v3089_v5 = vpop.permute.xlu0 %3088 }
0x19fa   :  { %3091 = vst.msk [vmem:[#allocation4] sm:$0x3] %vm21_vm0, %v3089_v5 }
0x1a04   :  { %v3084_v9 = vpop.permute.xlu1 %3083 }
0x1a05   :  { %v3086_v10 = vmul.f32 %v4056_v7, %v3084_v9 }
0x1a07   :  { %3093 = vrot.lane.b32.xlu1 %v3086_v10, %s4063_s0 }
0x1a79   :  { %v3094_v11 = vpop.permute.xlu1 %3093 }
0x1a7a   :  { %3096 = vst.msk [vmem:[#allocation3] sm:$0x3] %vm21_vm0, %v3094_v11  ;;  %3172 = vst.msk [vmem:[%s4518_s4 + $0xe] sm:$0x3] %vm21_vm0, %v3094_v11 }

// kernel: lstm_relu_forward.3
= control target key start
LH: loop header
LB: loop body
LE: loop exit
PB: predicated region body
PF: predicated region fallthrough
CT: control target
= control target key end

     0   :  { %v70_v3 = vlaneseq  ;;  %s4343_s22 = smov 64   ;;  %s4344_s23 = smov 96   ;;  %v4345_v17 = vmov 1983009808   ;;  %v4346_v24 = vmov 0.0|0.0   ;;  %vm34_vm0 = vcmask 254976   ;;  %s4859_s0 = inlined_call_operand.vmem [shape: f32[8,2,32], index: 0, kind: input, shape index: {}]   ;;  %s4860_s1 = inlined_call_operand.vmem [shape: f32[32,128], index: 1, kind: input, shape index: {}]   ;;  %s4861_s2 = inlined_call_operand.vmem [shape: f32[1,128], index: 2, kind: input, shape index: {}]   ;;  %s4862_s3 = inlined_call_operand.vmem [shape: f32[32,128], index: 3, kind: input, shape index: {}]   ;;  %s4863_s4 = inlined_call_operand.vmem [shape: f32[32,32], index: 4, kind: input, shape index: {}]   ;;  %s4864_s5 = inlined_call_operand.vmem [shape: f32[1,32], index: 5, kind: input, shape index: {}]   ;;  %s4865_s6 = inlined_call_operand.vmem [shape: f32[32,8], index: 6, kind: input, shape index: {}]   ;;  %s4866_s7 = inlined_call_operand.vmem [shape: f32[1,8], index: 7, kind: input, shape index: {}]   ;;  %s4867_s8 = inlined_call_operand.hbm [shape: f32[1,2,8], index: 8, kind: output, shape index: {}]  }
   0x1   :  { %v231_v0 = vld [vmem:[%s4862_s3] sm:$0xff]  ;;  %v232_v1 = vld [vmem:[%s4862_s3 + $0x8] sm:$0xff]  ;;  %v233_v2 = vld [vmem:[%s4862_s3 + $0x10] sm:$0xff]  ;;  %v68_v18 = vunpack.c.l.s4 %v4345_v17  ;;  %3949 = vmatprep.subr.bf16.mxu1 %v4346_v24 }
   0x2   :  { %v4161_v4 = vpack.i.bf16 %v232_v1, %v231_v0  ;;  %v4405_v5 = vpack.c.bf16 %v232_v1, %v231_v0  ;;  %v234_v6 = vld [vmem:[%s4862_s3 + $0x18] sm:$0xff]  ;;  %v46_v7 = vld [vmem:[%s4860_s1] sm:$0xff]  ;;  %v47_v8 = vld [vmem:[%s4860_s1 + $0x8] sm:$0xff]  ;;  %v71_v19 = vshrl.u32 %v70_v3, 7 }
   0x3   :  { %v4166_v9 = vpack.i.bf16 %v234_v6, %v233_v2  ;;  %v3941_v10 = vpack.c.bf16 %v47_v8, %v46_v7  ;;  %v48_v11 = vld [vmem:[%s4860_s1 + $0x10] sm:$0xff]  ;;  %v49_v12 = vld [vmem:[%s4860_s1 + $0x18] sm:$0xff]  ;;  %v38_v13 = vld [vmem:[%s4859_s0] sm:$0x3]  ;;  %v69_v26 = vunpack.c.0.s8 %v68_v18  ;;  %v4450_v30 = vpack.c.bf16 %v234_v6, %v233_v2 }
   0x4   :  { %4162 = vrot.lane.b32.xlu0 %v4161_v4, %s4343_s22  ;;  %4172 = vrot.lane.b32.xlu1 %v4161_v4, %s4344_s23  ;;  %v3945_v14 = vpack.c.bf16 %v49_v12, %v48_v11  ;;  %v39_v15 = vld [vmem:[%s4859_s0 + $0x2] sm:$0x3]  ;;  %v40_v16 = vld [vmem:[%s4859_s0 + $0x4] sm:$0x3] }
   0x5   :  { %3942 = vmatprep.subr.bf16.mxu0 %v3941_v10  ;;  %v41_v20 = vld [vmem:[%s4859_s0 + $0x6] sm:$0x3]  ;;  %v65_v21 = vcombine.low %v38_v13, %v39_v15  ;;  %v42_v22 = vld [vmem:[%s4859_s0 + $0x8] sm:$0x3]  ;;  %v43_v23 = vld [vmem:[%s4859_s0 + $0xa] sm:$0x3]  ;;  %3951 = vmatpush3.bf16.msra.mxu1 %v4405_v5 }
   0x6   :  { %3944 = vmatpush3.bf16.msra.mxu0 %v3941_v10  ;;  %v66_v25 = vcombine.low %v40_v16, %v41_v20  ;;  %v44_v27 = vld [vmem:[%s4859_s0 + $0xc] sm:$0x3]  ;;  %v45_v28 = vld [vmem:[%s4859_s0 + $0xe] sm:$0x3]  ;;  %v82_v29 = vcombine.low %v42_v22, %v43_v23  ;;  %3952 = vmatprep.subr.bf16.mxu1 %v4346_v24 }
   0x7   :  { %3946 = vmatprep.subr.bf16.mxu0 %v3945_v14  ;;  %v83_v31 = vcombine.low %v44_v27, %v45_v28 }
   0x8   :  { %13 = vsyncpa [#allocation7], 0  ;;  %4167 = vrot.lane.b32.xlu0 %v4166_v9, %s4343_s22  ;;  %4177 = vrot.lane.b32.xlu1 %v4166_v9, %s4344_s23  ;;  %v4455_v32 = vsub.s32 %v69_v26, %v71_v19  ;;  %v4347_v33 = vmov 0.0   ;;  %vm4348_vm1 = vmmov 0   ;;  %vm99_vm2 = vcmask 261120   ;;  %s4349_s0 = smov 32  }
   0x9   :  { %35 = vst.msk [vmem:[#allocation3] sm:$0x3] %vm34_vm0, %v4347_v33  ;;  %36 = vst.msk [vmem:[#allocation4] sm:$0x3] %vm34_vm0, %v4347_v33  ;;  %3575 = vmatprep.mubr.msk.f32.mxu1 %vm4348_vm1, %v4347_v33  ;;  %3954 = vmatpush3.bf16.msra.mxu1 %v4450_v30  ;;  %v3313_v1 = vld [vmem:[%s4861_s2] ss:$0 sm:$0xff] }
   0xa   :  { %37 = vst.msk [vmem:[#allocation5] sm:$0x3] %vm34_vm0, %v4347_v33  ;;  %3948 = vmatpush3.bf16.msra.mxu0 %v3945_v14  ;;  %v73_v34 = vrot.slane %v65_v21, %v4455_v32  ;;  %v80_v35 = vrot.slane %v66_v25, %v4455_v32  ;;  %v90_v36 = vrot.slane %v82_v29, %v4455_v32  ;;  %s4350_s11 = smov [#allocation6]   ;;  %vm3297_vm3 = vcmask 58368  }
   0xb   :  { %v97_v37 = vrot.slane %v83_v31, %v4455_v32  ;;  %3955 = vmatprep.subr.bf16.mxu0 %v4346_v24  ;;  %3961 = vmatprep.subr.bf16.mxu1 %v4346_v24  ;;  %s3305_s12 = sshll.u32 %s4350_s11, 4  ;;  %s3306_s12 = int_to_ptr.vmem [resolvable:$true] %s3305_s12 }
   0xc   :  { %v81_v38 = vcombine.low %v73_v34, %v80_v35  ;;  %4182 = vrot.lane.b32.xlu0 %v4161_v4, %s4349_s0  ;;  %4187 = vrot.lane.b32.xlu1 %v4166_v9, %s4349_s0  ;;  %p4324_p1 = scmp.lt.s32.totalorder %s3306_s12, %s3306_s12 }
   0xd   :  { %v98_v39 = vcombine.low %v90_v36, %v97_v37 }
   0xe   :  { %3564 = vmatprep.mubr.msk.f32.mxu0 %vm99_vm2, %v81_v38 }
   0xf   :  { %3565 = vmatmul.mubr.msk.f32.vlgmr.msra.gmra.mrb[0].mxu0 %vm99_vm2, %v98_v39 }
  0x10   :  { %v236_v40 = vld [vmem:[#allocation3] sm:$0x3]  ;;  %3586 = vmatprep.mubr.msk.f32.mxu0 %vm4348_vm1, %v4347_v33  ;;  %v595_v31 = vld [vmem:[#allocation4] sm:$0x3] }
  0x11   :  { %3576 = vmatmul.mubr.msk.f32.vlgmr.msra.gmra.mrb[0].mxu1 %vm99_vm2, %v236_v40 }
  0x12   :  { %3597 = vmatprep.mubr.msk.f32.mxu1 %vm4348_vm1, %v4347_v33 }
  0x76   :  { %v4163_v41 = vpop.permute.xlu0 %4162  ;;  %v4173_v42 = vpop.permute.xlu1 %4172 }
  0x77   :  { %v4165_v43 = vunpack.i.h.bf16 %v4163_v41  ;;  %v4164_v44 = vunpack.i.l.bf16 %v4163_v41  ;;  %v4175_v45 = vunpack.i.h.bf16 %v4173_v42  ;;  %v4174_v46 = vunpack.i.l.bf16 %v4173_v42 }
  0x79   :  { %v4481_v47 = vpack.c.bf16 %v4165_v43, %v4164_v44  ;;  %v4483_v48 = vpack.c.bf16 %v4175_v45, %v4174_v46 }
  0x7a   :  { %v4168_v49 = vpop.permute.xlu0 %4167  ;;  %v4178_v50 = vpop.permute.xlu1 %4177 }
  0x7b   :  { %v4170_v51 = vunpack.i.h.bf16 %v4168_v49  ;;  %v4169_v52 = vunpack.i.l.bf16 %v4168_v49  ;;  %3963 = vmatpush3.bf16.msra.mxu1 %v4481_v47  ;;  %v4180_v53 = vunpack.i.h.bf16 %v4178_v50  ;;  %v4179_v54 = vunpack.i.l.bf16 %v4178_v50  ;;  %3957 = vmatpush3.bf16.msra.mxu0 %v4483_v48 }
  0x7c   :  { %3964 = vmatprep.subr.bf16.mxu1 %v4346_v24  ;;  %3958 = vmatprep.subr.bf16.mxu0 %v4346_v24 }
  0x7d   :  { %v4489_v55 = vpack.c.bf16 %v4170_v51, %v4169_v52  ;;  %v4491_v56 = vpack.c.bf16 %v4180_v53, %v4179_v54 }
  0x7e   :  { %v4183_v57 = vpop.permute.xlu0 %4182  ;;  %v4188_v60 = vpop.permute.xlu1 %4187 }
  0x7f   :  { %3966 = vmatpush3.bf16.msra.mxu1 %v4489_v55  ;;  %3960 = vmatpush3.bf16.msra.mxu0 %v4491_v56  ;;  %v4185_v58 = vunpack.i.h.bf16 %v4183_v57  ;;  %v4184_v59 = vunpack.i.l.bf16 %v4183_v57  ;;  %v4190_v61 = vunpack.i.h.bf16 %v4188_v60  ;;  %v4189_v62 = vunpack.i.l.bf16 %v4188_v60 }
  0x80   :  { %3967 = vmatprep.subr.bf16.mxu0 %v4346_v24  ;;  %3973 = vmatprep.subr.bf16.mxu1 %v4346_v24 }
  0x81   :  { %v4497_v63 = vpack.c.bf16 %v4185_v58, %v4184_v59  ;;  %v4501_v0 = vpack.c.bf16 %v4190_v61, %v4189_v62 }
  0x82   :  { %3598 = vmatmul.mubr.msk.f32.vlgmr.msra.gmra.mrb[2].mxu1 %vm99_vm2, %v236_v40  ;;  %3587 = vmatmul.mubr.msk.f32.vlgmr.msra.gmra.mrb[2].mxu0 %vm99_vm2, %v236_v40 }
  0x83   :  { %3969 = vmatpush3.bf16.msra.mxu0 %v4497_v63  ;;  %3608 = vmatprep.mubr.msk.f32.mxu0 %vm4348_vm1, %v4347_v33 }
  0x84   :  { %3970 = vmatprep.subr.bf16.mxu0 %v4346_v24  ;;  %3975 = vmatpush3.bf16.msra.mxu1 %v4405_v5 }
  0x85   :  { %3976 = vmatprep.subr.bf16.mxu1 %v4346_v24  ;;  %3619 = vmatprep.mubr.msk.f32.mxu1 %vm4348_vm1, %v4347_v33 }
  0x87   :  { %3972 = vmatpush3.bf16.msra.mxu0 %v4501_v0 }
  0x88   :  { %3979 = vmatprep.subr.bf16.mxu0 %v4346_v24  ;;  %3978 = vmatpush3.bf16.msra.mxu1 %v4450_v30 }
  0x89   :  { %3985 = vmatprep.subr.bf16.mxu1 %v4346_v24 }
  0x8a   :  { %3609 = vmatmul.mubr.msk.f32.vlgmr.msra.gmra.mrb[4].mxu0 %vm99_vm2, %v236_v40 }
  0x8b   :  { %3981 = vmatpush3.bf16.msra.mxu0 %v4483_v48  ;;  %3630 = vmatprep.mubr.msk.f32.mxu0 %vm4348_vm1, %v4347_v33 }
  0x8c   :  { %3982 = vmatprep.subr.bf16.mxu0 %v4346_v24 }
  0x8f   :  { %3984 = vmatpush3.bf16.msra.mxu0 %v4491_v56 }
  0x90   :  { %3991 = vmatprep.subr.bf16.mxu0 %v4346_v24 }
  0xe2   :  { %v3566_v2 = vpop.f32.mrb[0].mxu0 }
  0xe3   :  { %v176_v3 = vadd.f32 %v3566_v2, %v3313_v1  ;;  %v170_v4 = vpop.f32.mrb[1].mxu0 }
  0xe4   :  { %v306_v6 = vpop.f32.mrb[0].mxu1  ;;  %v171_v7 = vadd.f32 %v3313_v1, %v170_v4  ;;  %v628_v1 = vld [vmem:[#allocation5] sm:$0x3] }
  0xe5   :  { %v3577_v8 = vpop.f32.mrb[1].mxu1  ;;  %v198_v9 = vcombine.high %v176_v3, %v176_v3  ;;  %v205_v10 = vrot.slane %v176_v3, %v4455_v32  ;;  %3318 = vst.sshfl [vmem:[#allocation2 + $0x8] sm:$0x3 pattern:$0x76325410] %v176_v3 }
  0xe6   :  { %v181_v11 = vcombine.high %v171_v7, %v171_v7  ;;  %v188_v12 = vrot.slane %v171_v7, %v4455_v32  ;;  %3316 = vst.sshfl [vmem:[#allocation2] sm:$0x3 pattern:$0x76325410] %v171_v7 }
  0xe7   :  { %v212_v13 = vrot.slane %v198_v9, %v4455_v32  ;;  %v213_v14 = vcombine.high %v205_v10, %v205_v10  ;;  %3319 = vst.sshfl [vmem:[#allocation2 + $0xc] sm:$0x3 pattern:$0x76325410] %v198_v9 }
  0xe8   :  { %v195_v15 = vrot.slane %v181_v11, %v4455_v32  ;;  %v196_v16 = vcombine.high %v188_v12, %v188_v12  ;;  %3317 = vst.sshfl [vmem:[#allocation2 + $0x4] sm:$0x3 pattern:$0x76325410] %v181_v11 }
  0xe9   :  { %v214_v17 = vcombine.high %v212_v13, %v212_v13  ;;  %228 = vst [vmem:[#allocation2 + $0xa] sm:$0x3] %v213_v14 }
  0xea   :  { %v197_v18 = vcombine.high %v195_v15, %v195_v15  ;;  %224 = vst [vmem:[#allocation2 + $0x2] sm:$0x3] %v196_v16 }
  0xeb   :  { %230 = vst [vmem:[#allocation2 + $0xe] sm:$0x3] %v214_v17 }
  0xec   :  { %226 = vst [vmem:[#allocation2 + $0x6] sm:$0x3] %v197_v18 }
  0xed   :  { %v235_v26 = vld [vmem:[#allocation2] sm:$0x3] }
  0xee   :  { %v310_v32 = vadd.f32 %v306_v6, %v235_v26 }
  0xf0   :  { %v3321_v34 = vmul.f32 -1.442695, %v310_v32 }
  0xf1   :  { %v632_v15 = vld [vmem:[#allocation2 + $0x2] sm:$0x3] }
 0x155   :  { %v492_v19 = vpop.f32.mrb[2].mxu1  ;;  %v399_v20 = vpop.f32.mrb[2].mxu0 }
 0x156   :  { %497 = vrot.lane.b32.xlu0 %v492_v19, %s4343_s22  ;;  %v3599_v21 = vpop.f32.mrb[3].mxu1  ;;  %v3588_v22 = vpop.f32.mrb[3].mxu0 }
 0x15a   :  { %404 = vrot.lane.b32.xlu0 %v399_v20, %s4349_s0 }
 0x15d   :  { %v580_v23 = vpop.f32.mrb[4].mxu0 }
 0x15e   :  { %v3610_v25 = vpop.f32.mrb[5].mxu0 }
 0x1c8   :  { %v498_v27 = vpop.permute.xlu0 %497 }
 0x1c9   :  { %v500_v28 = vadd.f32 %v498_v27, %v235_v26 }
 0x1cb   :  { %4191 = vtanh.f32 %v500_v28 }
 0x1cc   :  { %4193 = vpow2.f32 %v3321_v34  ;;  %v405_v40 = vpop.permute.xlu0 %404 }
 0x1cd   :  { %v407_v41 = vadd.f32 %v405_v40, %v235_v26 }
 0x1cf   :  { %v3323_v42 = vmul.f32 -1.442695, %v407_v41 }
 0x1d5   :  { %v4192_v29 = vpop.eup %4191 }
 0x1d6   :  { %602 = vrot.lane.b32.xlu1 %v4192_v29, %s4343_s22  ;;  %v4194_v35 = vpop.eup %4193 }
 0x1d7   :  { %v314_v36 = vadd.f32 1.0, %v4194_v35 }
 0x1d9   :  { %4195 = vrcp.f32 %v314_v36 }
 0x1da   :  { %597 = vrot.lane.b32.xlu1 %v595_v31, %s4349_s0  ;;  %4197 = vpow2.f32 %v3323_v42 }
 0x1de   :  { %585 = vrot.lane.b32.xlu1 %v580_v23, %s4344_s23 }
 0x1e3   :  { %v4196_v37 = vpop.eup %4195 }
 0x1e4   :  { %v4198_v43 = vpop.eup %4197 }
 0x1e5   :  { %v411_v44 = vadd.f32 1.0, %v4198_v43 }
 0x1e7   :  { %4199 = vrcp.f32 %v411_v44 }
 0x1f1   :  { %v4200_v46 = vpop.eup %4199 }
 0x248   :  { %v603_v38 = vpop.permute.xlu1 %602 }
 0x249   :  { %v605_v39 = vmul.f32 %v4196_v37, %v603_v38 }
 0x24b   :  { %607 = vrot.lane.b32.xlu0 %v605_v39, %s4349_s0 }
 0x24c   :  { %v598_v45 = vpop.permute.xlu1 %597 }
 0x24d   :  { %v600_v49 = vmul.f32 %v4200_v46, %v598_v45 }
 0x250   :  { %v586_v53 = vpop.permute.xlu1 %585 }
 0x251   :  { %v588_v54 = vadd.f32 %v586_v53, %v235_v26 }
 0x253   :  { %v3326_v57 = vmul.f32 -1.442695, %v588_v54 }
 0x2bd   :  { %v608_v50 = vpop.permute.xlu0 %607 }
 0x2be   :  { %v610_v51 = vadd.f32 %v608_v50, %v600_v49 }
 0x2c0   :  { %4201 = vtanh.f32 %v610_v51 }
 0x2c1   :  { %4203 = vpow2.f32 %v3326_v57 }
 0x2ca   :  { %v4202_v52 = vpop.eup %4201 }
 0x2cb   :  { %613 = vrot.lane.b32.xlu0 %v4202_v52, %s4343_s22  ;;  %v4204_v58 = vpop.eup %4203 }
 0x2cc   :  { %v592_v59 = vadd.f32 1.0, %v4204_v58 }
 0x2ce   :  { %4205 = vrcp.f32 %v592_v59 }
 0x2d8   :  { %v4206_v60 = vpop.eup %4205 }
 0x33d   :  { %v614_v61 = vpop.permute.xlu0 %613 }
 0x33e   :  { %v616_v62 = vmul.f32 %v4206_v60, %v614_v61 }
 0x340   :  { %624 = vrot.lane.b32.xlu1 %v616_v62, %s4349_s0 }
 0x344   :  { %618 = vrot.lane.b32.xlu1 %v610_v51, %s4344_s23 }
 0x3b2   :  { %v625_v2 = vpop.permute.xlu1 %624 }
 0x3b3   :  { %627 = vst.msk [vmem:[#allocation3] sm:$0x3] %vm34_vm0, %v625_v2  ;;  %v629_v3 = vadd.f32 %v628_v1, %v625_v2 }
 0x3b5   :  { %630 = vst.msk [vmem:[#allocation5] sm:$0x3] %vm34_vm0, %v629_v3 }
 0x3b6   :  { %v619_v4 = vpop.permute.xlu1 %618 }
 0x3b7   :  { %622 = vst.msk [vmem:[#allocation4] sm:$0x3] %vm34_vm0, %v619_v4  ;;  %v988_v4 = vld [vmem:[#allocation2 + $0x4] sm:$0x3] }
 0x3ba   :  { %v633_v6 = vld [vmem:[#allocation3] sm:$0x3] }
 0x3bb   :  { %3620 = vmatmul.mubr.msk.f32.vlgmr.msra.gmra.mrb[4].mxu1 %vm99_vm2, %v633_v6  ;;  %3631 = vmatmul.mubr.msk.f32.vlgmr.msra.gmra.mrb[6].mxu0 %vm99_vm2, %v633_v6 }
 0x3bc   :  { %3987 = vmatpush3.bf16.msra.mxu1 %v4481_v47  ;;  %3993 = vmatpush3.bf16.msra.mxu0 %v4497_v63  ;;  %v984_v51 = vld [vmem:[#allocation5] sm:$0x3] }
 0x3bd   :  { %3988 = vmatprep.subr.bf16.mxu1 %v4346_v24  ;;  %3994 = vmatprep.subr.bf16.mxu0 %v4346_v24 }
 0x3be   :  { %3641 = vmatprep.mubr.msk.f32.mxu1 %vm4348_vm1, %v4347_v33  ;;  %3652 = vmatprep.mubr.msk.f32.mxu0 %vm4348_vm1, %v4347_v33  ;;  %v952_v19 = vld [vmem:[#allocation4] sm:$0x3] }
 0x3c0   :  { %3990 = vmatpush3.bf16.msra.mxu1 %v4489_v55  ;;  %3996 = vmatpush3.bf16.msra.mxu0 %v4501_v0 }
 0x3c1   :  { %4003 = vmatprep.subr.bf16.mxu0 %v4346_v24  ;;  %3997 = vmatprep.subr.bf16.mxu1 %v4346_v24 }
 0x3c3   :  { %3642 = vmatmul.mubr.msk.f32.vlgmr.msra.gmra.mrb[6].mxu1 %vm99_vm2, %v633_v6  ;;  %3653 = vmatmul.mubr.msk.f32.vlgmr.msra.gmra.mrb[8].mxu0 %vm99_vm2, %v633_v6 }
 0x3c4   :  { %4005 = vmatpush3.bf16.msra.mxu0 %v4483_v48  ;;  %3999 = vmatpush3.bf16.msra.mxu1 %v4405_v5 }
 0x3c5   :  { %4006 = vmatprep.subr.bf16.mxu0 %v4346_v24  ;;  %4000 = vmatprep.subr.bf16.mxu1 %v4346_v24 }
 0x3c6   :  { %3663 = vmatprep.mubr.msk.f32.mxu1 %vm4348_vm1, %v4347_v33  ;;  %3674 = vmatprep.mubr.msk.f32.mxu0 %vm4348_vm1, %v4347_v33 }
 0x3c8   :  { %4008 = vmatpush3.bf16.msra.mxu0 %v4491_v56  ;;  %4002 = vmatpush3.bf16.msra.mxu1 %v4450_v30 }
 0x3c9   :  { %4009 = vmatprep.subr.bf16.mxu1 %v4346_v24  ;;  %4015 = vmatprep.subr.bf16.mxu0 %v4346_v24 }
 0x48e   :  { %v703_v7 = vpop.f32.mrb[4].mxu1  ;;  %v780_v8 = vpop.f32.mrb[6].mxu0 }
 0x48f   :  { %785 = vrot.lane.b32.xlu1 %v780_v8, %s4349_s0  ;;  %v3621_v9 = vpop.f32.mrb[5].mxu1  ;;  %v3632_v10 = vpop.f32.mrb[7].mxu0  ;;  %v707_v20 = vadd.f32 %v703_v7, %v632_v15 }
 0x491   :  { %v3328_v21 = vmul.f32 -1.442695, %v707_v20 }
 0x496   :  { %v861_v11 = vpop.f32.mrb[6].mxu1  ;;  %v937_v12 = vpop.f32.mrb[8].mxu0 }
 0x497   :  { %v3654_v13 = vpop.f32.mrb[9].mxu0  ;;  %866 = vrot.lane.b32.xlu0 %v861_v11, %s4343_s22  ;;  %v3643_v14 = vpop.f32.mrb[7].mxu1 }
 0x501   :  { %v786_v28 = vpop.permute.xlu1 %785 }
 0x502   :  { %v788_v29 = vadd.f32 %v786_v28, %v632_v15 }
 0x504   :  { %v3330_v31 = vmul.f32 -1.442695, %v788_v29 }
 0x509   :  { %v867_v16 = vpop.permute.xlu0 %866 }
 0x50a   :  { %v869_v17 = vadd.f32 %v867_v16, %v632_v15 }
 0x50c   :  { %4207 = vtanh.f32 %v869_v17 }
 0x50d   :  { %4209 = vpow2.f32 %v3328_v21 }
 0x516   :  { %v4208_v18 = vpop.eup %4207 }
 0x517   :  { %959 = vrot.lane.b32.xlu0 %v4208_v18, %s4343_s22  ;;  %v4210_v22 = vpop.eup %4209 }
 0x518   :  { %v711_v23 = vadd.f32 1.0, %v4210_v22 }
 0x51a   :  { %4211 = vrcp.f32 %v711_v23 }
 0x51b   :  { %954 = vrot.lane.b32.xlu0 %v952_v19, %s4349_s0  ;;  %4213 = vpow2.f32 %v3330_v31 }
 0x51f   :  { %942 = vrot.lane.b32.xlu0 %v937_v12, %s4344_s23 }
 0x524   :  { %v4212_v25 = vpop.eup %4211 }
 0x525   :  { %v4214_v32 = vpop.eup %4213 }
 0x526   :  { %v792_v34 = vadd.f32 1.0, %v4214_v32 }
 0x528   :  { %4215 = vrcp.f32 %v792_v34 }
 0x532   :  { %v4216_v36 = vpop.eup %4215 }
 0x589   :  { %v960_v26 = vpop.permute.xlu0 %959 }
 0x58a   :  { %v962_v27 = vmul.f32 %v4212_v25, %v960_v26 }
 0x58c   :  { %964 = vrot.lane.b32.xlu1 %v962_v27, %s4349_s0 }
 0x58d   :  { %v955_v35 = vpop.permute.xlu0 %954 }
 0x58e   :  { %v957_v37 = vmul.f32 %v4216_v36, %v955_v35 }
 0x591   :  { %v943_v41 = vpop.permute.xlu0 %942 }
 0x592   :  { %v945_v42 = vadd.f32 %v943_v41, %v632_v15 }
 0x594   :  { %v3333_v43 = vmul.f32 -1.442695, %v945_v42 }
 0x5fe   :  { %v965_v38 = vpop.permute.xlu1 %964 }
 0x5ff   :  { %v967_v39 = vadd.f32 %v965_v38, %v957_v37 }
 0x601   :  { %4217 = vtanh.f32 %v967_v39 }
 0x602   :  { %4219 = vpow2.f32 %v3333_v43 }
 0x60b   :  { %v4218_v40 = vpop.eup %4217 }
 0x60c   :  { %970 = vrot.lane.b32.xlu1 %v4218_v40, %s4343_s22  ;;  %v4220_v44 = vpop.eup %4219 }
 0x60d   :  { %v949_v45 = vadd.f32 1.0, %v4220_v44 }
 0x60f   :  { %4221 = vrcp.f32 %v949_v45 }
 0x619   :  { %v4222_v46 = vpop.eup %4221 }
 0x67e   :  { %v971_v49 = vpop.permute.xlu1 %970 }
 0x67f   :  { %v973_v50 = vmul.f32 %v4222_v46, %v971_v49 }
 0x681   :  { %980 = vrot.lane.b32.xlu0 %v973_v50, %s4349_s0 }
 0x685   :  { %975 = vrot.lane.b32.xlu0 %v967_v39, %s4344_s23 }
 0x6f3   :  { %v981_v52 = vpop.permute.xlu0 %980 }
 0x6f4   :  { %983 = vst.msk [vmem:[#allocation3] sm:$0x3] %vm34_vm0, %v981_v52  ;;  %v985_v53 = vadd.f32 %v984_v51, %v981_v52 }
 0x6f6   :  { %986 = vst.msk [vmem:[#allocation5] sm:$0x3] %vm34_vm0, %v985_v53 }
 0x6f7   :  { %v976_v54 = vpop.permute.xlu0 %975 }
 0x6f8   :  { %978 = vst.msk [vmem:[#allocation4] sm:$0x3] %vm34_vm0, %v976_v54  ;;  %v1344_v54 = vld [vmem:[#allocation2 + $0x6] sm:$0x3] }
 0x6fb   :  { %v989_v57 = vld [vmem:[#allocation3] sm:$0x3] }
 0x6fc   :  { %3664 = vmatmul.mubr.msk.f32.vlgmr.msra.gmra.mrb[8].mxu1 %vm99_vm2, %v989_v57  ;;  %3675 = vmatmul.mubr.msk.f32.vlgmr.msra.gmra.mrb[10].mxu0 %vm99_vm2, %v989_v57 }
 0x6fd   :  { %4011 = vmatpush3.bf16.msra.mxu1 %v4481_v47  ;;  %4017 = vmatpush3.bf16.msra.mxu0 %v4497_v63  ;;  %v1340_v39 = vld [vmem:[#allocation5] sm:$0x3] }
 0x6fe   :  { %4012 = vmatprep.subr.bf16.mxu1 %v4346_v24  ;;  %4018 = vmatprep.subr.bf16.mxu0 %v4346_v24 }
 0x6ff   :  { %3685 = vmatprep.mubr.msk.f32.mxu1 %vm4348_vm1, %v4347_v33  ;;  %3696 = vmatprep.mubr.msk.f32.mxu0 %vm4348_vm1, %v4347_v33  ;;  %v1308_v9 = vld [vmem:[#allocation4] sm:$0x3] }
 0x701   :  { %4014 = vmatpush3.bf16.msra.mxu1 %v4489_v55  ;;  %4020 = vmatpush3.bf16.msra.mxu0 %v4501_v0 }
 0x702   :  { %4027 = vmatprep.subr.bf16.mxu0 %v4346_v24  ;;  %4021 = vmatprep.subr.bf16.mxu1 %v4346_v24 }
 0x704   :  { %3686 = vmatmul.mubr.msk.f32.vlgmr.msra.gmra.mrb[10].mxu1 %vm99_vm2, %v989_v57  ;;  %3697 = vmatmul.mubr.msk.f32.vlgmr.msra.gmra.mrb[12].mxu0 %vm99_vm2, %v989_v57 }
 0x705   :  { %4029 = vmatpush3.bf16.msra.mxu0 %v4483_v48  ;;  %4023 = vmatpush3.bf16.msra.mxu1 %v4405_v5 }
 0x706   :  { %4030 = vmatprep.subr.bf16.mxu0 %v4346_v24  ;;  %4024 = vmatprep.subr.bf16.mxu1 %v4346_v24 }
 0x707   :  { %3707 = vmatprep.mubr.msk.f32.mxu1 %vm4348_vm1, %v4347_v33  ;;  %3718 = vmatprep.mubr.msk.f32.mxu0 %vm4348_vm1, %v4347_v33 }
 0x709   :  { %4032 = vmatpush3.bf16.msra.mxu0 %v4491_v56  ;;  %4026 = vmatpush3.bf16.msra.mxu1 %v4450_v30 }
 0x70a   :  { %4033 = vmatprep.subr.bf16.mxu1 %v4346_v24  ;;  %4039 = vmatprep.subr.bf16.mxu0 %v4346_v24 }
 0x7cf   :  { %v1059_v58 = vpop.f32.mrb[8].mxu1  ;;  %v1136_v59 = vpop.f32.mrb[10].mxu0 }
 0x7d0   :  { %1141 = vrot.lane.b32.xlu0 %v1136_v59, %s4349_s0  ;;  %v3665_v60 = vpop.f32.mrb[9].mxu1  ;;  %v3676_v61 = vpop.f32.mrb[11].mxu0  ;;  %v1063_v10 = vadd.f32 %v1059_v58, %v988_v4 }
 0x7d2   :  { %v3335_v11 = vmul.f32 -1.442695, %v1063_v10 }
 0x7d7   :  { %v1217_v62 = vpop.f32.mrb[10].mxu1  ;;  %v1293_v1 = vpop.f32.mrb[12].mxu0 }
 0x7d8   :  { %v3698_v2 = vpop.f32.mrb[13].mxu0  ;;  %1222 = vrot.lane.b32.xlu1 %v1217_v62, %s4343_s22  ;;  %v3687_v3 = vpop.f32.mrb[11].mxu1 }
 0x842   :  { %v1142_v17 = vpop.permute.xlu0 %1141 }
 0x843   :  { %v1144_v18 = vadd.f32 %v1142_v17, %v988_v4 }
 0x845   :  { %v3337_v19 = vmul.f32 -1.442695, %v1144_v18 }
 0x84a   :  { %v1223_v6 = vpop.permute.xlu1 %1222 }
 0x84b   :  { %v1225_v7 = vadd.f32 %v1223_v6, %v988_v4 }
 0x84d   :  { %4223 = vtanh.f32 %v1225_v7 }
 0x84e   :  { %4225 = vpow2.f32 %v3335_v11 }
 0x857   :  { %v4224_v8 = vpop.eup %4223 }
 0x858   :  { %1315 = vrot.lane.b32.xlu1 %v4224_v8, %s4343_s22  ;;  %v4226_v12 = vpop.eup %4225 }
 0x859   :  { %v1067_v13 = vadd.f32 1.0, %v4226_v12 }
 0x85b   :  { %4227 = vrcp.f32 %v1067_v13 }
 0x85c   :  { %1310 = vrot.lane.b32.xlu1 %v1308_v9, %s4349_s0  ;;  %4229 = vpow2.f32 %v3337_v19 }
 0x860   :  { %1298 = vrot.lane.b32.xlu1 %v1293_v1, %s4344_s23 }
 0x865   :  { %v4228_v14 = vpop.eup %4227 }
 0x866   :  { %v4230_v20 = vpop.eup %4229 }
 0x867   :  { %v1148_v21 = vadd.f32 1.0, %v4230_v20 }
 0x869   :  { %4231 = vrcp.f32 %v1148_v21 }
 0x873   :  { %v4232_v23 = vpop.eup %4231 }
 0x8ca   :  { %v1316_v15 = vpop.permute.xlu1 %1315 }
 0x8cb   :  { %v1318_v16 = vmul.f32 %v4228_v14, %v1316_v15 }
 0x8cd   :  { %1320 = vrot.lane.b32.xlu0 %v1318_v16, %s4349_s0 }
 0x8ce   :  { %v1311_v22 = vpop.permute.xlu1 %1310 }
 0x8cf   :  { %v1313_v25 = vmul.f32 %v4232_v23, %v1311_v22 }
 0x8d2   :  { %v1299_v29 = vpop.permute.xlu1 %1298 }
 0x8d3   :  { %v1301_v31 = vadd.f32 %v1299_v29, %v988_v4 }
 0x8d5   :  { %v3340_v32 = vmul.f32 -1.442695, %v1301_v31 }
 0x93f   :  { %v1321_v26 = vpop.permute.xlu0 %1320 }
 0x940   :  { %v1323_v27 = vadd.f32 %v1321_v26, %v1313_v25 }
 0x942   :  { %4233 = vtanh.f32 %v1323_v27 }
 0x943   :  { %4235 = vpow2.f32 %v3340_v32 }
 0x94c   :  { %v4234_v28 = vpop.eup %4233 }
 0x94d   :  { %1326 = vrot.lane.b32.xlu0 %v4234_v28, %s4343_s22  ;;  %v4236_v34 = vpop.eup %4235 }
 0x94e   :  { %v1305_v35 = vadd.f32 1.0, %v4236_v34 }
 0x950   :  { %4237 = vrcp.f32 %v1305_v35 }
 0x95a   :  { %v4238_v36 = vpop.eup %4237 }
 0x9bf   :  { %v1327_v37 = vpop.permute.xlu0 %1326 }
 0x9c0   :  { %v1329_v38 = vmul.f32 %v4238_v36, %v1327_v37 }
 0x9c2   :  { %1336 = vrot.lane.b32.xlu1 %v1329_v38, %s4349_s0 }
 0x9c6   :  { %1331 = vrot.lane.b32.xlu1 %v1323_v27, %s4344_s23 }
 0xa34   :  { %v1337_v40 = vpop.permute.xlu1 %1336 }
 0xa35   :  { %1339 = vst.msk [vmem:[#allocation3] sm:$0x3] %vm34_vm0, %v1337_v40  ;;  %v1341_v41 = vadd.f32 %v1340_v39, %v1337_v40 }
 0xa37   :  { %1342 = vst.msk [vmem:[#allocation5] sm:$0x3] %vm34_vm0, %v1341_v41 }
 0xa38   :  { %v1332_v42 = vpop.permute.xlu1 %1331 }
 0xa39   :  { %1334 = vst.msk [vmem:[#allocation4] sm:$0x3] %vm34_vm0, %v1332_v42  ;;  %v1700_v42 = vld [vmem:[#allocation2 + $0x8] sm:$0x3] }
 0xa3c   :  { %v1345_v43 = vld [vmem:[#allocation3] sm:$0x3] }
 0xa3d   :  { %3708 = vmatmul.mubr.msk.f32.vlgmr.msra.gmra.mrb[12].mxu1 %vm99_vm2, %v1345_v43  ;;  %3719 = vmatmul.mubr.msk.f32.vlgmr.msra.gmra.mrb[14].mxu0 %vm99_vm2, %v1345_v43 }
 0xa3e   :  { %4035 = vmatpush3.bf16.msra.mxu1 %v4481_v47  ;;  %4041 = vmatpush3.bf16.msra.mxu0 %v4497_v63  ;;  %v1696_v27 = vld [vmem:[#allocation5] sm:$0x3] }
 0xa3f   :  { %4036 = vmatprep.subr.bf16.mxu1 %v4346_v24  ;;  %4042 = vmatprep.subr.bf16.mxu0 %v4346_v24 }
 0xa40   :  { %3729 = vmatprep.mubr.msk.f32.mxu1 %vm4348_vm1, %v4347_v33  ;;  %3740 = vmatprep.mubr.msk.f32.mxu0 %vm4348_vm1, %v4347_v33  ;;  %v1664_v60 = vld [vmem:[#allocation4] sm:$0x3] }
 0xa42   :  { %4038 = vmatpush3.bf16.msra.mxu1 %v4489_v55  ;;  %4044 = vmatpush3.bf16.msra.mxu0 %v4501_v0 }
 0xa43   :  { %4051 = vmatprep.subr.bf16.mxu0 %v4346_v24  ;;  %4045 = vmatprep.subr.bf16.mxu1 %v4346_v24 }
 0xa45   :  { %3730 = vmatmul.mubr.msk.f32.vlgmr.msra.gmra.mrb[14].mxu1 %vm99_vm2, %v1345_v43  ;;  %3741 = vmatmul.mubr.msk.f32.vlgmr.msra.gmra.mrb[16].mxu0 %vm99_vm2, %v1345_v43 }
 0xa46   :  { %4053 = vmatpush3.bf16.msra.mxu0 %v4483_v48  ;;  %4047 = vmatpush3.bf16.msra.mxu1 %v4405_v5 }
 0xa47   :  { %4054 = vmatprep.subr.bf16.mxu0 %v4346_v24  ;;  %4048 = vmatprep.subr.bf16.mxu1 %v4346_v24 }
 0xa48   :  { %3751 = vmatprep.mubr.msk.f32.mxu1 %vm4348_vm1, %v4347_v33  ;;  %3762 = vmatprep.mubr.msk.f32.mxu0 %vm4348_vm1, %v4347_v33 }
 0xa4a   :  { %4056 = vmatpush3.bf16.msra.mxu0 %v4491_v56  ;;  %4050 = vmatpush3.bf16.msra.mxu1 %v4450_v30 }
 0xa4b   :  { %4057 = vmatprep.subr.bf16.mxu1 %v4346_v24  ;;  %4063 = vmatprep.subr.bf16.mxu0 %v4346_v24 }
 0xb10   :  { %v1415_v44 = vpop.f32.mrb[12].mxu1  ;;  %v1492_v45 = vpop.f32.mrb[14].mxu0 }
 0xb11   :  { %1497 = vrot.lane.b32.xlu1 %v1492_v45, %s4349_s0  ;;  %v3709_v46 = vpop.f32.mrb[13].mxu1  ;;  %v3720_v49 = vpop.f32.mrb[15].mxu0  ;;  %v1419_v61 = vadd.f32 %v1415_v44, %v1344_v54 }
 0xb13   :  { %v3342_v62 = vmul.f32 -1.442695, %v1419_v61 }
 0xb18   :  { %v1573_v50 = vpop.f32.mrb[14].mxu1  ;;  %v1649_v51 = vpop.f32.mrb[16].mxu0 }
 0xb19   :  { %v3742_v52 = vpop.f32.mrb[17].mxu0  ;;  %1578 = vrot.lane.b32.xlu0 %v1573_v50, %s4343_s22  ;;  %v3731_v53 = vpop.f32.mrb[15].mxu1 }
 0xb83   :  { %v1498_v7 = vpop.permute.xlu1 %1497 }
 0xb84   :  { %v1500_v8 = vadd.f32 %v1498_v7, %v1344_v54 }
 0xb86   :  { %v3344_v9 = vmul.f32 -1.442695, %v1500_v8 }
 0xb8b   :  { %v1579_v57 = vpop.permute.xlu0 %1578 }
 0xb8c   :  { %v1581_v58 = vadd.f32 %v1579_v57, %v1344_v54 }
 0xb8e   :  { %4239 = vtanh.f32 %v1581_v58 }
 0xb8f   :  { %4241 = vpow2.f32 %v3342_v62 }
 0xb98   :  { %v4240_v59 = vpop.eup %4239 }
 0xb99   :  { %1671 = vrot.lane.b32.xlu0 %v4240_v59, %s4343_s22  ;;  %v4242_v1 = vpop.eup %4241 }
 0xb9a   :  { %v1423_v2 = vadd.f32 1.0, %v4242_v1 }
 0xb9c   :  { %4243 = vrcp.f32 %v1423_v2 }
 0xb9d   :  { %1666 = vrot.lane.b32.xlu0 %v1664_v60, %s4349_s0  ;;  %4245 = vpow2.f32 %v3344_v9 }
 0xba1   :  { %1654 = vrot.lane.b32.xlu0 %v1649_v51, %s4344_s23 }
 0xba6   :  { %v4244_v3 = vpop.eup %4243 }
 0xba7   :  { %v4246_v10 = vpop.eup %4245 }
 0xba8   :  { %v1504_v11 = vadd.f32 1.0, %v4246_v10 }
 0xbaa   :  { %4247 = vrcp.f32 %v1504_v11 }
 0xbb4   :  { %v4248_v13 = vpop.eup %4247 }
 0xc0b   :  { %v1672_v4 = vpop.permute.xlu0 %1671 }
 0xc0c   :  { %v1674_v6 = vmul.f32 %v4244_v3, %v1672_v4 }
 0xc0e   :  { %1676 = vrot.lane.b32.xlu1 %v1674_v6, %s4349_s0 }
 0xc0f   :  { %v1667_v12 = vpop.permute.xlu0 %1666 }
 0xc10   :  { %v1669_v14 = vmul.f32 %v4248_v13, %v1667_v12 }
 0xc13   :  { %v1655_v18 = vpop.permute.xlu0 %1654 }
 0xc14   :  { %v1657_v19 = vadd.f32 %v1655_v18, %v1344_v54 }
 0xc16   :  { %v3347_v20 = vmul.f32 -1.442695, %v1657_v19 }
 0xc80   :  { %v1677_v15 = vpop.permute.xlu1 %1676 }
 0xc81   :  { %v1679_v16 = vadd.f32 %v1677_v15, %v1669_v14 }
 0xc83   :  { %4249 = vtanh.f32 %v1679_v16 }
 0xc84   :  { %4251 = vpow2.f32 %v3347_v20 }
 0xc8d   :  { %v4250_v17 = vpop.eup %4249 }
 0xc8e   :  { %1682 = vrot.lane.b32.xlu1 %v4250_v17, %s4343_s22  ;;  %v4252_v21 = vpop.eup %4251 }
 0xc8f   :  { %v1661_v22 = vadd.f32 1.0, %v4252_v21 }
 0xc91   :  { %4253 = vrcp.f32 %v1661_v22 }
 0xc9b   :  { %v4254_v23 = vpop.eup %4253 }
 0xd00   :  { %v1683_v25 = vpop.permute.xlu1 %1682 }
 0xd01   :  { %v1685_v26 = vmul.f32 %v4254_v23, %v1683_v25 }
 0xd03   :  { %1692 = vrot.lane.b32.xlu0 %v1685_v26, %s4349_s0 }
 0xd07   :  { %1687 = vrot.lane.b32.xlu0 %v1679_v16, %s4344_s23 }
 0xd75   :  { %v1693_v28 = vpop.permute.xlu0 %1692 }
 0xd76   :  { %1695 = vst.msk [vmem:[#allocation3] sm:$0x3] %vm34_vm0, %v1693_v28  ;;  %v1697_v29 = vadd.f32 %v1696_v27, %v1693_v28 }
 0xd78   :  { %1698 = vst.msk [vmem:[#allocation5] sm:$0x3] %vm34_vm0, %v1697_v29 }
 0xd79   :  { %v1688_v31 = vpop.permute.xlu0 %1687 }
 0xd7a   :  { %1690 = vst.msk [vmem:[#allocation4] sm:$0x3] %vm34_vm0, %v1688_v31  ;;  %v2056_v31 = vld [vmem:[#allocation2 + $0xa] sm:$0x3] }
 0xd7d   :  { %v1701_v32 = vld [vmem:[#allocation3] sm:$0x3] }
 0xd7e   :  { %3752 = vmatmul.mubr.msk.f32.vlgmr.msra.gmra.mrb[16].mxu1 %vm99_vm2, %v1701_v32  ;;  %3763 = vmatmul.mubr.msk.f32.vlgmr.msra.gmra.mrb[18].mxu0 %vm99_vm2, %v1701_v32 }
 0xd7f   :  { %4059 = vmatpush3.bf16.msra.mxu1 %v4481_v47  ;;  %4065 = vmatpush3.bf16.msra.mxu0 %v4497_v63  ;;  %v2052_v16 = vld [vmem:[#allocation5] sm:$0x3] }
 0xd80   :  { %4060 = vmatprep.subr.bf16.mxu1 %v4346_v24  ;;  %4066 = vmatprep.subr.bf16.mxu0 %v4346_v24 }
 0xd81   :  { %3773 = vmatprep.mubr.msk.f32.mxu1 %vm4348_vm1, %v4347_v33  ;;  %3784 = vmatprep.mubr.msk.f32.mxu0 %vm4348_vm1, %v4347_v33  ;;  %v2020_v46 = vld [vmem:[#allocation4] sm:$0x3] }
 0xd83   :  { %4062 = vmatpush3.bf16.msra.mxu1 %v4489_v55  ;;  %4068 = vmatpush3.bf16.msra.mxu0 %v4501_v0 }
 0xd84   :  { %4075 = vmatprep.subr.bf16.mxu0 %v4346_v24  ;;  %4069 = vmatprep.subr.bf16.mxu1 %v4346_v24 }
 0xd86   :  { %3774 = vmatmul.mubr.msk.f32.vlgmr.msra.gmra.mrb[18].mxu1 %vm99_vm2, %v1701_v32  ;;  %3785 = vmatmul.mubr.msk.f32.vlgmr.msra.gmra.mrb[20].mxu0 %vm99_vm2, %v1701_v32 }
 0xd87   :  { %4077 = vmatpush3.bf16.msra.mxu0 %v4483_v48  ;;  %4071 = vmatpush3.bf16.msra.mxu1 %v4405_v5 }
 0xd88   :  { %4078 = vmatprep.subr.bf16.mxu0 %v4346_v24  ;;  %4072 = vmatprep.subr.bf16.mxu1 %v4346_v24 }
 0xd89   :  { %3795 = vmatprep.mubr.msk.f32.mxu1 %vm4348_vm1, %v4347_v33  ;;  %3806 = vmatprep.mubr.msk.f32.mxu0 %vm4348_vm1, %v4347_v33 }
 0xd8b   :  { %4080 = vmatpush3.bf16.msra.mxu0 %v4491_v56  ;;  %4074 = vmatpush3.bf16.msra.mxu1 %v4450_v30 }
 0xd8c   :  { %4081 = vmatprep.subr.bf16.mxu1 %v4346_v24  ;;  %4087 = vmatprep.subr.bf16.mxu0 %v4346_v24 }
 0xe51   :  { %v1771_v34 = vpop.f32.mrb[16].mxu1  ;;  %v1848_v35 = vpop.f32.mrb[18].mxu0 }
 0xe52   :  { %1853 = vrot.lane.b32.xlu0 %v1848_v35, %s4349_s0  ;;  %v3753_v36 = vpop.f32.mrb[17].mxu1  ;;  %v3764_v37 = vpop.f32.mrb[19].mxu0  ;;  %v1775_v49 = vadd.f32 %v1771_v34, %v1700_v42 }
 0xe54   :  { %v3349_v50 = vmul.f32 -1.442695, %v1775_v49 }
 0xe59   :  { %v1929_v38 = vpop.f32.mrb[18].mxu1  ;;  %v2005_v39 = vpop.f32.mrb[20].mxu0 }
 0xe5a   :  { %v3786_v40 = vpop.f32.mrb[21].mxu0  ;;  %1934 = vrot.lane.b32.xlu1 %v1929_v38, %s4343_s22  ;;  %v3775_v41 = vpop.f32.mrb[19].mxu1 }
 0xec4   :  { %v1854_v58 = vpop.permute.xlu0 %1853 }
 0xec5   :  { %v1856_v59 = vadd.f32 %v1854_v58, %v1700_v42 }
 0xec7   :  { %v3351_v60 = vmul.f32 -1.442695, %v1856_v59 }
 0xecc   :  { %v1935_v43 = vpop.permute.xlu1 %1934 }
 0xecd   :  { %v1937_v44 = vadd.f32 %v1935_v43, %v1700_v42 }
 0xecf   :  { %4255 = vtanh.f32 %v1937_v44 }
 0xed0   :  { %4257 = vpow2.f32 %v3349_v50 }
 0xed9   :  { %v4256_v45 = vpop.eup %4255 }
 0xeda   :  { %2027 = vrot.lane.b32.xlu1 %v4256_v45, %s4343_s22  ;;  %v4258_v51 = vpop.eup %4257 }
 0xedb   :  { %v1779_v52 = vadd.f32 1.0, %v4258_v51 }
 0xedd   :  { %4259 = vrcp.f32 %v1779_v52 }
 0xede   :  { %2022 = vrot.lane.b32.xlu1 %v2020_v46, %s4349_s0  ;;  %4261 = vpow2.f32 %v3351_v60 }
 0xee2   :  { %2010 = vrot.lane.b32.xlu1 %v2005_v39, %s4344_s23 }
 0xee7   :  { %v4260_v53 = vpop.eup %4259 }
 0xee8   :  { %v4262_v61 = vpop.eup %4261 }
 0xee9   :  { %v1860_v62 = vadd.f32 1.0, %v4262_v61 }
 0xeeb   :  { %4263 = vrcp.f32 %v1860_v62 }
 0xef5   :  { %v4264_v2 = vpop.eup %4263 }
 0xf4c   :  { %v2028_v54 = vpop.permute.xlu1 %2027 }
 0xf4d   :  { %v2030_v57 = vmul.f32 %v4260_v53, %v2028_v54 }
 0xf4f   :  { %2032 = vrot.lane.b32.xlu0 %v2030_v57, %s4349_s0 }
 0xf50   :  { %v2023_v1 = vpop.permute.xlu1 %2022 }
 0xf51   :  { %v2025_v3 = vmul.f32 %v4264_v2, %v2023_v1 }
 0xf54   :  { %v2011_v8 = vpop.permute.xlu1 %2010 }
 0xf55   :  { %v2013_v9 = vadd.f32 %v2011_v8, %v1700_v42 }
 0xf57   :  { %v3354_v10 = vmul.f32 -1.442695, %v2013_v9 }
 0xfc1   :  { %v2033_v4 = vpop.permute.xlu0 %2032 }
 0xfc2   :  { %v2035_v6 = vadd.f32 %v2033_v4, %v2025_v3 }
 0xfc4   :  { %4265 = vtanh.f32 %v2035_v6 }
 0xfc5   :  { %4267 = vpow2.f32 %v3354_v10 }
 0xfce   :  { %v4266_v7 = vpop.eup %4265 }
 0xfcf   :  { %2038 = vrot.lane.b32.xlu0 %v4266_v7, %s4343_s22  ;;  %v4268_v11 = vpop.eup %4267 }
 0xfd0   :  { %v2017_v12 = vadd.f32 1.0, %v4268_v11 }
 0xfd2   :  { %4269 = vrcp.f32 %v2017_v12 }
 0xfdc   :  { %v4270_v13 = vpop.eup %4269 }
0x1041   :  { %v2039_v14 = vpop.permute.xlu0 %2038 }
0x1042   :  { %v2041_v15 = vmul.f32 %v4270_v13, %v2039_v14 }
0x1044   :  { %2048 = vrot.lane.b32.xlu1 %v2041_v15, %s4349_s0 }
0x1048   :  { %2043 = vrot.lane.b32.xlu1 %v2035_v6, %s4344_s23 }
0x10b6   :  { %v2049_v17 = vpop.permute.xlu1 %2048 }
0x10b7   :  { %2051 = vst.msk [vmem:[#allocation3] sm:$0x3] %vm34_vm0, %v2049_v17  ;;  %v2053_v18 = vadd.f32 %v2052_v16, %v2049_v17  ;;  %v2412_v17 = vld [vmem:[#allocation2 + $0xc] sm:$0x3] }
0x10b9   :  { %2054 = vst.msk [vmem:[#allocation5] sm:$0x3] %vm34_vm0, %v2053_v18 }
0x10ba   :  { %v2044_v19 = vpop.permute.xlu1 %2043 }
0x10bb   :  { %2046 = vst.msk [vmem:[#allocation4] sm:$0x3] %vm34_vm0, %v2044_v19 }
0x10be   :  { %v2057_v20 = vld [vmem:[#allocation3] sm:$0x3] }
0x10bf   :  { %3796 = vmatmul.mubr.msk.f32.vlgmr.msra.gmra.mrb[20].mxu1 %vm99_vm2, %v2057_v20  ;;  %3807 = vmatmul.mubr.msk.f32.vlgmr.msra.gmra.mrb[22].mxu0 %vm99_vm2, %v2057_v20 }
0x10c0   :  { %4083 = vmatpush3.bf16.msra.mxu1 %v4481_v47  ;;  %4089 = vmatpush3.bf16.msra.mxu0 %v4497_v63  ;;  %v2408_v6 = vld [vmem:[#allocation5] sm:$0x3] }
0x10c1   :  { %4084 = vmatprep.subr.bf16.mxu1 %v4346_v24  ;;  %4090 = vmatprep.subr.bf16.mxu0 %v4346_v24 }
0x10c2   :  { %3817 = vmatprep.mubr.msk.f32.mxu1 %vm4348_vm1, %v4347_v33  ;;  %3828 = vmatprep.mubr.msk.f32.mxu0 %vm4348_vm1, %v4347_v33  ;;  %v2376_v36 = vld [vmem:[#allocation4] sm:$0x3] }
0x10c4   :  { %4086 = vmatpush3.bf16.msra.mxu1 %v4489_v55  ;;  %4092 = vmatpush3.bf16.msra.mxu0 %v4501_v0 }
0x10c5   :  { %4099 = vmatprep.subr.bf16.mxu0 %v4346_v24  ;;  %4093 = vmatprep.subr.bf16.mxu1 %v4346_v24 }
0x10c7   :  { %3818 = vmatmul.mubr.msk.f32.vlgmr.msra.gmra.mrb[22].mxu1 %vm99_vm2, %v2057_v20  ;;  %3829 = vmatmul.mubr.msk.f32.vlgmr.msra.gmra.mrb[24].mxu0 %vm99_vm2, %v2057_v20 }
0x10c8   :  { %4101 = vmatpush3.bf16.msra.mxu0 %v4483_v48  ;;  %4095 = vmatpush3.bf16.msra.mxu1 %v4405_v5 }
0x10c9   :  { %4102 = vmatprep.subr.bf16.mxu0 %v4346_v24  ;;  %4096 = vmatprep.subr.bf16.mxu1 %v4346_v24 }
0x10ca   :  { %3839 = vmatprep.mubr.msk.f32.mxu1 %vm4348_vm1, %v4347_v33  ;;  %3850 = vmatprep.mubr.msk.f32.mxu0 %vm4348_vm1, %v4347_v33 }
0x10cc   :  { %4104 = vmatpush3.bf16.msra.mxu0 %v4491_v56  ;;  %4098 = vmatpush3.bf16.msra.mxu1 %v4450_v30 }
0x10cd   :  { %4105 = vmatprep.subr.bf16.mxu1 %v4346_v24  ;;  %4111 = vmatprep.subr.bf16.mxu0 %v4346_v24 }
0x1192   :  { %v2127_v21 = vpop.f32.mrb[20].mxu1  ;;  %v2204_v22 = vpop.f32.mrb[22].mxu0 }
0x1193   :  { %2209 = vrot.lane.b32.xlu1 %v2204_v22, %s4349_s0  ;;  %v3797_v23 = vpop.f32.mrb[21].mxu1  ;;  %v3808_v25 = vpop.f32.mrb[23].mxu0  ;;  %v2131_v37 = vadd.f32 %v2127_v21, %v2056_v31 }
0x1195   :  { %v3356_v38 = vmul.f32 -1.442695, %v2131_v37 }
0x119a   :  { %v2285_v26 = vpop.f32.mrb[22].mxu1  ;;  %v2361_v27 = vpop.f32.mrb[24].mxu0 }
0x119b   :  { %v3830_v28 = vpop.f32.mrb[25].mxu0  ;;  %2290 = vrot.lane.b32.xlu0 %v2285_v26, %s4343_s22  ;;  %v3819_v29 = vpop.f32.mrb[23].mxu1 }
0x1205   :  { %v2210_v44 = vpop.permute.xlu1 %2209 }
0x1206   :  { %v2212_v45 = vadd.f32 %v2210_v44, %v2056_v31 }
0x1208   :  { %v3358_v46 = vmul.f32 -1.442695, %v2212_v45 }
0x120d   :  { %v2291_v32 = vpop.permute.xlu0 %2290 }
0x120e   :  { %v2293_v34 = vadd.f32 %v2291_v32, %v2056_v31 }
0x1210   :  { %4271 = vtanh.f32 %v2293_v34 }
0x1211   :  { %4273 = vpow2.f32 %v3356_v38 }
0x121a   :  { %v4272_v35 = vpop.eup %4271 }
0x121b   :  { %2383 = vrot.lane.b32.xlu0 %v4272_v35, %s4343_s22  ;;  %v4274_v39 = vpop.eup %4273 }
0x121c   :  { %v2135_v40 = vadd.f32 1.0, %v4274_v39 }
0x121e   :  { %4275 = vrcp.f32 %v2135_v40 }
0x121f   :  { %2378 = vrot.lane.b32.xlu0 %v2376_v36, %s4349_s0  ;;  %4277 = vpow2.f32 %v3358_v46 }
0x1223   :  { %2366 = vrot.lane.b32.xlu0 %v2361_v27, %s4344_s23 }
0x1228   :  { %v4276_v41 = vpop.eup %4275 }
0x1229   :  { %v4278_v49 = vpop.eup %4277 }
0x122a   :  { %v2216_v50 = vadd.f32 1.0, %v4278_v49 }
0x122c   :  { %4279 = vrcp.f32 %v2216_v50 }
0x1236   :  { %v4280_v52 = vpop.eup %4279 }
0x128d   :  { %v2384_v42 = vpop.permute.xlu0 %2383 }
0x128e   :  { %v2386_v43 = vmul.f32 %v4276_v41, %v2384_v42 }
0x1290   :  { %2388 = vrot.lane.b32.xlu1 %v2386_v43, %s4349_s0 }
0x1291   :  { %v2379_v51 = vpop.permute.xlu0 %2378 }
0x1292   :  { %v2381_v53 = vmul.f32 %v4280_v52, %v2379_v51 }
0x1295   :  { %v2367_v59 = vpop.permute.xlu0 %2366 }
0x1296   :  { %v2369_v60 = vadd.f32 %v2367_v59, %v2056_v31 }
0x1298   :  { %v3361_v61 = vmul.f32 -1.442695, %v2369_v60 }
0x1302   :  { %v2389_v54 = vpop.permute.xlu1 %2388 }
0x1303   :  { %v2391_v57 = vadd.f32 %v2389_v54, %v2381_v53 }
0x1305   :  { %4281 = vtanh.f32 %v2391_v57 }
0x1306   :  { %4283 = vpow2.f32 %v3361_v61 }
0x130f   :  { %v4282_v58 = vpop.eup %4281 }
0x1310   :  { %2394 = vrot.lane.b32.xlu1 %v4282_v58, %s4343_s22  ;;  %v4284_v62 = vpop.eup %4283 }
0x1311   :  { %v2373_v1 = vadd.f32 1.0, %v4284_v62  ;;  %v2768_v62 = vld [vmem:[#allocation2 + $0xe] sm:$0x3] }
0x1313   :  { %4285 = vrcp.f32 %v2373_v1 }
0x131d   :  { %v4286_v2 = vpop.eup %4285 }
0x1382   :  { %v2395_v3 = vpop.permute.xlu1 %2394 }
0x1383   :  { %v2397_v4 = vmul.f32 %v4286_v2, %v2395_v3 }
0x1385   :  { %2404 = vrot.lane.b32.xlu0 %v2397_v4, %s4349_s0 }
0x1389   :  { %2399 = vrot.lane.b32.xlu0 %v2391_v57, %s4344_s23 }
0x13f7   :  { %v2405_v7 = vpop.permute.xlu0 %2404 }
0x13f8   :  { %2407 = vst.msk [vmem:[#allocation3] sm:$0x3] %vm34_vm0, %v2405_v7  ;;  %v2409_v8 = vadd.f32 %v2408_v6, %v2405_v7 }
0x13fa   :  { %2410 = vst.msk [vmem:[#allocation5] sm:$0x3] %vm34_vm0, %v2409_v8 }
0x13fb   :  { %v2400_v9 = vpop.permute.xlu0 %2399 }
0x13fc   :  { %2402 = vst.msk [vmem:[#allocation4] sm:$0x3] %vm34_vm0, %v2400_v9 }
0x13ff   :  { %v2413_v10 = vld [vmem:[#allocation3] sm:$0x3] }
0x1400   :  { %3840 = vmatmul.mubr.msk.f32.vlgmr.msra.gmra.mrb[24].mxu1 %vm99_vm2, %v2413_v10  ;;  %3851 = vmatmul.mubr.msk.f32.vlgmr.msra.gmra.mrb[26].mxu0 %vm99_vm2, %v2413_v10 }
0x1401   :  { %4107 = vmatpush3.bf16.msra.mxu1 %v4481_v47  ;;  %4113 = vmatpush3.bf16.msra.mxu0 %v4497_v63  ;;  %v2764_v51 = vld [vmem:[#allocation5] sm:$0x3] }
0x1402   :  { %4108 = vmatprep.subr.bf16.mxu1 %v4346_v24  ;;  %4114 = vmatprep.subr.bf16.mxu0 %v4346_v24 }
0x1403   :  { %3861 = vmatprep.mubr.msk.f32.mxu1 %vm4348_vm1, %v4347_v33  ;;  %3872 = vmatprep.mubr.msk.f32.mxu0 %vm4348_vm1, %v4347_v33  ;;  %v2732_v19 = vld [vmem:[#allocation4] sm:$0x3] }
0x1405   :  { %4110 = vmatpush3.bf16.msra.mxu1 %v4489_v55  ;;  %4116 = vmatpush3.bf16.msra.mxu0 %v4501_v0 }
0x1406   :  { %4123 = vmatprep.subr.bf16.mxu0 %v4346_v24  ;;  %4117 = vmatprep.subr.bf16.mxu1 %v4346_v24 }
0x1408   :  { %3862 = vmatmul.mubr.msk.f32.vlgmr.msra.gmra.mrb[26].mxu1 %vm99_vm2, %v2413_v10  ;;  %3873 = vmatmul.mubr.msk.f32.vlgmr.msra.gmra.mrb[28].mxu0 %vm99_vm2, %v2413_v10 }
0x1409   :  { %4125 = vmatpush3.bf16.msra.mxu0 %v4483_v48  ;;  %4119 = vmatpush3.bf16.msra.mxu1 %v4405_v5 }
0x140a   :  { %4126 = vmatprep.subr.bf16.mxu0 %v4346_v24  ;;  %4120 = vmatprep.subr.bf16.mxu1 %v4346_v24 }
0x140b   :  { %3883 = vmatprep.mubr.msk.f32.mxu1 %vm4348_vm1, %v4347_v33  ;;  %3894 = vmatprep.mubr.msk.f32.mxu0 %vm4348_vm1, %v4347_v33 }
0x140d   :  { %4128 = vmatpush3.bf16.msra.mxu0 %v4491_v56  ;;  %4122 = vmatpush3.bf16.msra.mxu1 %v4450_v30 }
0x140e   :  { %4129 = vmatprep.subr.bf16.mxu1 %v4346_v24  ;;  %4135 = vmatprep.subr.bf16.mxu0 %v4346_v24 }
0x14d3   :  { %v2483_v48 = vpop.f32.mrb[24].mxu1  ;;  %v2560_v5 = vpop.f32.mrb[26].mxu0 }
0x14d4   :  { %2565 = vrot.lane.b32.xlu0 %v2560_v5, %s4349_s0  ;;  %v3841_v11 = vpop.f32.mrb[25].mxu1  ;;  %v3852_v12 = vpop.f32.mrb[27].mxu0  ;;  %v2487_v20 = vadd.f32 %v2483_v48, %v2412_v17 }
0x14d6   :  { %v3363_v21 = vmul.f32 -1.442695, %v2487_v20 }
0x14db   :  { %v2641_v13 = vpop.f32.mrb[26].mxu1  ;;  %v2717_v14 = vpop.f32.mrb[28].mxu0 }
0x14dc   :  { %v3874_v15 = vpop.f32.mrb[29].mxu0  ;;  %2646 = vrot.lane.b32.xlu1 %v2641_v13, %s4343_s22  ;;  %v3863_v16 = vpop.f32.mrb[27].mxu1 }
0x1546   :  { %v2566_v28 = vpop.permute.xlu0 %2565 }
0x1547   :  { %v2568_v29 = vadd.f32 %v2566_v28, %v2412_v17 }
0x1549   :  { %v3365_v31 = vmul.f32 -1.442695, %v2568_v29  ;;  %v3131_v29 = vld [vmem:[%s4863_s4 + $0x18] sm:$0xff] }
0x154e   :  { %v2647_v56 = vpop.permute.xlu1 %2646 }
0x154f   :  { %v2649_v18 = vadd.f32 %v2647_v56, %v2412_v17 }
0x1551   :  { %4287 = vtanh.f32 %v2649_v18 }
0x1552   :  { %4289 = vpow2.f32 %v3363_v21 }
0x155b   :  { %v4288_v30 = vpop.eup %4287 }
0x155c   :  { %2739 = vrot.lane.b32.xlu1 %v4288_v30, %s4343_s22  ;;  %v4290_v22 = vpop.eup %4289 }
0x155d   :  { %v2491_v23 = vadd.f32 1.0, %v4290_v22 }
0x155f   :  { %4291 = vrcp.f32 %v2491_v23 }
0x1560   :  { %2734 = vrot.lane.b32.xlu1 %v2732_v19, %s4349_s0  ;;  %4293 = vpow2.f32 %v3365_v31 }
0x1564   :  { %2722 = vrot.lane.b32.xlu1 %v2717_v14, %s4344_s23 }
0x1569   :  { %v4292_v25 = vpop.eup %4291 }
0x156a   :  { %v4294_v32 = vpop.eup %4293 }
0x156b   :  { %v2572_v34 = vadd.f32 1.0, %v4294_v32 }
0x156d   :  { %4295 = vrcp.f32 %v2572_v34 }
0x1577   :  { %v4296_v36 = vpop.eup %4295 }
0x15ce   :  { %v2740_v26 = vpop.permute.xlu1 %2739 }
0x15cf   :  { %v2742_v27 = vmul.f32 %v4292_v25, %v2740_v26  ;;  %v3128_v25 = vld [vmem:[%s4863_s4] sm:$0xff]  ;;  %v3129_v26 = vld [vmem:[%s4863_s4 + $0x8] sm:$0xff] }
0x15d0   :  { %v4142_v28 = vpack.c.bf16 %v3129_v26, %v3128_v25 }
0x15d1   :  { %2744 = vrot.lane.b32.xlu0 %v2742_v27, %s4349_s0  ;;  %v3130_v27 = vld [vmem:[%s4863_s4 + $0x10] sm:$0xff] }
0x15d2   :  { %v2735_v35 = vpop.permute.xlu1 %2734  ;;  %v4145_v31 = vpack.c.bf16 %v3131_v29, %v3130_v27 }
0x15d3   :  { %v2737_v37 = vmul.f32 %v4296_v36, %v2735_v35  ;;  %v3213_v36 = vld [vmem:[%s4865_s6] sm:$0xff] }
0x15d6   :  { %v2723_v41 = vpop.permute.xlu1 %2722 }
0x15d7   :  { %v2725_v42 = vadd.f32 %v2723_v41, %v2412_v17 }
0x15d9   :  { %v3368_v43 = vmul.f32 -1.442695, %v2725_v42 }
0x1643   :  { %v2745_v38 = vpop.permute.xlu0 %2744 }
0x1644   :  { %v2747_v39 = vadd.f32 %v2745_v38, %v2737_v37  ;;  %v3214_v37 = vld [vmem:[%s4865_s6 + $0x8] sm:$0xff] }
0x1645   :  { %v4148_v38 = vpack.c.bf16 %v3214_v37, %v3213_v36 }
0x1646   :  { %4297 = vtanh.f32 %v2747_v39 }
0x1647   :  { %4299 = vpow2.f32 %v3368_v43 }
0x1650   :  { %v4298_v40 = vpop.eup %4297 }
0x1651   :  { %2750 = vrot.lane.b32.xlu0 %v4298_v40, %s4343_s22  ;;  %v4300_v44 = vpop.eup %4299 }
0x1652   :  { %v2729_v45 = vadd.f32 1.0, %v4300_v44 }
0x1654   :  { %4301 = vrcp.f32 %v2729_v45  ;;  %v3215_v45 = vld [vmem:[%s4865_s6 + $0x10] sm:$0xff] }
0x165e   :  { %v4302_v46 = vpop.eup %4301 }
0x16c3   :  { %v2751_v49 = vpop.permute.xlu0 %2750 }
0x16c4   :  { %v2753_v50 = vmul.f32 %v4302_v46, %v2751_v49  ;;  %v3216_v46 = vld [vmem:[%s4865_s6 + $0x18] sm:$0xff]  ;;  %v3376_v49 = vld [vmem:[%s4864_s5] ss:$0 sm:$0xff]  ;;  %s4319_s6 = scalar_lea.vmem %s3306_s12, 32 }
0x16c5   :  { %p4320_p0 = scmp.ne.s32.totalorder %s3306_s12, %s4319_s6  ;;  %p4325_p2 = scmp.lt.s32.totalorder %s4319_s6, %s4319_s6 }
0x16c6   :  { %2760 = vrot.lane.b32.xlu1 %v2753_v50, %s4349_s0 }
0x16c7   :  { %p4326_p3 = por %p4325_p2, %p4324_p1 }
0x16c9   :  { %p4327_p4 = pnand %p4326_p3, %p4320_p0 }
0x16ca   :  { %2755 = vrot.lane.b32.xlu1 %v2747_v39, %s4344_s23 }
0x1738   :  { %v2761_v52 = vpop.permute.xlu1 %2760 }
0x1739   :  { %2763 = vst.msk [vmem:[#allocation3] sm:$0x3] %vm34_vm0, %v2761_v52  ;;  %v2765_v53 = vadd.f32 %v2764_v51, %v2761_v52 }
0x173b   :  { %2766 = vst.msk [vmem:[#allocation5] sm:$0x3] %vm34_vm0, %v2765_v53 }
0x173c   :  { %v2756_v54 = vpop.permute.xlu1 %2755 }
0x173d   :  { %2758 = vst.msk [vmem:[#allocation4] sm:$0x3] %vm34_vm0, %v2756_v54  ;;  %v3378_v54 = vld [vmem:[%s4866_s7] ss:$0 sm:$0xff] }
0x1740   :  { %v2769_v57 = vld [vmem:[#allocation3] sm:$0x3] }
0x1741   :  { %3884 = vmatmul.mubr.msk.f32.vlgmr.msra.gmra.mrb[28].mxu1 %vm99_vm2, %v2769_v57  ;;  %3895 = vmatmul.mubr.msk.f32.vlgmr.msra.gmra.mrb[30].mxu0 %vm99_vm2, %v2769_v57 }
0x1742   :  { %4131 = vmatpush3.bf16.msra.mxu1 %v4481_v47  ;;  %4137 = vmatpush3.bf16.msra.mxu0 %v4497_v63  ;;  %v3120_v40 = vld [vmem:[#allocation5] sm:$0x3] }
0x1743   :  { %4132 = vmatprep.subr.bf16.mxu1 %v4346_v24  ;;  %4138 = vmatprep.subr.bf16.mxu0 %v4346_v24 }
0x1744   :  { %3905 = vmatprep.mubr.msk.f32.mxu1 %vm4348_vm1, %v4347_v33  ;;  %3916 = vmatprep.mubr.msk.f32.mxu0 %vm4348_vm1, %v4347_v33 }
0x1746   :  { %4134 = vmatpush3.bf16.msra.mxu1 %v4489_v55  ;;  %4140 = vmatpush3.bf16.msra.mxu0 %v4501_v0 }
0x1747   :  { %4141 = vmatprep.subr.bf16.mxu1 %v4346_v24  ;;  %4147 = vmatprep.subr.bf16.mxu0 %v4346_v24 }
0x1749   :  { %3906 = vmatmul.mubr.msk.f32.vlgmr.msra.gmra.mrb[30].mxu1 %vm99_vm2, %v2769_v57  ;;  %3917 = vmatmul.mubr.msk.f32.vlgmr.msra.gmra.mrb[32].mxu0 %vm99_vm2, %v2769_v57 }
0x174a   :  { %3927 = vmatprep.mubr.msk.f32.mxu1 %vm4348_vm1, %v4347_v33  ;;  %3938 = vmatprep.mubr.msk.f32.mxu0 %vm4348_vm1, %v4347_v33  ;;  %v3088_v33 = vld [vmem:[#allocation4] sm:$0x3] }
0x174b   :  { %4143 = vmatpush3.bf16.msra.mxu1 %v4142_v28  ;;  %4149 = vmatpush3.bf16.msra.mxu0 %v4148_v38 }
0x174c   :  { %4144 = vmatprep.subr.bf16.mxu1 %v4346_v24  ;;  %4150 = vmatprep.subr.bf16.mxu0 %v4346_v24  ;;  %v4151_v24 = vpack.c.bf16 %v3216_v46, %v3215_v45 }
0x174f   :  { %4146 = vmatpush3.bf16.msra.mxu1 %v4145_v31  ;;  %4152 = vmatpush3.bf16.msra.mxu0 %v4151_v24 }
0x1814   :  { %v2839_v47 = vpop.f32.mrb[28].mxu1  ;;  %v2916_v63 = vpop.f32.mrb[30].mxu0 }
0x1815   :  { %2921 = vrot.lane.b32.xlu1 %v2916_v63, %s4349_s0  ;;  %v3885_v55 = vpop.f32.mrb[29].mxu1  ;;  %v3896_v0 = vpop.f32.mrb[31].mxu0  ;;  %v2843_v4 = vadd.f32 %v2839_v47, %v2768_v62 }
0x1817   :  { %v3370_v6 = vmul.f32 -1.442695, %v2843_v4 }
0x181c   :  { %v2997_v58 = vpop.f32.mrb[30].mxu1  ;;  %v3073_v59 = vpop.f32.mrb[32].mxu0 }
0x181d   :  { %v3918_v60 = vpop.f32.mrb[33].mxu0  ;;  %3002 = vrot.lane.b32.xlu0 %v2997_v58, %s4343_s22  ;;  %v3907_v61 = vpop.f32.mrb[31].mxu1 }
0x1887   :  { %v2922_v5 = vpop.permute.xlu1 %2921 }
0x1888   :  { %v2924_v11 = vadd.f32 %v2922_v5, %v2768_v62 }
0x188a   :  { %v3372_v12 = vmul.f32 -1.442695, %v2924_v11 }
0x188f   :  { %v3003_v1 = vpop.permute.xlu0 %3002 }
0x1890   :  { %v3005_v2 = vadd.f32 %v3003_v1, %v2768_v62 }
0x1892   :  { %4303 = vtanh.f32 %v3005_v2 }
0x1893   :  { %4305 = vpow2.f32 %v3370_v6 }
0x189c   :  { %v4304_v3 = vpop.eup %4303 }
0x189d   :  { %3095 = vrot.lane.b32.xlu0 %v4304_v3, %s4343_s22  ;;  %v4306_v7 = vpop.eup %4305 }
0x189e   :  { %v2847_v8 = vadd.f32 1.0, %v4306_v7 }
0x18a0   :  { %4307 = vrcp.f32 %v2847_v8 }
0x18a1   :  { %3090 = vrot.lane.b32.xlu0 %v3088_v33, %s4349_s0  ;;  %4309 = vpow2.f32 %v3372_v12 }
0x18a5   :  { %3078 = vrot.lane.b32.xlu0 %v3073_v59, %s4344_s23 }
0x18aa   :  { %v4308_v9 = vpop.eup %4307 }
0x18ab   :  { %v4310_v13 = vpop.eup %4309 }
0x18ac   :  { %v2928_v14 = vadd.f32 1.0, %v4310_v13 }
0x18ae   :  { %4311 = vrcp.f32 %v2928_v14 }
0x18b8   :  { %v4312_v16 = vpop.eup %4311 }
0x190f   :  { %v3096_v10 = vpop.permute.xlu0 %3095 }
0x1910   :  { %v3098_v48 = vmul.f32 %v4308_v9, %v3096_v10 }
0x1912   :  { %3100 = vrot.lane.b32.xlu1 %v3098_v48, %s4349_s0 }
0x1913   :  { %v3091_v15 = vpop.permute.xlu0 %3090 }
0x1914   :  { %v3093_v17 = vmul.f32 %v4312_v16, %v3091_v15 }
0x1917   :  { %v3079_v19 = vpop.permute.xlu0 %3078 }
0x1918   :  { %v3081_v20 = vadd.f32 %v3079_v19, %v2768_v62 }
0x191a   :  { %v3375_v21 = vmul.f32 -1.442695, %v3081_v20 }
0x1984   :  { %v3101_v56 = vpop.permute.xlu1 %3100 }
0x1985   :  { %v3103_v18 = vadd.f32 %v3101_v56, %v3093_v17 }
0x1987   :  { %4313 = vtanh.f32 %v3103_v18 }
0x1988   :  { %4315 = vpow2.f32 %v3375_v21 }
0x1991   :  { %v4314_v30 = vpop.eup %4313 }
0x1992   :  { %3106 = vrot.lane.b32.xlu1 %v4314_v30, %s4343_s22  ;;  %v4316_v22 = vpop.eup %4315 }
0x1993   :  { %v3085_v23 = vadd.f32 1.0, %v4316_v22 }
0x1995   :  { %4317 = vrcp.f32 %v3085_v23 }
0x1996   :  { %3111 = vrot.lane.b32.xlu1 %v3103_v18, %s4344_s23 }
0x199f   :  { %v4318_v32 = vpop.eup %4317 }
0x1a04   :  { %v3107_v34 = vpop.permute.xlu1 %3106 }
0x1a05   :  { %v3109_v35 = vmul.f32 %v4318_v32, %v3107_v34 }
0x1a07   :  { %3116 = vrot.lane.b32.xlu0 %v3109_v35, %s4349_s0 }
0x1a08   :  { %v3112_v39 = vpop.permute.xlu1 %3111 }
0x1a09   :  { %3114 = vst.msk [vmem:[#allocation4] sm:$0x3] %vm34_vm0, %v3112_v39 }
0x1a79   :  { %v3117_v41 = vpop.permute.xlu0 %3116 }
0x1a7a   :  { %3119 = vst.msk [vmem:[#allocation3] sm:$0x3] %vm34_vm0, %v3117_v41  ;;  %v3121_v42 = vadd.f32 %v3120_v40, %v3117_v41 }
0x1a7c   :  { %3122 = vst.msk [vmem:[#allocation5] sm:$0x3] %vm34_vm0, %v3121_v42 }
0x1a83   :  { %v3126_v43 = vld [vmem:[#allocation5] sm:$0x3] }
0x1a84   :  { %v3127_v44 = vmul.f32 0.125, %v3126_v43 }
0x1a86   :  { %3928 = vmatmul.mubr.msk.f32.vlgmr.msra.gmra.mrb[32].mxu1 %vm99_vm2, %v3127_v44 }
0x1b59   :  { %v3208_v50 = vpop.f32.mrb[32].mxu1 }
0x1b5a   :  { %v3209_v51 = vadd.f32 %v3376_v49, %v3208_v50  ;;  %v3929_v52 = vpop.f32.mrb[33].mxu1 }
0x1b5c   :  { %v3212_v53 = vmax.f32 %v3209_v51, 0.0 }
0x1b5e   :  { %3939 = vmatmul.mubr.msk.f32.vlgmr.msra.gmra.mrb[34].mxu0 %vm99_vm2, %v3212_v53 }
0x1c31   :  { %v3293_v57 = vpop.f32.mrb[34].mxu0 }
0x1c32   :  { %v3294_v47 = vadd.f32 %v3378_v54, %v3293_v57  ;;  %v3940_v63 = vpop.f32.mrb[35].mxu0 }
0x1c34   :  { %3298 = vst.msk [vmem:[#allocation6] sm:$0x3] %vm3297_vm3, %v3294_v47 }
0x1c35   :  { %4330 = shalt.err (!%p4327_p4)
}
0x1c36   :  { %s4331_s14 = scalar_lea.hbm %s4867_s8, 32 }
0x1c37   :  { %p4332_p5 = scmp.ne.s32.totalorder %s4867_s8, %s4331_s14  ;;  %p4335_p6 = scmp.lt.u32.totalorder %s4331_s14, %s4867_s8 }
0x1c39   :  { %p4337_p7 = pnand %p4335_p6, %p4332_p5 }
0x1c3b   :  { %4340 = shalt.err (!%p4337_p7)
}
0x1c3c   :  { %3308 = dma.vmem_to_hbm [thread:$0]  %s3306_s12, 32, %s4867_s8, [#allocation7]  }
0x1c3d   :  { %4341 = dma.done.wait [#allocation7], 32  }
0x1c3e   :  { %4342 = vsyncadd [#allocation7], 4294967264 }
0x1c3f   :  { %3312 = vsyncpa [#allocation7], 1 }

</bundles_post_ra>
